<compile_context>
chip_gen: v6e
topology: v6e:2x2x1
jax: 0.10.0
libtpu: 0.0.40
codegen_flags: <defaults>
</compile_context>

<pallas_src>
import jax
import jax.numpy as jnp
from jax.experimental import pallas as pl
from jax.experimental.pallas import tpu as pltpu


def _round_up(n, m):
    return ((n + m - 1) // m) * m


def _cdiv(a, b):
    return -(-a // b)


def _default_elementwise_dtype():
    """bf16 elementwise on bf16-native VPUs (v6e/v7x); f32 on older generations."""
    try:
        kind = jax.devices()[0].device_kind.lower()
    except Exception:
        return jnp.bfloat16
    if any(g in kind for g in ("v2", "v3", "v4", "v5")):
        return jnp.float32
    return jnp.bfloat16


def _choose_tile_b(B, tile_b):
    """Clamp the batch tile to the batch, keep it 8-aligned, and rebalance so that
    (a) batches > 512 rows get >= 2 tiles (v7x dual TensorCore) and (b) padding never
    exceeds one 8-row slab per tile."""
    B8 = _round_up(max(B, 1), 8)
    tile_b = max(8, min(_round_up(tile_b, 8), B8))
    num_tiles = _cdiv(B8, tile_b)
    if B8 > 512 and num_tiles < 2:
        num_tiles = 2
    return _round_up(_cdiv(B8, num_tiles), 8)


def _make_resnet_kernel(ew_dtype):
    f32, bf16 = jnp.float32, jnp.bfloat16

    def kernel(x_ref,
               w_in_ref, b_in_ref,
               w1a_ref, b1a_ref, w1b_ref, b1b_ref,
               w2a_ref, b2a_ref, w2b_ref, b2b_ref,
               w_out_ref, b_out_ref,
               o_ref):
        def linear_relu(a, w_ref, b_ref):
            # bf16 MXU operands, f32 accumulation; bias-add in f32 straight off the
            # MXU result, then drop to the elementwise dtype for the ReLU onwards.
            y = jnp.dot(a.astype(bf16), w_ref[...],
                        preferred_element_type=f32) + b_ref[...]
            return jnp.maximum(y.astype(ew_dtype), 0.0)

        x = x_ref[...]                                   # bf16 [tile_b, D]

        # input_layer + ReLU
        h = linear_relu(x, w_in_ref, b_in_ref)           # [tile_b, 256]
        residual = h

        # res_block1: Linear -> ReLU -> Dropout(id) -> Linear -> ReLU, then residual
        r = linear_relu(h, w1a_ref, b1a_ref)
        r = linear_relu(r, w1b_ref, b1b_ref)
        h = r + residual                                 # Dropout(id) after the add

        # res_block2: Linear(256,128) -> ReLU -> Dropout(id) -> Linear(128,128) -> ReLU
        r = linear_relu(h, w2a_ref, b2a_ref)             # [tile_b, 128]
        y = jnp.dot(r.astype(bf16), w2b_ref[...],
                    preferred_element_type=f32) + b2b_ref[...]
        r = jnp.maximum(y, 0.0)                          # keep f32 for the transpose

        # output_layer Linear(128, 1), lane-major: [8,128] @ [128,tile_b] on the MXU
        # (only row 0 of the lhs is real; M=8 keeps a full sublane slab).  Output is
        # a lane-dense (1, 1, tile_b) block -> a handful of stores, not tile_b/8.
        outs = jnp.dot(w_out_ref[...], r.T, preferred_element_type=f32)  # [8, tile_b]
        row = outs[0:1, :] + b_out_ref[...]              # (1, tile_b)
        o_ref[...] = row[jnp.newaxis].astype(o_ref.dtype)

    return kernel


def torch_resnet_forward(x, params, *, tile_b=1024, elementwise_dtype=None):
    """x: [B, input_dim] float32.  Weights [in, out] bf16 (w_out is an [8, 128] f32
    slab with row 0 real), biases [1, out] f32.  Arbitrary B: the batch is zero-padded
    up to a tile multiple and sliced back."""
    B, D = x.shape
    ew_dtype = elementwise_dtype if elementwise_dtype is not None else _default_elementwise_dtype()

    tile_b = _choose_tile_b(B, tile_b)
    B_pad = _round_up(B, tile_b)
    num_tiles = B_pad // tile_b

    x = x.astype(jnp.bfloat16)                 # halve the x DMA; kernel consumes bf16
    if B_pad != B:
        x = jnp.pad(x, ((0, B_pad - B), (0, 0)))

    weight_order = ["w_in", "b_in", "w1a", "b1a", "w1b", "b1b",
                    "w2a", "b2a", "w2b", "b2b", "w_out", "b_out"]
    weights = [params[k] for k in weight_order]

    def full_spec(arr):
        # Whole (small) parameter array as one block; constant index_map keeps it
        # VMEM-resident across grid steps (the pipeline elides repeat DMAs).
        nd = arr.ndim
        return pl.BlockSpec(arr.shape, lambda i, _nd=nd: (0,) * _nd)

    in_specs = ([pl.BlockSpec((tile_b, D), lambda i: (i, 0))]
                + [full_spec(w) for w in weights])
    # Lane-dense output: one (1, 1, tile_b) block per grid step.
    out_specs = pl.BlockSpec((1, 1, tile_b), lambda i: (i, 0, 0))

    cp_kwargs = dict(dimension_semantics=("parallel",))
    if tile_b > 1024:
        # Only needed for very large tiles; keep headroom on v7x's 64 MiB VMEM.
        cp_kwargs["vmem_limit_bytes"] = 48 * 1024 * 1024

    out3 = pl.pallas_call(
        _make_resnet_kernel(ew_dtype),
        out_shape=jax.ShapeDtypeStruct((num_tiles, 1, tile_b), jnp.float32),
        grid_spec=pltpu.PrefetchScalarGridSpec(
            num_scalar_prefetch=0,
            grid=(num_tiles,),
            in_specs=in_specs,
            out_specs=out_specs,
        ),
        compiler_params=pltpu.CompilerParams(**cp_kwargs),
    )(x, *weights)

    return out3.reshape(B_pad, 1)[:B]


def init_params(input_dim, key):
    """Deterministic init.  Weights [in, out] bf16 (transposed vs torch), biases
    [1, out] f32.  w_out is an [8, 128] f32 slab (row 0 real, rows 1..7 padding) for
    the lane-major MXU output layer."""
    dims = [
        ("w_in", (input_dim, 256)), ("b_in", (1, 256)),
        ("w1a", (256, 256)), ("b1a", (1, 256)),
        ("w1b", (256, 256)), ("b1b", (1, 256)),
        ("w2a", (256, 128)), ("b2a", (1, 128)),
        ("w2b", (128, 128)), ("b2b", (1, 128)),
        ("w_out", (1, 128)), ("b_out", (1, 1)),
    ]
    keys = jax.random.split(key, len(dims))
    params = {}
    for (name, shape), k in zip(dims, keys):
        p = (0.05 * jax.random.normal(k, shape)).astype(jnp.float32)
        if name.startswith("w") and name != "w_out":
            p = p.astype(jnp.bfloat16)
        params[name] = p
    params["w_out"] = jnp.tile(params["w_out"], (8, 1))   # [8, 128] f32, row 0 real
    return params


def reference_forward(x, p, elementwise_dtype=jnp.float32):
    """Pure-JAX reference mirroring the kernel numerics (bf16 matmul operands, f32
    accumulation, elementwise in `elementwise_dtype`, f32 output head)."""
    f32, bf16 = jnp.float32, jnp.bfloat16
    ew = elementwise_dtype

    def lin_relu(a, w, b):
        y = jnp.dot(a.astype(bf16), w.astype(bf16), preferred_element_type=f32) + b
        return jnp.maximum(y.astype(ew), 0.0)

    x = x.astype(bf16)
    h = lin_relu(x, p["w_in"], p["b_in"])
    residual = h
    r = lin_relu(h, p["w1a"], p["b1a"])
    r = lin_relu(r, p["w1b"], p["b1b"])
    h = r + residual
    r = lin_relu(h, p["w2a"], p["b2a"])
    y = jnp.dot(r.astype(bf16), p["w2b"], preferred_element_type=f32) + p["b2b"]
    r = jnp.maximum(y, 0.0)
    w_row = p["w_out"][0:1]                               # (1, 128) f32
    return jnp.dot(r, w_row.T, preferred_element_type=f32) + p["b_out"]


if __name__ == "__main__":
    key = jax.random.PRNGKey(0)
    k_x, k_p = jax.random.split(key)

    B, input_dim = 500, 16
    x = jax.random.normal(k_x, (B, input_dim), dtype=jnp.float32)
    params = init_params(input_dim, k_p)

    # Default path: one big (504-row) tile.
    out = torch_resnet_forward(x, params)
    out = jax.block_until_ready(out)

    # Forced small tile: exercises the multi-step grid + batch-padding path.
    out_multi = torch_resnet_forward(x, params, tile_b=128)
    out_multi = jax.block_until_ready(out_multi)

    ew = _default_elementwise_dtype()
    ref = reference_forward(x, params, ew)

    assert out.shape == (B, 1)
    assert out_multi.shape == (B, 1)
    assert jnp.allclose(out, ref, atol=2e-3, rtol=2e-2), "mismatch vs pure-JAX reference"
    assert jnp.allclose(out_multi, ref, atol=2e-3, rtol=2e-2), "multi-tile mismatch vs reference"

    print("KERNEL_OK")
</pallas_src>

<mosaic_0001>
module attributes {stable_mosaic.version = 11 : i64} {
  func.func @kernel(%arg0: i32, %arg1: memref<504x16xbf16, #tpu.memory_space<vmem>>, %arg2: memref<16x256xbf16, #tpu.memory_space<vmem>>, %arg3: memref<1x256xf32, #tpu.memory_space<vmem>>, %arg4: memref<256x256xbf16, #tpu.memory_space<vmem>>, %arg5: memref<1x256xf32, #tpu.memory_space<vmem>>, %arg6: memref<256x256xbf16, #tpu.memory_space<vmem>>, %arg7: memref<1x256xf32, #tpu.memory_space<vmem>>, %arg8: memref<256x128xbf16, #tpu.memory_space<vmem>>, %arg9: memref<1x128xf32, #tpu.memory_space<vmem>>, %arg10: memref<128x128xbf16, #tpu.memory_space<vmem>>, %arg11: memref<1x128xf32, #tpu.memory_space<vmem>>, %arg12: memref<8x128xf32, #tpu.memory_space<vmem>>, %arg13: memref<1x1xf32, #tpu.memory_space<vmem>>, %arg14: memref<1x1x504xf32, #tpu.memory_space<vmem>>) attributes {dimension_semantics = [#tpu.dimension_semantics<parallel>], iteration_bounds = array<i64: 1>, scalar_prefetch = 0 : i64, scratch_operands = 0 : i64, tpu.core_type = #tpu.core_type<tc>, window_params = [{transform_indices = @transform_0, window_bounds = array<i64: 504, 16>}, {pipeline_mode = #tpu.pipeline_mode<synchronous>, transform_indices = @transform_1, window_bounds = array<i64: 16, 256>}, {pipeline_mode = #tpu.pipeline_mode<synchronous>, transform_indices = @transform_2, window_bounds = array<i64: 1, 256>}, {pipeline_mode = #tpu.pipeline_mode<synchronous>, transform_indices = @transform_3, window_bounds = array<i64: 256, 256>}, {pipeline_mode = #tpu.pipeline_mode<synchronous>, transform_indices = @transform_4, window_bounds = array<i64: 1, 256>}, {pipeline_mode = #tpu.pipeline_mode<synchronous>, transform_indices = @transform_5, window_bounds = array<i64: 256, 256>}, {pipeline_mode = #tpu.pipeline_mode<synchronous>, transform_indices = @transform_6, window_bounds = array<i64: 1, 256>}, {pipeline_mode = #tpu.pipeline_mode<synchronous>, transform_indices = @transform_7, window_bounds = array<i64: 256, 128>}, {pipeline_mode = #tpu.pipeline_mode<synchronous>, transform_indices = @transform_8, window_bounds = array<i64: 1, 128>}, {pipeline_mode = #tpu.pipeline_mode<synchronous>, transform_indices = @transform_9, window_bounds = array<i64: 128, 128>}, {pipeline_mode = #tpu.pipeline_mode<synchronous>, transform_indices = @transform_10, window_bounds = array<i64: 1, 128>}, {pipeline_mode = #tpu.pipeline_mode<synchronous>, transform_indices = @transform_11, window_bounds = array<i64: 8, 128>}, {pipeline_mode = #tpu.pipeline_mode<synchronous>, transform_indices = @transform_12, window_bounds = array<i64: 1, 1>}, {transform_indices = @transform_13, window_bounds = array<i64: 1, 1, 504>}]} {
    %c0 = arith.constant 0 : index
    %c0_0 = arith.constant 0 : index
    %0 = vector.load %arg1[%c0, %c0_0] : memref<504x16xbf16, #tpu.memory_space<vmem>>, vector<504x16xbf16>
    %c0_1 = arith.constant 0 : index
    %c0_2 = arith.constant 0 : index
    %1 = vector.load %arg2[%c0_1, %c0_2] : memref<16x256xbf16, #tpu.memory_space<vmem>>, vector<16x256xbf16>
    %cst = arith.constant dense<0.000000e+00> : vector<504x256xf32>
    %2 = tpu.matmul %0, %1, %cst {dimension_numbers = #tpu.dot_dimension_numbers<[1], [0], [0], [1], [0, 0, 1, 1], [], []>} : vector<504x16xbf16>, vector<16x256xbf16>, vector<504x256xf32> -> vector<504x256xf32>
    %c0_3 = arith.constant 0 : index
    %c0_4 = arith.constant 0 : index
    %3 = vector.load %arg3[%c0_3, %c0_4] : memref<1x256xf32, #tpu.memory_space<vmem>>, vector<1x256xf32>
    %4 = vector.broadcast %3 : vector<1x256xf32> to vector<504x256xf32>
    %5 = arith.addf %2, %4 : vector<504x256xf32>
    %6 = arith.truncf %5 : vector<504x256xf32> to vector<504x256xbf16>
    %cst_5 = arith.constant 0.000000e+00 : bf16
    %7 = vector.broadcast %cst_5 : bf16 to vector<504x256xbf16>
    %8 = arith.maximumf %6, %7 : vector<504x256xbf16>
    %c0_6 = arith.constant 0 : index
    %c0_7 = arith.constant 0 : index
    %9 = vector.load %arg4[%c0_6, %c0_7] : memref<256x256xbf16, #tpu.memory_space<vmem>>, vector<256x256xbf16>
    %cst_8 = arith.constant dense<0.000000e+00> : vector<504x256xf32>
    %10 = tpu.matmul %8, %9, %cst_8 {dimension_numbers = #tpu.dot_dimension_numbers<[1], [0], [0], [1], [0, 0, 1, 1], [], []>} : vector<504x256xbf16>, vector<256x256xbf16>, vector<504x256xf32> -> vector<504x256xf32>
    %c0_9 = arith.constant 0 : index
    %c0_10 = arith.constant 0 : index
    %11 = vector.load %arg5[%c0_9, %c0_10] : memref<1x256xf32, #tpu.memory_space<vmem>>, vector<1x256xf32>
    %12 = vector.broadcast %11 : vector<1x256xf32> to vector<504x256xf32>
    %13 = arith.addf %10, %12 : vector<504x256xf32>
    %14 = arith.truncf %13 : vector<504x256xf32> to vector<504x256xbf16>
    %cst_11 = arith.constant 0.000000e+00 : bf16
    %15 = vector.broadcast %cst_11 : bf16 to vector<504x256xbf16>
    %16 = arith.maximumf %14, %15 : vector<504x256xbf16>
    %c0_12 = arith.constant 0 : index
    %c0_13 = arith.constant 0 : index
    %17 = vector.load %arg6[%c0_12, %c0_13] : memref<256x256xbf16, #tpu.memory_space<vmem>>, vector<256x256xbf16>
    %cst_14 = arith.constant dense<0.000000e+00> : vector<504x256xf32>
    %18 = tpu.matmul %16, %17, %cst_14 {dimension_numbers = #tpu.dot_dimension_numbers<[1], [0], [0], [1], [0, 0, 1, 1], [], []>} : vector<504x256xbf16>, vector<256x256xbf16>, vector<504x256xf32> -> vector<504x256xf32>
    %c0_15 = arith.constant 0 : index
    %c0_16 = arith.constant 0 : index
    %19 = vector.load %arg7[%c0_15, %c0_16] : memref<1x256xf32, #tpu.memory_space<vmem>>, vector<1x256xf32>
    %20 = vector.broadcast %19 : vector<1x256xf32> to vector<504x256xf32>
    %21 = arith.addf %18, %20 : vector<504x256xf32>
    %22 = arith.truncf %21 : vector<504x256xf32> to vector<504x256xbf16>
    %cst_17 = arith.constant 0.000000e+00 : bf16
    %23 = vector.broadcast %cst_17 : bf16 to vector<504x256xbf16>
    %24 = arith.maximumf %22, %23 : vector<504x256xbf16>
    %25 = arith.addf %24, %8 : vector<504x256xbf16>
    %c0_18 = arith.constant 0 : index
    %c0_19 = arith.constant 0 : index
    %26 = vector.load %arg8[%c0_18, %c0_19] : memref<256x128xbf16, #tpu.memory_space<vmem>>, vector<256x128xbf16>
    %cst_20 = arith.constant dense<0.000000e+00> : vector<504x128xf32>
    %27 = tpu.matmul %25, %26, %cst_20 {dimension_numbers = #tpu.dot_dimension_numbers<[1], [0], [0], [1], [0, 0, 1, 1], [], []>} : vector<504x256xbf16>, vector<256x128xbf16>, vector<504x128xf32> -> vector<504x128xf32>
    %c0_21 = arith.constant 0 : index
    %c0_22 = arith.constant 0 : index
    %28 = vector.load %arg9[%c0_21, %c0_22] : memref<1x128xf32, #tpu.memory_space<vmem>>, vector<1x128xf32>
    %29 = vector.broadcast %28 : vector<1x128xf32> to vector<504x128xf32>
    %30 = arith.addf %27, %29 : vector<504x128xf32>
    %31 = arith.truncf %30 : vector<504x128xf32> to vector<504x128xbf16>
    %cst_23 = arith.constant 0.000000e+00 : bf16
    %32 = vector.broadcast %cst_23 : bf16 to vector<504x128xbf16>
    %33 = arith.maximumf %31, %32 : vector<504x128xbf16>
    %c0_24 = arith.constant 0 : index
    %c0_25 = arith.constant 0 : index
    %34 = vector.load %arg10[%c0_24, %c0_25] : memref<128x128xbf16, #tpu.memory_space<vmem>>, vector<128x128xbf16>
    %cst_26 = arith.constant dense<0.000000e+00> : vector<504x128xf32>
    %35 = tpu.matmul %33, %34, %cst_26 {dimension_numbers = #tpu.dot_dimension_numbers<[1], [0], [0], [1], [0, 0, 1, 1], [], []>} : vector<504x128xbf16>, vector<128x128xbf16>, vector<504x128xf32> -> vector<504x128xf32>
    %c0_27 = arith.constant 0 : index
    %c0_28 = arith.constant 0 : index
    %36 = vector.load %arg11[%c0_27, %c0_28] : memref<1x128xf32, #tpu.memory_space<vmem>>, vector<1x128xf32>
    %37 = vector.broadcast %36 : vector<1x128xf32> to vector<504x128xf32>
    %38 = arith.addf %35, %37 : vector<504x128xf32>
    %cst_29 = arith.constant 0.000000e+00 : f32
    %39 = vector.broadcast %cst_29 : f32 to vector<504x128xf32>
    %40 = arith.maximumf %38, %39 : vector<504x128xf32>
    %c0_30 = arith.constant 0 : index
    %c0_31 = arith.constant 0 : index
    %41 = vector.load %arg12[%c0_30, %c0_31] : memref<8x128xf32, #tpu.memory_space<vmem>>, vector<8x128xf32>
    %42 = tpu.transpose %40, [1, 0] : vector<504x128xf32> -> vector<128x504xf32>
    %cst_32 = arith.constant dense<0.000000e+00> : vector<8x504xf32>
    %43 = tpu.matmul %41, %42, %cst_32 {dimension_numbers = #tpu.dot_dimension_numbers<[1], [0], [0], [1], [0, 0, 1, 1], [], []>} : vector<8x128xf32>, vector<128x504xf32>, vector<8x504xf32> -> vector<8x504xf32>
    %44 = vector.extract_strided_slice %43 {offsets = [0, 0], sizes = [1, 504], strides = [1, 1]} : vector<8x504xf32> to vector<1x504xf32>
    %c0_33 = arith.constant 0 : index
    %c0_34 = arith.constant 0 : index
    %45 = vector.load %arg13[%c0_33, %c0_34] : memref<1x1xf32, #tpu.memory_space<vmem>>, vector<1x1xf32>
    %46 = vector.broadcast %45 : vector<1x1xf32> to vector<1x504xf32>
    %47 = arith.addf %44, %46 : vector<1x504xf32>
    %48 = vector.shape_cast %47 : vector<1x504xf32> to vector<1x1x504xf32>
    %c0_35 = arith.constant 0 : index
    %c0_36 = arith.constant 0 : index
    %c0_37 = arith.constant 0 : index
    %49 = vector.load %arg14[%c0_35, %c0_36, %c0_37] : memref<1x1x504xf32, #tpu.memory_space<vmem>>, vector<1x1x504xf32>
    tpu.vector_store %arg14[%c0_35, %c0_36, %c0_37], %48 {strides = array<i32>} : memref<1x1x504xf32, #tpu.memory_space<vmem>>, vector<1x1x504xf32>,
    return
  }
  func.func @transform_0(%arg0: i32) -> (i32, i32) {
    %c0_i32 = arith.constant 0 : i32
    %c0_i32_0 = arith.constant 0 : i32
    return %arg0, %c0_i32 : i32, i32
  }
  func.func @transform_1(%arg0: i32) -> (i32, i32) {
    %c0_i32 = arith.constant 0 : i32
    %c0_i32_0 = arith.constant 0 : i32
    %c0_i32_1 = arith.constant 0 : i32
    return %c0_i32, %c0_i32_0 : i32, i32
  }
  func.func @transform_2(%arg0: i32) -> (i32, i32) {
    %c0_i32 = arith.constant 0 : i32
    %c0_i32_0 = arith.constant 0 : i32
    %c0_i32_1 = arith.constant 0 : i32
    return %c0_i32, %c0_i32_0 : i32, i32
  }
  func.func @transform_3(%arg0: i32) -> (i32, i32) {
    %c0_i32 = arith.constant 0 : i32
    %c0_i32_0 = arith.constant 0 : i32
    %c0_i32_1 = arith.constant 0 : i32
    return %c0_i32, %c0_i32_0 : i32, i32
  }
  func.func @transform_4(%arg0: i32) -> (i32, i32) {
    %c0_i32 = arith.constant 0 : i32
    %c0_i32_0 = arith.constant 0 : i32
    %c0_i32_1 = arith.constant 0 : i32
    return %c0_i32, %c0_i32_0 : i32, i32
  }
  func.func @transform_5(%arg0: i32) -> (i32, i32) {
    %c0_i32 = arith.constant 0 : i32
    %c0_i32_0 = arith.constant 0 : i32
    %c0_i32_1 = arith.constant 0 : i32
    return %c0_i32, %c0_i32_0 : i32, i32
  }
  func.func @transform_6(%arg0: i32) -> (i32, i32) {
    %c0_i32 = arith.constant 0 : i32
    %c0_i32_0 = arith.constant 0 : i32
    %c0_i32_1 = arith.constant 0 : i32
    return %c0_i32, %c0_i32_0 : i32, i32
  }
  func.func @transform_7(%arg0: i32) -> (i32, i32) {
    %c0_i32 = arith.constant 0 : i32
    %c0_i32_0 = arith.constant 0 : i32
    %c0_i32_1 = arith.constant 0 : i32
    return %c0_i32, %c0_i32_0 : i32, i32
  }
  func.func @transform_8(%arg0: i32) -> (i32, i32) {
    %c0_i32 = arith.constant 0 : i32
    %c0_i32_0 = arith.constant 0 : i32
    %c0_i32_1 = arith.constant 0 : i32
    return %c0_i32, %c0_i32_0 : i32, i32
  }
  func.func @transform_9(%arg0: i32) -> (i32, i32) {
    %c0_i32 = arith.constant 0 : i32
    %c0_i32_0 = arith.constant 0 : i32
    %c0_i32_1 = arith.constant 0 : i32
    return %c0_i32, %c0_i32_0 : i32, i32
  }
  func.func @transform_10(%arg0: i32) -> (i32, i32) {
    %c0_i32 = arith.constant 0 : i32
    %c0_i32_0 = arith.constant 0 : i32
    %c0_i32_1 = arith.constant 0 : i32
    return %c0_i32, %c0_i32_0 : i32, i32
  }
  func.func @transform_11(%arg0: i32) -> (i32, i32) {
    %c0_i32 = arith.constant 0 : i32
    %c0_i32_0 = arith.constant 0 : i32
    %c0_i32_1 = arith.constant 0 : i32
    return %c0_i32, %c0_i32_0 : i32, i32
  }
  func.func @transform_12(%arg0: i32) -> (i32, i32) {
    %c0_i32 = arith.constant 0 : i32
    %c0_i32_0 = arith.constant 0 : i32
    %c0_i32_1 = arith.constant 0 : i32
    return %c0_i32, %c0_i32_0 : i32, i32
  }
  func.func @transform_13(%arg0: i32) -> (i32, i32, i32) {
    %c0_i32 = arith.constant 0 : i32
    %c0_i32_0 = arith.constant 0 : i32
    %c0_i32_1 = arith.constant 0 : i32
    return %arg0, %c0_i32, %c0_i32_0 : i32, i32, i32
  }
}

</mosaic_0001>

<bundles_post_ra>
// kernel: tpu_custom_call.1
= control target key start
LH: loop header
LB: loop body
LE: loop exit
PB: predicated region body
PF: predicated region fallthrough
CT: control target
= control target key end

     0   :  { %s5679_s0 = inlined_call_operand.vmem [shape: bf16[504,16], index: 0, kind: input, shape index: {}]   ;;  %s5680_s1 = inlined_call_operand.vmem [shape: bf16[16,256], index: 1, kind: input, shape index: {}]   ;;  %s5681_s2 = inlined_call_operand.vmem [shape: f32[1,256], index: 2, kind: input, shape index: {}]   ;;  %s5682_s3 = inlined_call_operand.vmem [shape: bf16[256,256], index: 3, kind: input, shape index: {}]   ;;  %s5683_s4 = inlined_call_operand.vmem [shape: f32[1,256], index: 4, kind: input, shape index: {}]   ;;  %s5684_s5 = inlined_call_operand.hbm [shape: bf16[256,256], index: 5, kind: input, shape index: {}]   ;;  %s5685_s6 = inlined_call_operand.vmem [shape: f32[1,256], index: 6, kind: input, shape index: {}]   ;;  %s5686_s7 = inlined_call_operand.hbm [shape: bf16[256,128], index: 7, kind: input, shape index: {}]   ;;  %s5687_s8 = inlined_call_operand.vmem [shape: f32[1,128], index: 8, kind: input, shape index: {}]   ;;  %s5688_s9 = inlined_call_operand.hbm [shape: bf16[128,128], index: 9, kind: input, shape index: {}]   ;;  %s5689_s10 = inlined_call_operand.vmem [shape: f32[1,128], index: 10, kind: input, shape index: {}]   ;;  %s5690_s11 = inlined_call_operand.vmem [shape: f32[8,128], index: 11, kind: input, shape index: {}]   ;;  %s5691_s12 = inlined_call_operand.<no memory space> [shape: f32[1,1], index: 12, kind: input, shape index: {}]   ;;  %s5692_s13 = inlined_call_operand.hbm [shape: f32[1,1,504], index: 13, kind: output, shape index: {}]  }
   0x1   :  { %v18_v0 = vstv %s5691_s12 }
   0x2   :  { %19 = vst [vmem:[#allocation2] sm:$0x1] %v18_v0 }
   0x3   :  { %20 = vsyncpa [#allocation4], 0 }
   0x4   :  { %21 = vsyncpa [#allocation7], 0 }
   0x5   :  { %22 = vsyncpa [#allocation5], 0  ;;  %s4021_s27 = smov [#allocation6]  }
   0x6   :  { %s52_s28 = sshll.u32 %s4021_s27, 4  ;;  %s53_s28 = int_to_ptr.vmem [resolvable:$true] %s52_s28 }
   0x7   :  { %s3943_s29 = scalar_lea.vmem %s53_s28, 2048  ;;  %p3948_p1 = scmp.lt.s32.totalorder %s53_s28, %s53_s28 }
   0x8   :  { %p3944_p0 = scmp.ne.s32.totalorder %s53_s28, %s3943_s29  ;;  %p3949_p2 = scmp.lt.s32.totalorder %s3943_s29, %s3943_s29 }
   0xa   :  { %p3950_p3 = por %p3949_p2, %p3948_p1 }
   0xc   :  { %p3951_p4 = pnand %p3950_p3, %p3944_p0 }
   0xe   :  { %3954 = shalt.err (!%p3951_p4)
}
   0xf   :  { %s4022_s30 = smov 64   ;;  %s4023_s14 = smov 4  }
  0x10   :  { %58 = dma.hbm_to_vmem [thread:$0]  %s5686_s7, 2048, %s53_s28, [#allocation7], %s4022_s30, %s4022_s30, %s4023_s14  }
  0x11   :  { %s4024_s12 = smov [#allocation3]  }
  0x12   :  { %s38_s17 = sshll.u32 %s4024_s12, 4  ;;  %s39_s17 = int_to_ptr.vmem [resolvable:$true] %s38_s17 }
  0x13   :  { %s3963_s18 = scalar_lea.vmem %s39_s17, 4096  ;;  %p3968_p6 = scmp.lt.s32.totalorder %s39_s17, %s39_s17 }
  0x14   :  { %p3964_p5 = scmp.ne.s32.totalorder %s39_s17, %s3963_s18  ;;  %p3969_p7 = scmp.lt.s32.totalorder %s3963_s18, %s3963_s18 }
  0x16   :  { %p3970_p8 = por %p3969_p7, %p3968_p6 }
  0x18   :  { %p3971_p9 = pnand %p3970_p8, %p3964_p5 }
  0x1a   :  { %3974 = shalt.err (!%p3971_p9)
}
  0x1b   :  { %s4025_s19 = smov 128   ;;  %s4026_s20 = smov 8  }
  0x1c   :  { %44 = dma.hbm_to_vmem [thread:$0]  %s5684_s5, 4096, %s39_s17, [#allocation4], %s4025_s19, %s4025_s19, %s4026_s20  }
  0x1d   :  { %s4027_s23 = smov [#allocation8]  }
  0x1e   :  { %s66_s24 = sshll.u32 %s4027_s23, 4  ;;  %s67_s24 = int_to_ptr.vmem [resolvable:$true] %s66_s24 }
  0x1f   :  { %s3983_s7 = scalar_lea.vmem %s67_s24, 1024  ;;  %p3988_p11 = scmp.lt.s32.totalorder %s67_s24, %s67_s24 }
  0x20   :  { %p3984_p10 = scmp.ne.s32.totalorder %s67_s24, %s3983_s7  ;;  %p3989_p12 = scmp.lt.s32.totalorder %s3983_s7, %s3983_s7 }
  0x22   :  { %p3990_p13 = por %p3989_p12, %p3988_p11 }
  0x24   :  { %p3991_p0 = pnand %p3990_p13, %p3984_p10 }
  0x26   :  { %3994 = shalt.err (!%p3991_p0)
}
  0x27   :  { %72 = dma.hbm_to_vmem [thread:$0]  %s5688_s9, 1024, %s67_s24, [#allocation7], %s4022_s30, %s4022_s30, %s4023_s14  }
  0x28   :  { %4015 = dma.done.wait [#allocation4], 4096  }
  0x29   :  { %4016 = vsyncadd [#allocation4], 4294963200 }
  0x2a   :  { %4017 = dma.done.wait [#allocation7], 3072  }
  0x2b   :  { %4018 = vsyncadd [#allocation7], 4294964224  ;;  %v5694_v1 = vmov 0   ;;  %v3780_v2 = vld [vmem:[%s5680_s1 + $0x4] ss:$8 sps:$4 sm:$0xff]   ;;  %vm334_vm0 = vcmask 130048  }
  0x2c   :  { %463 = vmatprep.mubr.bf16.mxu0 %v5694_v1  ;;  %703 = vmatprep.mubr.bf16.mxu1 %v5694_v1  ;;  %v3782_v3 = vld [vmem:[%s5680_s1] ss:$8 sps:$4 sm:$0xff]   ;;  %v3785_v6 = vld [vmem:[%s5679_s0 + $0x10] sm:$0xff]   ;;  %v3786_v10 = vld [vmem:[%s5679_s0 + $0x18] sm:$0xff]  }
  0x2d   :  { %3779 = vset.pattern.permute.xlu0 %v5694_v1  ;;  %445 = vmatprep.subr.bf16.mxu0 %v3780_v2  ;;  %v3783_v4 = vld [vmem:[%s5679_s0] sm:$0xff]   ;;  %v3784_v5 = vld [vmem:[%s5679_s0 + $0x8] sm:$0xff]   ;;  %v3802_v8 = vld [vmem:[%s5682_s3 + $0x70] ss:$8 sps:$4 sm:$0xff]  }
  0x2e   :  { %3766 = vmatprep.subr.bf16.mxu1 %v3780_v2  ;;  %446 = vmatpush1.bf16.msra.mxu0 %v3782_v3  ;;  %v3801_v7 = vld [vmem:[%s5679_s0 + $0xc0] sm:$0xff]   ;;  %v3804_v9 = vld [vmem:[%s5682_s3 + $0x74] ss:$8 sps:$4 sm:$0xff]   ;;  %v3806_v13 = vld [vmem:[%s5679_s0 + $0xc8] sm:$0xff]  }
  0x2f   :  { %3767 = vmatpush1.bf16.msra.mxu1 %v3782_v3  ;;  %v3807_v11 = vld [vmem:[%s5682_s3 + $0x60] ss:$8 sps:$4 sm:$0xff]   ;;  %v3809_v12 = vld [vmem:[%s5682_s3 + $0x64] ss:$8 sps:$4 sm:$0xff]   ;;  %v3812_v14 = vld [vmem:[%s5682_s3 + $0x54] ss:$8 sps:$4 sm:$0xff]  }
  0x30   :  { %1114 = vmatprep.subr.bf16.mxu1 %v3804_v9  ;;  %v3810_v15 = vld [vmem:[%s5682_s3 + $0x50] ss:$8 sps:$4 sm:$0xff]   ;;  %v3817_v16 = vld [vmem:[%s5682_s3 + $0x44] ss:$8 sps:$4 sm:$0xff]   ;;  %v3815_v17 = vld [vmem:[%s5682_s3 + $0x40] ss:$8 sps:$4 sm:$0xff]   ;;  %v5693_v9 = vlaneseq }
  0x31   :  { %3490 = vmatmul.mubr.msk.bf16.vlgmr.msra.gmra.mxu0 %vm334_vm0, %v3783_v4  ;;  %v3820_v18 = vld [vmem:[%s5682_s3 + $0x34] ss:$8 sps:$4 sm:$0xff]   ;;  %v3787_v19 = vld [vmem:[%s5679_s0 + $0x20] sm:$0xff]   ;;  %v3818_v21 = vld [vmem:[%s5682_s3 + $0x30] ss:$8 sps:$4 sm:$0xff]  }
  0x32   :  { %473 = vmatprep.mubr.bf16.mxu0 %v5694_v1  ;;  %3514 = vmatmul.mubr.msk.bf16.vlgmr.msra.gmra.mxu1 %vm334_vm0, %v3801_v7  ;;  %v3814_v20 = vld [vmem:[%s5679_s0 + $0xd0] sm:$0xff]   ;;  %v3825_v22 = vld [vmem:[%s5682_s3 + $0x24] ss:$8 sps:$4 sm:$0xff]   ;;  %v3823_v23 = vld [vmem:[%s5682_s3 + $0x20] ss:$8 sps:$4 sm:$0xff]  }
  0x33   :  { %713 = vmatprep.mubr.bf16.mxu1 %v5694_v1  ;;  %1115 = vmatpush1.bf16.msra.mxu1 %v3802_v8  ;;  %v3828_v24 = vld [vmem:[%s5682_s3 + $0x14] ss:$8 sps:$4 sm:$0xff]   ;;  %v3788_v25 = vld [vmem:[%s5679_s0 + $0x28] sm:$0xff]   ;;  %v3826_v27 = vld [vmem:[%s5682_s3 + $0x10] ss:$8 sps:$4 sm:$0xff]  }
  0x34   :  { %1116 = vmatprep.subr.bf16.mxu1 %v3809_v12  ;;  %v3822_v26 = vld [vmem:[%s5679_s0 + $0xd8] sm:$0xff]   ;;  %v3833_v28 = vld [vmem:[%s5682_s3 + $0x4] ss:$8 sps:$4 sm:$0xff]   ;;  %v3831_v29 = vld [vmem:[%s5682_s3] ss:$8 sps:$4 sm:$0xff]   ;;  %v4379_v12 = vshrl.u32 %v5693_v9, 7 }
  0x35   :  { %v3836_v30 = vld [vmem:[%s5682_s3 + $0xf4] ss:$8 sps:$4 sm:$0xff]   ;;  %v3830_v32 = vld [vmem:[%s5679_s0 + $0xe0] sm:$0xff]   ;;  %v3834_v33 = vld [vmem:[%s5682_s3 + $0xf0] ss:$8 sps:$4 sm:$0xff]  }
  0x36   :  { %v3789_v31 = vld [vmem:[%s5679_s0 + $0x30] sm:$0xff]   ;;  %v3841_v34 = vld [vmem:[%s5682_s3 + $0xe4] ss:$8 sps:$4 sm:$0xff]   ;;  %v3839_v35 = vld [vmem:[%s5682_s3 + $0xe0] ss:$8 sps:$4 sm:$0xff]   ;;  %5728 = vst [vmem:[#allocation13_spill] sm:$0xff] %v4379_v12 }
  0x37   :  { %1117 = vmatpush1.bf16.msra.mxu1 %v3807_v11  ;;  %v3844_v36 = vld [vmem:[%s5682_s3 + $0xd4] ss:$8 sps:$4 sm:$0xff]   ;;  %v3838_v38 = vld [vmem:[%s5679_s0 + $0xe8] sm:$0xff]   ;;  %v3842_v39 = vld [vmem:[%s5682_s3 + $0xd0] ss:$8 sps:$4 sm:$0xff]  }
  0x38   :  { %1118 = vmatprep.subr.bf16.mxu1 %v3812_v14  ;;  %v3790_v37 = vld [vmem:[%s5679_s0 + $0x38] sm:$0xff]   ;;  %v3849_v40 = vld [vmem:[%s5682_s3 + $0xc4] ss:$8 sps:$4 sm:$0xff]   ;;  %v3847_v41 = vld [vmem:[%s5682_s3 + $0xc0] ss:$8 sps:$4 sm:$0xff]  }
  0x39   :  { %3491 = vmatmul.mubr.msk.bf16.gmra.mxu0 %vm334_vm0, %v3784_v5  ;;  %v3791_v42 = vld [vmem:[%s5679_s0 + $0x40] sm:$0xff]   ;;  %v3852_v43 = vld [vmem:[%s5682_s3 + $0xb4] ss:$8 sps:$4 sm:$0xff]   ;;  %v3850_v45 = vld [vmem:[%s5682_s3 + $0xb0] ss:$8 sps:$4 sm:$0xff]  }
  0x3a   :  { %483 = vmatprep.mubr.bf16.mxu0 %v5694_v1  ;;  %3515 = vmatmul.mubr.msk.bf16.gmra.mxu1 %vm334_vm0, %v3806_v13  ;;  %v3846_v44 = vld [vmem:[%s5679_s0 + $0xf0] sm:$0xff]   ;;  %v3856_v46 = vld [vmem:[%s5682_s3 + $0xa4] ss:$8 sps:$4 sm:$0xff]   ;;  %v3854_v47 = vld [vmem:[%s5682_s3 + $0xa0] ss:$8 sps:$4 sm:$0xff]   ;;  %v4382_v13 = vsub.s32 0, %v4379_v12 }
  0x3b   :  { %723 = vmatprep.mubr.bf16.mxu1 %v5694_v1  ;;  %1119 = vmatpush1.bf16.msra.mxu1 %v3810_v15  ;;  %v3792_v48 = vld [vmem:[%s5679_s0 + $0x48] sm:$0xff]   ;;  %v3853_v49 = vld [vmem:[%s5679_s0 + $0xf8] ss:$0 sps:$4 sm:$0xff]   ;;  %v3859_v50 = vld [vmem:[%s5682_s3 + $0x94] ss:$8 sps:$4 sm:$0xff]   ;;  %v4388_v15 = vsub.s32 1, %v4379_v12 }
  0x3c   :  { %1120 = vmatprep.subr.bf16.mxu1 %v3817_v16  ;;  %v3857_v51 = vld [vmem:[%s5682_s3 + $0x90] ss:$8 sps:$4 sm:$0xff]   ;;  %v3862_v52 = vld [vmem:[%s5682_s3 + $0x84] ss:$8 sps:$4 sm:$0xff]   ;;  %v3860_v53 = vld [vmem:[%s5682_s3 + $0x80] ss:$8 sps:$4 sm:$0xff]  }
  0x3d   :  { %v3793_v54 = vld [vmem:[%s5679_s0 + $0x50] sm:$0xff]   ;;  %v3794_v55 = vld [vmem:[%s5679_s0 + $0x58] sm:$0xff]   ;;  %v3795_v56 = vld [vmem:[%s5679_s0 + $0x60] sm:$0xff]  }
  0x3e   :  { %v3796_v57 = vld [vmem:[%s5679_s0 + $0x68] sm:$0xff]   ;;  %v3797_v58 = vld [vmem:[%s5679_s0 + $0x70] sm:$0xff]   ;;  %v3798_v59 = vld [vmem:[%s5679_s0 + $0x78] sm:$0xff]  }
  0x3f   :  { %1121 = vmatpush1.bf16.msra.mxu1 %v3815_v17  ;;  %v3799_v60 = vld [vmem:[%s5679_s0 + $0x80] sm:$0xff]   ;;  %v3800_v61 = vld [vmem:[%s5679_s0 + $0x88] sm:$0xff]   ;;  %v3805_v62 = vld [vmem:[%s5679_s0 + $0x90] sm:$0xff]  }
  0x40   :  { %1122 = vmatprep.subr.bf16.mxu1 %v3820_v18  ;;  %v3813_v63 = vld [vmem:[%s5679_s0 + $0x98] sm:$0xff]   ;;  %v3821_v0 = vld [vmem:[%s5679_s0 + $0xa0] sm:$0xff]   ;;  %v3829_v4 = vld [vmem:[%s5679_s0 + $0xa8] sm:$0xff]  }
  0x41   :  { %3492 = vmatmul.mubr.msk.bf16.gmra.mxu0 %vm334_vm0, %v3785_v6  ;;  %v3863_v2 = vld [vmem:[#allocation3 + $0x70] ss:$8 sps:$4 sm:$0xff]   ;;  %v3865_v3 = vld [vmem:[#allocation3 + $0x74] ss:$8 sps:$4 sm:$0xff]   ;;  %v3866_v6 = vld [vmem:[#allocation3 + $0x60] ss:$8 sps:$4 sm:$0xff]  }
  0x42   :  { %493 = vmatprep.mubr.bf16.mxu0 %v5694_v1  ;;  %3516 = vmatmul.mubr.msk.bf16.gmra.mxu1 %vm334_vm0, %v3814_v20  ;;  %v3837_v5 = vld [vmem:[%s5679_s0 + $0xb0] sm:$0xff]   ;;  %v3845_v8 = vld [vmem:[%s5679_s0 + $0xb8] sm:$0xff]   ;;  %v154_v14 = vld [vmem:[%s5681_s2] sm:$0x3] }
  0x43   :  { %733 = vmatprep.mubr.bf16.mxu1 %v5694_v1  ;;  %1123 = vmatpush1.bf16.msra.mxu1 %v3818_v21  ;;  %v3868_v7 = vld [vmem:[#allocation3 + $0x64] ss:$8 sps:$4 sm:$0xff]   ;;  %v3871_v11 = vld [vmem:[#allocation3 + $0x54] ss:$8 sps:$4 sm:$0xff]   ;;  %v4391_v17 = vrot.slane %v154_v14, %v4382_v13 }
  0x44   :  { %1124 = vmatprep.subr.bf16.mxu1 %v3825_v22  ;;  %1797 = vmatprep.subr.bf16.mxu0 %v3865_v3  ;;  %v3895_v9 = vld [vmem:[#allocation3 + $0xd4] ss:$8 sps:$4 sm:$0xff]  }
  0x45   :  { %1798 = vmatpush1.bf16.msra.mxu0 %v3863_v2 }
  0x46   :  { %1799 = vmatprep.subr.bf16.mxu0 %v3868_v7 }
  0x47   :  { %1125 = vmatpush1.bf16.msra.mxu1 %v3823_v23 }
  0x48   :  { %1126 = vmatprep.subr.bf16.mxu1 %v3828_v24 }
  0x49   :  { %3493 = vmatmul.mubr.msk.bf16.gmra.mxu0 %vm334_vm0, %v3786_v10  ;;  %v3869_v10 = vld [vmem:[#allocation3 + $0x50] ss:$8 sps:$4 sm:$0xff]  }
  0x4a   :  { %503 = vmatprep.mubr.bf16.mxu0 %v5694_v1  ;;  %3517 = vmatmul.mubr.msk.bf16.gmra.mxu1 %vm334_vm0, %v3822_v26  ;;  %v3872_v26 = vld [vmem:[#allocation3 + $0x40] ss:$8 sps:$4 sm:$0xff]  }
  0x4b   :  { %743 = vmatprep.mubr.bf16.mxu1 %v5694_v1  ;;  %1127 = vmatpush1.bf16.msra.mxu1 %v3826_v27  ;;  %v3874_v27 = vld [vmem:[#allocation3 + $0x44] ss:$8 sps:$4 sm:$0xff]  }
  0x4c   :  { %1128 = vmatprep.subr.bf16.mxu1 %v3833_v28  ;;  %1800 = vmatpush1.bf16.msra.mxu0 %v3866_v6 }
  0x4d   :  { %1801 = vmatprep.subr.bf16.mxu0 %v3871_v11 }
  0x4f   :  { %1129 = vmatpush1.bf16.msra.mxu1 %v3831_v29 }
  0x50   :  { %1130 = vmatprep.subr.bf16.mxu1 %v3836_v30  ;;  %1802 = vmatpush1.bf16.msra.mxu0 %v3869_v10 }
  0x51   :  { %3494 = vmatmul.mubr.msk.bf16.gmra.mxu0 %vm334_vm0, %v3787_v19  ;;  %v4394_v19 = vrot.slane %v154_v14, %v4388_v15  ;;  %1803 = vmatprep.subr.bf16.mxu0 %v3874_v27 }
  0x52   :  { %513 = vmatprep.mubr.bf16.mxu0 %v5694_v1  ;;  %3518 = vmatmul.mubr.msk.bf16.gmra.mxu1 %vm334_vm0, %v3830_v32 }
  0x53   :  { %753 = vmatprep.mubr.bf16.mxu1 %v5694_v1  ;;  %1131 = vmatpush2.bf16.msra.mxu1 %v3834_v33 }
  0x54   :  { %1132 = vmatprep.subr.bf16.mxu1 %v3841_v34  ;;  %1804 = vmatpush1.bf16.msra.mxu0 %v3872_v26 }
  0x57   :  { %1133 = vmatpush2.bf16.msra.mxu1 %v3839_v35 }
  0x58   :  { %1134 = vmatprep.subr.bf16.mxu1 %v3844_v36 }
  0x59   :  { %3495 = vmatmul.mubr.msk.bf16.gmra.mxu0 %vm334_vm0, %v3788_v25 }
  0x5a   :  { %523 = vmatprep.mubr.bf16.mxu0 %v5694_v1  ;;  %3519 = vmatmul.mubr.msk.bf16.gmra.mxu1 %vm334_vm0, %v3838_v38 }
  0x5b   :  { %763 = vmatprep.mubr.bf16.mxu1 %v5694_v1  ;;  %1135 = vmatpush2.bf16.msra.mxu1 %v3842_v39 }
  0x5c   :  { %1136 = vmatprep.subr.bf16.mxu1 %v3849_v40 }
  0x5f   :  { %1137 = vmatpush2.bf16.msra.mxu1 %v3847_v41 }
  0x60   :  { %1138 = vmatprep.subr.bf16.mxu1 %v3852_v43 }
  0x61   :  { %3496 = vmatmul.mubr.msk.bf16.gmra.mxu0 %vm334_vm0, %v3789_v31 }
  0x62   :  { %533 = vmatprep.mubr.bf16.mxu0 %v5694_v1  ;;  %3520 = vmatmul.mubr.msk.bf16.gmra.mxu1 %vm334_vm0, %v3846_v44  ;;  %v3875_v44 = vld [vmem:[#allocation3 + $0x30] ss:$8 sps:$4 sm:$0xff]  }
  0x63   :  { %773 = vmatprep.mubr.bf16.mxu1 %v5694_v1  ;;  %1139 = vmatpush2.bf16.msra.mxu1 %v3850_v45  ;;  %v3877_v45 = vld [vmem:[#allocation3 + $0x34] ss:$8 sps:$4 sm:$0xff]  }
  0x64   :  { %1140 = vmatprep.subr.bf16.mxu1 %v3856_v46  ;;  %1805 = vmatprep.subr.bf16.mxu0 %v3877_v45 }
  0x65   :  { %1806 = vmatpush1.bf16.msra.mxu0 %v3875_v44 }
  0x67   :  { %1141 = vmatpush2.bf16.msra.mxu1 %v3854_v47 }
  0x68   :  { %1142 = vmatprep.subr.bf16.mxu1 %v3859_v50 }
  0x69   :  { %3497 = vmatmul.mubr.msk.bf16.gmra.mxu0 %vm334_vm0, %v3790_v37 }
  0x6a   :  { %543 = vmatprep.mubr.bf16.mxu0 %v5694_v1  ;;  %3521 = vmatmul.mubr.msk.bf16.gmra.mxu1 %vm334_vm0, %v3853_v49 }
  0x6b   :  { %1143 = vmatpush2.bf16.msra.mxu1 %v3857_v51 }
  0x6c   :  { %1144 = vmatprep.subr.bf16.mxu1 %v3862_v52 }
  0x6f   :  { %1145 = vmatpush2.bf16.msra.mxu1 %v3860_v53 }
  0x70   :  { %2475 = vmatprep.subr.bf16.mxu1 %v5694_v1 }
  0x71   :  { %3498 = vmatmul.mubr.msk.bf16.gmra.mxu0 %vm334_vm0, %v3791_v42 }
  0x72   :  { %553 = vmatprep.mubr.bf16.mxu0 %v5694_v1 }
  0x79   :  { %3499 = vmatmul.mubr.msk.bf16.gmra.mxu0 %vm334_vm0, %v3792_v48 }
  0x7a   :  { %563 = vmatprep.mubr.bf16.mxu0 %v5694_v1 }
  0x81   :  { %3500 = vmatmul.mubr.msk.bf16.gmra.mxu0 %vm334_vm0, %v3793_v54 }
  0x82   :  { %573 = vmatprep.mubr.bf16.mxu0 %v5694_v1 }
  0x89   :  { %3501 = vmatmul.mubr.msk.bf16.gmra.mxu0 %vm334_vm0, %v3794_v55 }
  0x8a   :  { %583 = vmatprep.mubr.bf16.mxu0 %v5694_v1 }
  0x91   :  { %3502 = vmatmul.mubr.msk.bf16.gmra.mxu0 %vm334_vm0, %v3795_v56 }
  0x92   :  { %593 = vmatprep.mubr.bf16.mxu0 %v5694_v1 }
  0x99   :  { %3503 = vmatmul.mubr.msk.bf16.gmra.mxu0 %vm334_vm0, %v3796_v57 }
  0x9a   :  { %603 = vmatprep.mubr.bf16.mxu0 %v5694_v1 }
  0xa1   :  { %3504 = vmatmul.mubr.msk.bf16.gmra.mxu0 %vm334_vm0, %v3797_v58 }
  0xa2   :  { %613 = vmatprep.mubr.bf16.mxu0 %v5694_v1 }
  0xa9   :  { %3505 = vmatmul.mubr.msk.bf16.gmra.mxu0 %vm334_vm0, %v3798_v59 }
  0xaa   :  { %623 = vmatprep.mubr.bf16.mxu0 %v5694_v1 }
  0xb1   :  { %3506 = vmatmul.mubr.msk.bf16.gmra.mxu0 %vm334_vm0, %v3799_v60 }
  0xb2   :  { %633 = vmatprep.mubr.bf16.mxu0 %v5694_v1 }
  0xb9   :  { %3507 = vmatmul.mubr.msk.bf16.gmra.mxu0 %vm334_vm0, %v3800_v61 }
  0xba   :  { %643 = vmatprep.mubr.bf16.mxu0 %v5694_v1 }
  0xc1   :  { %3508 = vmatmul.mubr.msk.bf16.gmra.mxu0 %vm334_vm0, %v3805_v62 }
  0xc2   :  { %653 = vmatprep.mubr.bf16.mxu0 %v5694_v1 }
  0xc9   :  { %3509 = vmatmul.mubr.msk.bf16.gmra.mxu0 %vm334_vm0, %v3813_v63 }
  0xca   :  { %663 = vmatprep.mubr.bf16.mxu0 %v5694_v1 }
  0xd1   :  { %3510 = vmatmul.mubr.msk.bf16.gmra.mxu0 %vm334_vm0, %v3821_v0 }
  0xd2   :  { %673 = vmatprep.mubr.bf16.mxu0 %v5694_v1 }
  0xd9   :  { %3511 = vmatmul.mubr.msk.bf16.gmra.mxu0 %vm334_vm0, %v3829_v4 }
  0xda   :  { %683 = vmatprep.mubr.bf16.mxu0 %v5694_v1 }
  0xe1   :  { %3512 = vmatmul.mubr.msk.bf16.gmra.mxu0 %vm334_vm0, %v3837_v5 }
  0xe2   :  { %693 = vmatprep.mubr.bf16.mxu0 %v5694_v1 }
  0xe9   :  { %3513 = vmatmul.mubr.msk.bf16.gmra.mxu0 %vm334_vm0, %v3845_v8 }
  0xf1   :  { %v465_v16 = vpop.f32.mrf.mxu0 }
  0xf2   :  { %v466_v22 = vadd.f32 %v465_v16, %v4391_v17  ;;  %v705_v42 = vpop.f32.mrf.mxu1 }
  0xf3   :  { %v467_v18 = vpop.f32.mrf.mxu0  ;;  %v4418_v49 = vadd.f32 %v705_v42, %v4391_v17 }
  0xf4   :  { %v468_v24 = vadd.f32 %v467_v18, %v4394_v19  ;;  %v4412_v47 = vpop.f32.mrf.mxu1 }
  0xf5   :  { %v469_v20 = vpop.f32.mrf.mxu0 }
  0xf6   :  { %v470_v21 = vadd.f32 %v469_v20, %v4391_v17  ;;  %v709_v52 = vpop.f32.mrf.mxu1 }
  0xf7   :  { %v471_v23 = vpop.f32.mrf.mxu0  ;;  %v4426_v54 = vadd.f32 %v709_v52, %v4391_v17 }
  0xf8   :  { %v472_v25 = vadd.f32 %v471_v23, %v4394_v19  ;;  %v782_v28 = vpack.c.bf16 %v470_v21, %v466_v22  ;;  %v4430_v57 = vpop.f32.mrf.mxu1  ;;  %v3878_v23 = vld [vmem:[#allocation3 + $0x20] ss:$8 sps:$4 sm:$0xff]   ;;  %v3901_v22 = vld [vmem:[#allocation3 + $0xb4] ss:$8 sps:$4 sm:$0xff]  }
  0xf9   :  { %v475_v29 = vpop.f32.mrf.mxu0 }
  0xfa   :  { %v783_v30 = vpack.c.bf16 %v472_v25, %v468_v24  ;;  %v4404_v33 = vmax.bf16 %v5694_v1, %v782_v28  ;;  %v476_v36 = vadd.f32 %v475_v29, %v4391_v17  ;;  %v715_v63 = vpop.f32.mrf.mxu1  ;;  %v3880_v24 = vld [vmem:[#allocation3 + $0x24] ss:$8 sps:$4 sm:$0xff]  }
  0xfb   :  { %v477_v31 = vpop.f32.mrf.mxu0  ;;  %v4442_v5 = vadd.f32 %v715_v63, %v4391_v17  ;;  %1807 = vmatprep.subr.bf16.mxu0 %v3880_v24 }
  0xfc   :  { %v4401_v32 = vmax.bf16 %v5694_v1, %v783_v30  ;;  %v478_v38 = vadd.f32 %v477_v31, %v4394_v19  ;;  %v4436_v3 = vpop.f32.mrf.mxu1  ;;  %1808 = vmatpush1.bf16.msra.mxu0 %v3878_v23 }
  0xfd   :  { %v479_v34 = vpop.f32.mrf.mxu0 }
  0xfe   :  { %v480_v35 = vadd.f32 %v479_v34, %v4391_v17  ;;  %1146 = vmatprep.mubr.bf16.mxu1 %v4401_v32  ;;  %v719_v8 = vpop.f32.mrf.mxu1 }
  0xff   :  { %v481_v37 = vpop.f32.mrf.mxu0  ;;  %1147 = vmatmul.mubr.bf16.vlgmr.msra.gmra.mxu1 %v4404_v33  ;;  %v4450_v11 = vadd.f32 %v719_v8, %v4391_v17 }
 0x100   :  { %v482_v39 = vadd.f32 %v481_v37, %v4394_v19  ;;  %v784_v40 = vpack.c.bf16 %v480_v35, %v476_v36  ;;  %v4454_v18 = vpop.f32.mrf.mxu1 }
 0x101   :  { %v485_v41 = vpop.f32.mrf.mxu0 }
 0x102   :  { %v785_v43 = vpack.c.bf16 %v482_v39, %v478_v38  ;;  %v4421_v51 = vmax.bf16 %v5694_v1, %v784_v40  ;;  %v486_v55 = vadd.f32 %v485_v41, %v4391_v17  ;;  %v725_v27 = vpop.f32.mrf.mxu1 }
 0x103   :  { %v487_v46 = vpop.f32.mrf.mxu0  ;;  %v4466_v34 = vadd.f32 %v725_v27, %v4391_v17 }
 0x104   :  { %v4415_v48 = vmax.bf16 %v5694_v1, %v785_v43  ;;  %v488_v58 = vadd.f32 %v487_v46, %v4394_v19  ;;  %v4460_v30 = vpop.f32.mrf.mxu1 }
 0x105   :  { %v489_v50 = vpop.f32.mrf.mxu0 }
 0x106   :  { %v490_v53 = vadd.f32 %v489_v50, %v4391_v17  ;;  %1156 = vmatprep.mubr.bf16.mxu1 %v4415_v48  ;;  %v729_v37 = vpop.f32.mrf.mxu1 }
 0x107   :  { %v491_v56 = vpop.f32.mrf.mxu0  ;;  %1157 = vmatmul.mubr.bf16.gmra.mxu1 %v4421_v51  ;;  %v4474_v39 = vadd.f32 %v729_v37, %v4391_v17 }
 0x108   :  { %v492_v59 = vadd.f32 %v491_v56, %v4394_v19  ;;  %v786_v61 = vpack.c.bf16 %v490_v53, %v486_v55  ;;  %v4478_v42 = vpop.f32.mrf.mxu1  ;;  %v3881_v55 = vld [vmem:[#allocation3 + $0x10] ss:$8 sps:$4 sm:$0xff]   ;;  %v3883_v56 = vld [vmem:[#allocation3 + $0x14] ss:$8 sps:$4 sm:$0xff]  }
 0x109   :  { %v495_v62 = vpop.f32.mrf.mxu0  ;;  %1809 = vmatprep.subr.bf16.mxu0 %v3883_v56 }
 0x10a   :  { %v787_v0 = vpack.c.bf16 %v492_v59, %v488_v58  ;;  %v4445_v7 = vmax.bf16 %v5694_v1, %v786_v61  ;;  %v496_v14 = vadd.f32 %v495_v62, %v4391_v17  ;;  %v735_v52 = vpop.f32.mrf.mxu1  ;;  %1810 = vmatpush1.bf16.msra.mxu0 %v3881_v55 }
 0x10b   :  { %v497_v2 = vpop.f32.mrf.mxu0  ;;  %v4490_v62 = vadd.f32 %v735_v52, %v4391_v17 }
 0x10c   :  { %v4439_v4 = vmax.bf16 %v5694_v1, %v787_v0  ;;  %v498_v20 = vadd.f32 %v497_v2, %v4394_v19  ;;  %v4484_v59 = vpop.f32.mrf.mxu1 }
 0x10d   :  { %v499_v6 = vpop.f32.mrf.mxu0 }
 0x10e   :  { %v500_v10 = vadd.f32 %v499_v6, %v4391_v17  ;;  %1166 = vmatprep.mubr.bf16.mxu1 %v4439_v4  ;;  %v739_v2 = vpop.f32.mrf.mxu1 }
 0x10f   :  { %v501_v16 = vpop.f32.mrf.mxu0  ;;  %1167 = vmatmul.mubr.bf16.gmra.mxu1 %v4445_v7  ;;  %v4498_v8 = vadd.f32 %v739_v2, %v4391_v17 }
 0x110   :  { %v502_v21 = vadd.f32 %v501_v16, %v4394_v19  ;;  %v788_v25 = vpack.c.bf16 %v500_v10, %v496_v14  ;;  %v4502_v16 = vpop.f32.mrf.mxu1 }
 0x111   :  { %v505_v26 = vpop.f32.mrf.mxu0 }
 0x112   :  { %v789_v28 = vpack.c.bf16 %v502_v21, %v498_v20  ;;  %v4469_v36 = vmax.bf16 %v5694_v1, %v788_v25  ;;  %v506_v40 = vadd.f32 %v505_v26, %v4391_v17  ;;  %v745_v26 = vpop.f32.mrf.mxu1 }
 0x113   :  { %v507_v29 = vpop.f32.mrf.mxu0  ;;  %v4514_v37 = vadd.f32 %v745_v26, %v4391_v17 }
 0x114   :  { %v4463_v31 = vmax.bf16 %v5694_v1, %v789_v28  ;;  %v508_v43 = vadd.f32 %v507_v29, %v4394_v19  ;;  %v4508_v29 = vpop.f32.mrf.mxu1 }
 0x115   :  { %v509_v35 = vpop.f32.mrf.mxu0 }
 0x116   :  { %v510_v38 = vadd.f32 %v509_v35, %v4391_v17  ;;  %1176 = vmatprep.mubr.bf16.mxu1 %v4463_v31 }
 0x117   :  { %v511_v41 = vpop.f32.mrf.mxu0  ;;  %1177 = vmatmul.mubr.bf16.gmra.mxu1 %v4469_v36 }
 0x118   :  { %v512_v44 = vadd.f32 %v511_v41, %v4394_v19  ;;  %v790_v46 = vpack.c.bf16 %v510_v38, %v506_v40  ;;  %v749_v41 = vpop.f32.mrf.mxu1 }
 0x119   :  { %v515_v50 = vpop.f32.mrf.mxu0 }
 0x11a   :  { %v791_v53 = vpack.c.bf16 %v512_v44, %v508_v43  ;;  %v4493_v0 = vmax.bf16 %v5694_v1, %v790_v46  ;;  %v516_v10 = vadd.f32 %v515_v50, %v4391_v17  ;;  %v4522_v44 = vadd.f32 %v749_v41, %v4391_v17  ;;  %v4526_v52 = vpop.f32.mrf.mxu1 }
 0x11b   :  { %v517_v58 = vpop.f32.mrf.mxu0 }
 0x11c   :  { %v4487_v61 = vmax.bf16 %v5694_v1, %v791_v53  ;;  %v518_v20 = vadd.f32 %v517_v58, %v4394_v19  ;;  %v3886_v53 = vld [vmem:[#allocation3 + $0x4] ss:$8 sps:$4 sm:$0xff]  }
 0x11d   :  { %v519_v63 = vpop.f32.mrf.mxu0  ;;  %1811 = vmatprep.subr.bf16.mxu0 %v3886_v53 }
 0x11e   :  { %v520_v6 = vadd.f32 %v519_v63, %v4391_v17  ;;  %1186 = vmatprep.mubr.bf16.mxu1 %v4487_v61  ;;  %v3884_v63 = vld [vmem:[#allocation3] ss:$8 sps:$4 sm:$0xff]  }
 0x11f   :  { %v521_v14 = vpop.f32.mrf.mxu0  ;;  %1187 = vmatmul.mubr.bf16.gmra.mxu1 %v4493_v0  ;;  %1812 = vmatpush1.bf16.msra.mxu0 %v3884_v63 }
 0x120   :  { %v522_v21 = vadd.f32 %v521_v14, %v4394_v19  ;;  %v792_v24 = vpack.c.bf16 %v520_v6, %v516_v10  ;;  %v755_v10 = vpop.f32.mrf.mxu1 }
 0x121   :  { %v525_v25 = vpop.f32.mrf.mxu0  ;;  %v4538_v26 = vadd.f32 %v755_v10, %v4391_v17  ;;  %v3896_v10 = vld [vmem:[#allocation3 + $0xc0] ss:$8 sps:$4 sm:$0xff]  }
 0x122   :  { %v793_v27 = vpack.c.bf16 %v522_v21, %v518_v20  ;;  %v4517_v40 = vmax.bf16 %v5694_v1, %v792_v24  ;;  %v526_v46 = vadd.f32 %v525_v25, %v4391_v17  ;;  %v4532_v21 = vpop.f32.mrf.mxu1  ;;  %v3889_v24 = vld [vmem:[#allocation3 + $0xf4] ss:$8 sps:$4 sm:$0xff]  }
 0x123   :  { %v527_v28 = vpop.f32.mrf.mxu0  ;;  %1813 = vmatprep.subr.bf16.mxu0 %v3889_v24 }
 0x124   :  { %v4511_v35 = vmax.bf16 %v5694_v1, %v793_v27  ;;  %5729 = vst [vmem:[#allocation14_spill] sm:$0xff] %v4517_v40  ;;  %v528_v55 = vadd.f32 %v527_v28, %v4394_v19  ;;  %v3887_v27 = vld [vmem:[#allocation3 + $0xf0] ss:$8 sps:$4 sm:$0xff]   ;;  %v759_v41 = vpop.f32.mrf.mxu1 }
 0x125   :  { %v529_v38 = vpop.f32.mrf.mxu0  ;;  %1814 = vmatpush2.bf16.msra.mxu0 %v3887_v27 }
 0x126   :  { %v530_v43 = vadd.f32 %v529_v38, %v4391_v17  ;;  %1196 = vmatprep.mubr.bf16.mxu1 %v4511_v35 }
 0x127   :  { %v531_v50 = vpop.f32.mrf.mxu0  ;;  %1197 = vmatmul.mubr.bf16.gmra.mxu1 %v4517_v40 }
 0x128   :  { %v532_v56 = vadd.f32 %v531_v50, %v4394_v19  ;;  %v794_v2 = vpack.c.bf16 %v530_v43, %v526_v46  ;;  %v4546_v46 = vadd.f32 %v759_v41, %v4391_v17 }
 0x129   :  { %v535_v6 = vpop.f32.mrf.mxu0 }
 0x12a   :  { %v795_v14 = vpack.c.bf16 %v532_v56, %v528_v55  ;;  %v4541_v38 = vmax.bf16 %v5694_v1, %v794_v2  ;;  %v536_v50 = vadd.f32 %v535_v6, %v4391_v17  ;;  %v4550_v55 = vpop.f32.mrf.mxu1  ;;  %v3892_v56 = vld [vmem:[#allocation3 + $0xe4] ss:$8 sps:$4 sm:$0xff]   ;;  %v3893_v6 = vld [vmem:[#allocation3 + $0xd0] ss:$8 sps:$4 sm:$0xff]  }
 0x12b   :  { %v537_v20 = vpop.f32.mrf.mxu0  ;;  %1815 = vmatprep.subr.bf16.mxu0 %v3892_v56 }
 0x12c   :  { %v4535_v25 = vmax.bf16 %v5694_v1, %v795_v14  ;;  %5731 = vst [vmem:[#allocation16_spill] sm:$0xff] %v4541_v38  ;;  %v538_v63 = vadd.f32 %v537_v20, %v4394_v19  ;;  %v3890_v14 = vld [vmem:[#allocation3 + $0xe0] ss:$8 sps:$4 sm:$0xff]   ;;  %v765_v41 = vpop.f32.mrf.mxu1 }
 0x12d   :  { %v539_v28 = vpop.f32.mrf.mxu0  ;;  %1816 = vmatpush2.bf16.msra.mxu0 %v3890_v14  ;;  %v4562_v20 = vadd.f32 %v765_v41, %v4391_v17 }
 0x12e   :  { %5730 = vst [vmem:[#allocation15_spill] sm:$0xff] %v4535_v25  ;;  %v540_v43 = vadd.f32 %v539_v28, %v4391_v17  ;;  %1206 = vmatprep.mubr.bf16.mxu1 %v4535_v25  ;;  %v4556_v23 = vpop.f32.mrf.mxu1  ;;  %1817 = vmatprep.subr.bf16.mxu0 %v3895_v9  ;;  %v3898_v9 = vld [vmem:[#allocation3 + $0xc4] ss:$8 sps:$4 sm:$0xff]  }
 0x12f   :  { %v541_v53 = vpop.f32.mrf.mxu0  ;;  %1207 = vmatmul.mubr.bf16.gmra.mxu1 %v4541_v38 }
 0x130   :  { %v542_v2 = vadd.f32 %v541_v53, %v4394_v19  ;;  %v796_v24 = vpack.c.bf16 %v540_v43, %v536_v50  ;;  %v769_v50 = vpop.f32.mrf.mxu1 }
 0x131   :  { %v545_v28 = vpop.f32.mrf.mxu0  ;;  %1818 = vmatpush2.bf16.msra.mxu0 %v3893_v6 }
 0x132   :  { %v797_v27 = vpack.c.bf16 %v542_v2, %v538_v63  ;;  %v4565_v43 = vmax.bf16 %v5694_v1, %v796_v24  ;;  %v4570_v63 = vadd.f32 %v769_v50, %v4391_v17  ;;  %v546_v2 = vadd.f32 %v545_v28, %v4391_v17  ;;  %v4574_v41 = vpop.f32.mrf.mxu1  ;;  %1819 = vmatprep.subr.bf16.mxu0 %v3898_v9 }
 0x133   :  { %v547_v58 = vpop.f32.mrf.mxu0 }
 0x134   :  { %v4559_v45 = vmax.bf16 %v5694_v1, %v797_v27  ;;  %5733 = vst [vmem:[#allocation18_spill] sm:$0xff] %v4565_v43  ;;  %v548_v24 = vadd.f32 %v547_v58, %v4394_v19  ;;  %v4580_v6 = vpop.f32.mrf.mxu1  ;;  %v3899_v1 = vld [vmem:[#allocation3 + $0xb0] ss:$8 sps:$4 sm:$0xff]   ;;  %v5734_v58 = vmov 0  }
 0x135   :  { %v549_v53 = vpop.f32.mrf.mxu0  ;;  %1820 = vmatpush2.bf16.msra.mxu0 %v3896_v10 }
 0x136   :  { %5732 = vst [vmem:[#allocation17_spill] sm:$0xff] %v4559_v45  ;;  %v550_v56 = vadd.f32 %v549_v53, %v4391_v17  ;;  %1216 = vmatprep.mubr.bf16.mxu1 %v4559_v45  ;;  %1821 = vmatprep.subr.bf16.mxu0 %v3901_v22  ;;  %v3904_v22 = vld [vmem:[#allocation3 + $0xa4] ss:$8 sps:$4 sm:$0xff]  }
 0x137   :  { %v551_v14 = vpop.f32.mrf.mxu0  ;;  %1217 = vmatmul.mubr.bf16.gmra.mxu1 %v4565_v43  ;;  %v4582_v43 = vpop.f32.mrf.mxu1 }
 0x138   :  { %v552_v27 = vadd.f32 %v551_v14, %v4394_v19  ;;  %v798_v50 = vpack.c.bf16 %v550_v56, %v546_v2 }
 0x139   :  { %v555_v60 = vpop.f32.mrf.mxu0  ;;  %v779_v38 = vpop.f32.mrf.mxu1  ;;  %1822 = vmatpush2.bf16.msra.mxu0 %v3899_v1 }
 0x13a   :  { %v799_v28 = vpack.c.bf16 %v552_v27, %v548_v24  ;;  %v4588_v53 = vmax.bf16 %v5734_v58, %v798_v50  ;;  %v556_v10 = vadd.f32 %v555_v60, %v4391_v17  ;;  %1823 = vmatprep.subr.bf16.mxu0 %v3904_v22  ;;  %v3905_v60 = vld [vmem:[#allocation3 + $0x90] ss:$8 sps:$4 sm:$0xff]  }
 0x13b   :  { %v557_v12 = vpop.f32.mrf.mxu0  ;;  %v780_v9 = vpop.f32.mrf.mxu1 }
 0x13c   :  { %v4585_v45 = vmax.bf16 %v5734_v58, %v799_v28  ;;  %v558_v24 = vadd.f32 %v557_v12, %v4394_v19  ;;  %v3902_v28 = vld [vmem:[#allocation3 + $0xa0] ss:$8 sps:$4 sm:$0xff]  }
 0x13d   :  { %v559_v14 = vpop.f32.mrf.mxu0  ;;  %1824 = vmatpush2.bf16.msra.mxu0 %v3902_v28 }
 0x13e   :  { %5735 = vst [vmem:[#allocation19_spill] sm:$0xff] %v4585_v45  ;;  %v560_v56 = vadd.f32 %v559_v14, %v4391_v17  ;;  %1226 = vmatprep.mubr.bf16.mxu1 %v4585_v45  ;;  %v3907_v45 = vld [vmem:[#allocation3 + $0x94] ss:$8 sps:$4 sm:$0xff]  }
 0x13f   :  { %v561_v2 = vpop.f32.mrf.mxu0  ;;  %1227 = vmatmul.mubr.bf16.gmra.mxu1 %v4588_v53  ;;  %1825 = vmatprep.subr.bf16.mxu0 %v3907_v45 }
 0x140   :  { %v562_v27 = vadd.f32 %v561_v2, %v4394_v19  ;;  %v800_v50 = vpack.c.bf16 %v560_v56, %v556_v10  ;;  %v3910_v2 = vld [vmem:[#allocation3 + $0x84] ss:$8 sps:$4 sm:$0xff]  }
 0x141   :  { %v565_v25 = vpop.f32.mrf.mxu0  ;;  %1826 = vmatpush2.bf16.msra.mxu0 %v3905_v60 }
 0x142   :  { %v801_v38 = vpack.c.bf16 %v562_v27, %v558_v24  ;;  %v4600_v9 = vmax.bf16 %v5734_v58, %v800_v50  ;;  %v566_v56 = vadd.f32 %v565_v25, %v4391_v17  ;;  %v3908_v27 = vld [vmem:[#allocation3 + $0x80] ss:$8 sps:$4 sm:$0xff]   ;;  %1827 = vmatprep.subr.bf16.mxu0 %v3910_v2 }
 0x143   :  { %v567_v14 = vpop.f32.mrf.mxu0 }
 0x144   :  { %v4597_v1 = vmax.bf16 %v5734_v58, %v801_v38  ;;  %5736 = vst [vmem:[#allocation20_spill] sm:$0xff] %v4600_v9  ;;  %v568_v22 = vadd.f32 %v567_v14, %v4394_v19 }
 0x145   :  { %v569_v40 = vpop.f32.mrf.mxu0  ;;  %1828 = vmatpush2.bf16.msra.mxu0 %v3908_v27 }
 0x146   :  { %v570_v12 = vadd.f32 %v569_v40, %v4391_v17  ;;  %1236 = vmatprep.mubr.bf16.mxu1 %v4597_v1 }
 0x147   :  { %v571_v10 = vpop.f32.mrf.mxu0  ;;  %1237 = vmatmul.mubr.bf16.gmra.mxu1 %v4600_v9 }
 0x148   :  { %v572_v24 = vadd.f32 %v571_v10, %v4394_v19  ;;  %v802_v28 = vpack.c.bf16 %v570_v12, %v566_v56 }
 0x149   :  { %v575_v50 = vpop.f32.mrf.mxu0 }
 0x14a   :  { %v803_v45 = vpack.c.bf16 %v572_v24, %v568_v22  ;;  %v4612_v25 = vmax.bf16 %v5734_v58, %v802_v28  ;;  %v576_v14 = vadd.f32 %v575_v50, %v4391_v17 }
 0x14b   :  { %v577_v40 = vpop.f32.mrf.mxu0 }
 0x14c   :  { %v4609_v38 = vmax.bf16 %v5734_v58, %v803_v45  ;;  %5738 = vst [vmem:[#allocation22_spill] sm:$0xff] %v4612_v25  ;;  %v578_v12 = vadd.f32 %v577_v40, %v4394_v19 }
 0x14d   :  { %v579_v60 = vpop.f32.mrf.mxu0 }
 0x14e   :  { %5737 = vst [vmem:[#allocation21_spill] sm:$0xff] %v4609_v38  ;;  %v580_v9 = vadd.f32 %v579_v60, %v4391_v17  ;;  %1246 = vmatprep.mubr.bf16.mxu1 %v4609_v38 }
 0x14f   :  { %v581_v10 = vpop.f32.mrf.mxu0  ;;  %1247 = vmatmul.mubr.bf16.gmra.mxu1 %v4612_v25 }
 0x150   :  { %v582_v56 = vadd.f32 %v581_v10, %v4394_v19  ;;  %v804_v2 = vpack.c.bf16 %v580_v9, %v576_v14 }
 0x151   :  { %v585_v22 = vpop.f32.mrf.mxu0 }
 0x152   :  { %v805_v24 = vpack.c.bf16 %v582_v56, %v578_v12  ;;  %v4624_v60 = vmax.bf16 %v5734_v58, %v804_v2  ;;  %v586_v25 = vadd.f32 %v585_v22, %v4391_v17 }
 0x153   :  { %v587_v27 = vpop.f32.mrf.mxu0 }
 0x154   :  { %v4621_v28 = vmax.bf16 %v5734_v58, %v805_v24  ;;  %5740 = vst [vmem:[#allocation24_spill] sm:$0xff] %v4624_v60  ;;  %v588_v9 = vadd.f32 %v587_v27, %v4394_v19 }
 0x155   :  { %v589_v45 = vpop.f32.mrf.mxu0 }
 0x156   :  { %5739 = vst [vmem:[#allocation23_spill] sm:$0xff] %v4621_v28  ;;  %v590_v50 = vadd.f32 %v589_v45, %v4391_v17  ;;  %1256 = vmatprep.mubr.bf16.mxu1 %v4621_v28 }
 0x157   :  { %v591_v40 = vpop.f32.mrf.mxu0  ;;  %1257 = vmatmul.mubr.bf16.gmra.mxu1 %v4624_v60 }
 0x158   :  { %v592_v14 = vadd.f32 %v591_v40, %v4394_v19  ;;  %v806_v10 = vpack.c.bf16 %v590_v50, %v586_v25 }
 0x159   :  { %v595_v12 = vpop.f32.mrf.mxu0 }
 0x15a   :  { %v807_v56 = vpack.c.bf16 %v592_v14, %v588_v9  ;;  %v4636_v45 = vmax.bf16 %v5734_v58, %v806_v10  ;;  %v596_v60 = vadd.f32 %v595_v12, %v4391_v17 }
 0x15b   :  { %v597_v24 = vpop.f32.mrf.mxu0 }
 0x15c   :  { %v4633_v2 = vmax.bf16 %v5734_v58, %v807_v56  ;;  %5742 = vst [vmem:[#allocation26_spill] sm:$0xff] %v4636_v45  ;;  %v598_v25 = vadd.f32 %v597_v24, %v4394_v19 }
 0x15d   :  { %v599_v38 = vpop.f32.mrf.mxu0 }
 0x15e   :  { %5741 = vst [vmem:[#allocation25_spill] sm:$0xff] %v4633_v2  ;;  %v600_v22 = vadd.f32 %v599_v38, %v4391_v17  ;;  %1266 = vmatprep.mubr.bf16.mxu1 %v4633_v2 }
 0x15f   :  { %v601_v27 = vpop.f32.mrf.mxu0  ;;  %1267 = vmatmul.mubr.bf16.gmra.mxu1 %v4636_v45 }
 0x160   :  { %v602_v50 = vadd.f32 %v601_v27, %v4394_v19  ;;  %v808_v40 = vpack.c.bf16 %v600_v22, %v596_v60  ;;  %v3911_v27 = vld [vmem:[#allocation6 + $0x38] sm:$0xff]  }
 0x161   :  { %v605_v9 = vpop.f32.mrf.mxu0  ;;  %2476 = vmatpush1.bf16.msra.mxu1 %v3911_v27 }
 0x162   :  { %v809_v14 = vpack.c.bf16 %v602_v50, %v598_v25  ;;  %v4648_v38 = vmax.bf16 %v5734_v58, %v808_v40  ;;  %v606_v45 = vadd.f32 %v605_v9, %v4391_v17  ;;  %2477 = vmatprep.subr.bf16.mxu1 %v5734_v58 }
 0x163   :  { %v607_v56 = vpop.f32.mrf.mxu0 }
 0x164   :  { %v4645_v10 = vmax.bf16 %v5734_v58, %v809_v14  ;;  %5744 = vst [vmem:[#allocation28_spill] sm:$0xff] %v4648_v38  ;;  %v608_v60 = vadd.f32 %v607_v56, %v4394_v19 }
 0x165   :  { %v609_v28 = vpop.f32.mrf.mxu0 }
 0x166   :  { %5743 = vst [vmem:[#allocation27_spill] sm:$0xff] %v4645_v10  ;;  %v610_v12 = vadd.f32 %v609_v28, %v4391_v17  ;;  %1276 = vmatprep.mubr.bf16.mxu1 %v4645_v10 }
 0x167   :  { %v611_v24 = vpop.f32.mrf.mxu0  ;;  %1277 = vmatmul.mubr.bf16.gmra.mxu1 %v4648_v38 }
 0x168   :  { %v612_v22 = vadd.f32 %v611_v24, %v4394_v19  ;;  %v810_v25 = vpack.c.bf16 %v610_v12, %v606_v45 }
 0x169   :  { %v615_v50 = vpop.f32.mrf.mxu0 }
 0x16a   :  { %v811_v14 = vpack.c.bf16 %v612_v22, %v608_v60  ;;  %v4661_v9 = vmax.bf16 %v5734_v58, %v810_v25  ;;  %v616_v56 = vadd.f32 %v615_v50, %v4391_v17 }
 0x16b   :  { %v617_v40 = vpop.f32.mrf.mxu0 }
 0x16c   :  { %v4658_v28 = vmax.bf16 %v5734_v58, %v811_v14  ;;  %5746 = vst [vmem:[#allocation30_spill] sm:$0xff] %v4661_v9  ;;  %v618_v12 = vadd.f32 %v617_v40, %v4394_v19 }
 0x16d   :  { %v619_v10 = vpop.f32.mrf.mxu0 }
 0x16e   :  { %5745 = vst [vmem:[#allocation29_spill] sm:$0xff] %v4658_v28  ;;  %v620_v38 = vadd.f32 %v619_v10, %v4391_v17  ;;  %1286 = vmatprep.mubr.bf16.mxu1 %v4658_v28 }
 0x16f   :  { %v621_v45 = vpop.f32.mrf.mxu0  ;;  %1287 = vmatmul.mubr.bf16.gmra.mxu1 %v4661_v9 }
 0x170   :  { %v622_v24 = vadd.f32 %v621_v45, %v4394_v19  ;;  %v812_v60 = vpack.c.bf16 %v620_v38, %v616_v56  ;;  %v3912_v45 = vld [vmem:[#allocation6 + $0x30] sm:$0xff]  }
 0x171   :  { %v625_v22 = vpop.f32.mrf.mxu0  ;;  %2478 = vmatpush1.bf16.msra.mxu1 %v3912_v45 }
 0x172   :  { %v813_v27 = vpack.c.bf16 %v622_v24, %v618_v12  ;;  %v4673_v10 = vmax.bf16 %v5734_v58, %v812_v60  ;;  %v626_v9 = vadd.f32 %v625_v22, %v4391_v17  ;;  %2479 = vmatprep.subr.bf16.mxu1 %v5734_v58 }
 0x173   :  { %v627_v14 = vpop.f32.mrf.mxu0 }
 0x174   :  { %v4670_v25 = vmax.bf16 %v5734_v58, %v813_v27  ;;  %5748 = vst [vmem:[#allocation32_spill] sm:$0xff] %v4673_v10  ;;  %v628_v38 = vadd.f32 %v627_v14, %v4394_v19 }
 0x175   :  { %v629_v2 = vpop.f32.mrf.mxu0 }
 0x176   :  { %5747 = vst [vmem:[#allocation31_spill] sm:$0xff] %v4670_v25  ;;  %v630_v50 = vadd.f32 %v629_v2, %v4391_v17  ;;  %1296 = vmatprep.mubr.bf16.mxu1 %v4670_v25 }
 0x177   :  { %v631_v40 = vpop.f32.mrf.mxu0  ;;  %1297 = vmatmul.mubr.bf16.gmra.mxu1 %v4673_v10 }
 0x178   :  { %v632_v56 = vadd.f32 %v631_v40, %v4394_v19  ;;  %v814_v12 = vpack.c.bf16 %v630_v50, %v626_v9 }
 0x179   :  { %v635_v24 = vpop.f32.mrf.mxu0 }
 0x17a   :  { %v815_v27 = vpack.c.bf16 %v632_v56, %v628_v38  ;;  %v4686_v22 = vmax.bf16 %v5734_v58, %v814_v12  ;;  %v636_v14 = vadd.f32 %v635_v24, %v4391_v17 }
 0x17b   :  { %v637_v60 = vpop.f32.mrf.mxu0 }
 0x17c   :  { %v4683_v2 = vmax.bf16 %v5734_v58, %v815_v27  ;;  %5750 = vst [vmem:[#allocation34_spill] sm:$0xff] %v4686_v22  ;;  %v638_v50 = vadd.f32 %v637_v60, %v4394_v19 }
 0x17d   :  { %v639_v25 = vpop.f32.mrf.mxu0 }
 0x17e   :  { %5749 = vst [vmem:[#allocation33_spill] sm:$0xff] %v4683_v2  ;;  %v640_v10 = vadd.f32 %v639_v25, %v4391_v17  ;;  %1306 = vmatprep.mubr.bf16.mxu1 %v4683_v2 }
 0x17f   :  { %v641_v9 = vpop.f32.mrf.mxu0  ;;  %1307 = vmatmul.mubr.bf16.gmra.mxu1 %v4686_v22 }
 0x180   :  { %v642_v40 = vadd.f32 %v641_v9, %v4394_v19  ;;  %v816_v38 = vpack.c.bf16 %v640_v10, %v636_v14  ;;  %v3913_v9 = vld [vmem:[#allocation6 + $0x28] sm:$0xff]  }
 0x181   :  { %v645_v56 = vpop.f32.mrf.mxu0  ;;  %2480 = vmatpush1.bf16.msra.mxu1 %v3913_v9 }
 0x182   :  { %v817_v45 = vpack.c.bf16 %v642_v40, %v638_v50  ;;  %v4698_v25 = vmax.bf16 %v5734_v58, %v816_v38  ;;  %v646_v22 = vadd.f32 %v645_v56, %v4391_v17  ;;  %2481 = vmatprep.subr.bf16.mxu1 %v5734_v58 }
 0x183   :  { %v647_v27 = vpop.f32.mrf.mxu0 }
 0x184   :  { %v4695_v12 = vmax.bf16 %v5734_v58, %v817_v45  ;;  %5752 = vst [vmem:[#allocation36_spill] sm:$0xff] %v4698_v25  ;;  %v648_v10 = vadd.f32 %v647_v27, %v4394_v19 }
 0x185   :  { %v649_v28 = vpop.f32.mrf.mxu0 }
 0x186   :  { %5751 = vst [vmem:[#allocation35_spill] sm:$0xff] %v4695_v12  ;;  %v650_v24 = vadd.f32 %v649_v28, %v4391_v17  ;;  %1316 = vmatprep.mubr.bf16.mxu1 %v4695_v12 }
 0x187   :  { %v651_v60 = vpop.f32.mrf.mxu0  ;;  %1317 = vmatmul.mubr.bf16.gmra.mxu1 %v4698_v25 }
 0x188   :  { %v652_v14 = vadd.f32 %v651_v60, %v4394_v19  ;;  %v818_v50 = vpack.c.bf16 %v650_v24, %v646_v22 }
 0x189   :  { %v655_v40 = vpop.f32.mrf.mxu0 }
 0x18a   :  { %v819_v45 = vpack.c.bf16 %v652_v14, %v648_v10  ;;  %v4711_v56 = vmax.bf16 %v5734_v58, %v818_v50  ;;  %v656_v27 = vadd.f32 %v655_v40, %v4391_v17 }
 0x18b   :  { %v657_v38 = vpop.f32.mrf.mxu0 }
 0x18c   :  { %v4708_v28 = vmax.bf16 %v5734_v58, %v819_v45  ;;  %5753 = vst [vmem:[#allocation37_spill] sm:$0xff] %v4711_v56  ;;  %v658_v24 = vadd.f32 %v657_v38, %v4394_v19 }
 0x18d   :  { %v659_v12 = vpop.f32.mrf.mxu0 }
 0x18e   :  { %v660_v25 = vadd.f32 %v659_v12, %v4391_v17  ;;  %1326 = vmatprep.mubr.bf16.mxu1 %v4708_v28 }
 0x18f   :  { %v661_v22 = vpop.f32.mrf.mxu0  ;;  %1327 = vmatmul.mubr.bf16.gmra.mxu1 %v4711_v56 }
 0x190   :  { %v662_v60 = vadd.f32 %v661_v22, %v4394_v19  ;;  %v820_v10 = vpack.c.bf16 %v660_v25, %v656_v27  ;;  %v3914_v22 = vld [vmem:[#allocation6 + $0x20] sm:$0xff]  }
 0x191   :  { %v665_v14 = vpop.f32.mrf.mxu0  ;;  %2482 = vmatpush1.bf16.msra.mxu1 %v3914_v22 }
 0x192   :  { %v821_v9 = vpack.c.bf16 %v662_v60, %v658_v24  ;;  %v4723_v12 = vmax.bf16 %v5734_v58, %v820_v10  ;;  %v666_v56 = vadd.f32 %v665_v14, %v4391_v17  ;;  %2483 = vmatprep.subr.bf16.mxu1 %v5734_v58 }
 0x193   :  { %v667_v45 = vpop.f32.mrf.mxu0 }
 0x194   :  { %v4720_v50 = vmax.bf16 %v5734_v58, %v821_v9  ;;  %5755 = vst [vmem:[#allocation39_spill] sm:$0xff] %v4723_v12  ;;  %v668_v25 = vadd.f32 %v667_v45, %v4394_v19 }
 0x195   :  { %v669_v2 = vpop.f32.mrf.mxu0 }
 0x196   :  { %5754 = vst [vmem:[#allocation38_spill] sm:$0xff] %v4720_v50  ;;  %v670_v40 = vadd.f32 %v669_v2, %v4391_v17  ;;  %1336 = vmatprep.mubr.bf16.mxu1 %v4720_v50 }
 0x197   :  { %v671_v38 = vpop.f32.mrf.mxu0  ;;  %1337 = vmatmul.mubr.bf16.gmra.mxu1 %v4723_v12 }
 0x198   :  { %v672_v27 = vadd.f32 %v671_v38, %v4394_v19  ;;  %v822_v24 = vpack.c.bf16 %v670_v40, %v666_v56 }
 0x199   :  { %v675_v60 = vpop.f32.mrf.mxu0 }
 0x19a   :  { %v823_v9 = vpack.c.bf16 %v672_v27, %v668_v25  ;;  %v4736_v14 = vmax.bf16 %v5734_v58, %v822_v24  ;;  %v676_v45 = vadd.f32 %v675_v60, %v4391_v17 }
 0x19b   :  { %v677_v10 = vpop.f32.mrf.mxu0 }
 0x19c   :  { %v4733_v2 = vmax.bf16 %v5734_v58, %v823_v9  ;;  %5757 = vst [vmem:[#allocation41_spill] sm:$0xff] %v4736_v14  ;;  %v678_v40 = vadd.f32 %v677_v10, %v4394_v19 }
 0x19d   :  { %v679_v50 = vpop.f32.mrf.mxu0 }
 0x19e   :  { %5756 = vst [vmem:[#allocation40_spill] sm:$0xff] %v4733_v2  ;;  %v680_v12 = vadd.f32 %v679_v50, %v4391_v17  ;;  %1346 = vmatprep.mubr.bf16.mxu1 %v4733_v2 }
 0x19f   :  { %v681_v56 = vpop.f32.mrf.mxu0  ;;  %1347 = vmatmul.mubr.bf16.gmra.mxu1 %v4736_v14 }
 0x1a0   :  { %v682_v38 = vadd.f32 %v681_v56, %v4394_v19  ;;  %v824_v25 = vpack.c.bf16 %v680_v12, %v676_v45  ;;  %v3915_v56 = vld [vmem:[#allocation6 + $0x18] sm:$0xff]  }
 0x1a1   :  { %v685_v27 = vpop.f32.mrf.mxu0  ;;  %2484 = vmatpush1.bf16.msra.mxu1 %v3915_v56 }
 0x1a2   :  { %v825_v22 = vpack.c.bf16 %v682_v38, %v678_v40  ;;  %v4748_v50 = vmax.bf16 %v5734_v58, %v824_v25  ;;  %v686_v14 = vadd.f32 %v685_v27, %v4391_v17  ;;  %2485 = vmatprep.subr.bf16.mxu1 %v5734_v58 }
 0x1a3   :  { %v687_v9 = vpop.f32.mrf.mxu0 }
 0x1a4   :  { %v4745_v24 = vmax.bf16 %v5734_v58, %v825_v22  ;;  %5759 = vst [vmem:[#allocation43_spill] sm:$0xff] %v4748_v50  ;;  %v688_v12 = vadd.f32 %v687_v9, %v4394_v19  ;;  %v708_v9 = vadd.f32 %v4412_v47, %v4394_v19 }
 0x1a5   :  { %v689_v2 = vpop.f32.mrf.mxu0 }
 0x1a6   :  { %5758 = vst [vmem:[#allocation42_spill] sm:$0xff] %v4745_v24  ;;  %v690_v60 = vadd.f32 %v689_v2, %v4391_v17  ;;  %1356 = vmatprep.mubr.bf16.mxu1 %v4745_v24 }
 0x1a7   :  { %v691_v10 = vpop.f32.mrf.mxu0  ;;  %1357 = vmatmul.mubr.bf16.gmra.mxu1 %v4748_v50 }
 0x1a8   :  { %v692_v45 = vadd.f32 %v691_v10, %v4394_v19  ;;  %v826_v40 = vpack.c.bf16 %v690_v60, %v686_v14  ;;  %v712_v10 = vadd.f32 %v4430_v57, %v4394_v19 }
 0x1a9   :  { %v695_v38 = vpop.f32.mrf.mxu0 }
 0x1aa   :  { %v827_v22 = vpack.c.bf16 %v692_v45, %v688_v12  ;;  %v4761_v27 = vmax.bf16 %v5734_v58, %v826_v40  ;;  %v696_v60 = vadd.f32 %v695_v38, %v4391_v17  ;;  %v722_v38 = vadd.f32 %v4454_v18, %v4394_v19 }
 0x1ab   :  { %v697_v25 = vpop.f32.mrf.mxu0  ;;  %v728_v18 = vadd.f32 %v4460_v30, %v4394_v19 }
 0x1ac   :  { %v4758_v2 = vmax.bf16 %v5734_v58, %v827_v22  ;;  %v698_v45 = vadd.f32 %v697_v25, %v4394_v19  ;;  %v831_v22 = vpack.c.bf16 %v712_v10, %v708_v9 }
 0x1ad   :  { %v699_v24 = vpop.f32.mrf.mxu0 }
 0x1ae   :  { %v700_v14 = vadd.f32 %v699_v24, %v4391_v17  ;;  %1366 = vmatprep.mubr.bf16.mxu1 %v4758_v2  ;;  %v718_v24 = vadd.f32 %v4436_v3, %v4394_v19  ;;  %v4785_v25 = vmax.bf16 %v5734_v58, %v831_v22  ;;  %v5760_v3 = vpack.c.bf16 %v4426_v54, %v4418_v49 }
 0x1af   :  { %v701_v12 = vpop.f32.mrf.mxu0  ;;  %1367 = vmatmul.mubr.bf16.gmra.mxu1 %v4761_v27  ;;  %v5762_v22 = vpack.c.bf16 %v4450_v11, %v4442_v5 }
 0x1b0   :  { %v702_v56 = vadd.f32 %v701_v12, %v4394_v19  ;;  %v828_v40 = vpack.c.bf16 %v700_v14, %v696_v60  ;;  %v833_v9 = vpack.c.bf16 %v722_v38, %v718_v24  ;;  %v4794_v10 = vmax.bf16 %v5734_v58, %v5760_v3  ;;  %v942_v60 = vld [vmem:[%s5683_s4] sm:$0x3] }
 0x1b1   :  { %v732_v14 = vadd.f32 %v4478_v42, %v4394_v19  ;;  %v4809_v49 = vrot.slane %v942_v60, %v4382_v13  ;;  %v4819_v24 = vmax.bf16 %v5734_v58, %v5762_v22  ;;  %v738_v38 = vadd.f32 %v4484_v59, %v4394_v19  ;;  %v3917_v59 = vld [vmem:[#allocation6 + $0x8] sm:$0xff]  }
 0x1b2   :  { %v829_v50 = vpack.c.bf16 %v702_v56, %v698_v45  ;;  %v4777_v57 = vmax.bf16 %v5734_v58, %v828_v40  ;;  %v4804_v12 = vmax.bf16 %v5734_v58, %v833_v9  ;;  %v4812_v56 = vrot.slane %v942_v60, %v4388_v15 }
 0x1b3   :  { %v835_v30 = vpack.c.bf16 %v732_v14, %v728_v18  ;;  %v742_v3 = vadd.f32 %v4502_v16, %v4394_v19 }
 0x1b4   :  { %v4774_v47 = vmax.bf16 %v5734_v58, %v829_v50  ;;  %v3916_v50 = vld [vmem:[#allocation6 + $0x10] sm:$0xff]   ;;  %5761 = vst [vmem:[#allocation44_spill] sm:$0xff] %v4804_v12 }
 0x1b5   :  { %2486 = vmatpush1.bf16.msra.mxu1 %v3916_v50  ;;  %v4829_v60 = vmax.bf16 %v5734_v58, %v835_v30  ;;  %v837_v22 = vpack.c.bf16 %v742_v3, %v738_v38  ;;  %v748_v38 = vadd.f32 %v4508_v29, %v4394_v19 }
 0x1b6   :  { %1376 = vmatprep.mubr.bf16.mxu1 %v4774_v47  ;;  %2487 = vmatprep.subr.bf16.mxu1 %v5734_v58 }
 0x1b7   :  { %1377 = vmatmul.mubr.bf16.gmra.mxu1 %v4777_v57 }
 0x1b8   :  { %1386 = vmatprep.mubr.bf16.mxu1 %v4785_v25 }
 0x1b9   :  { %2488 = vmatpush1.bf16.msra.mxu1 %v3917_v59 }
 0x1ba   :  { %2489 = vmatprep.subr.bf16.mxu1 %v5734_v58 }
 0x1bf   :  { %v1148_v45 = vpop.f32.mrf.mxu1  ;;  %1387 = vmatmul.mubr.bf16.gmra.mxu1 %v4794_v10 }
 0x1c0   :  { %1396 = vmatprep.mubr.bf16.mxu1 %v4804_v12  ;;  %v1149_v50 = vadd.f32 %v1148_v45, %v4809_v49 }
 0x1c1   :  { %v1150_v54 = vpop.f32.mrf.mxu1 }
 0x1c2   :  { %v1151_v18 = vadd.f32 %v1150_v54, %v4812_v56 }
 0x1c3   :  { %v1152_v42 = vpop.f32.mrf.mxu1 }
 0x1c4   :  { %v1153_v40 = vadd.f32 %v1152_v42, %v4809_v49 }
 0x1c5   :  { %v1154_v9 = vpop.f32.mrf.mxu1 }
 0x1c6   :  { %v1155_v14 = vadd.f32 %v1154_v9, %v4812_v56  ;;  %v1465_v5 = vpack.c.bf16 %v1153_v40, %v1149_v50  ;;  %v5763_v40 = vpack.c.bf16 %v4474_v39, %v4466_v34 }
 0x1c7   :  { %v1158_v11 = vpop.f32.mrf.mxu1  ;;  %1397 = vmatmul.mubr.bf16.gmra.mxu1 %v4819_v24 }
 0x1c8   :  { %v1466_v42 = vpack.c.bf16 %v1155_v14, %v1151_v18  ;;  %1406 = vmatprep.mubr.bf16.mxu1 %v4829_v60  ;;  %v1529_v16 = vmax.bf16 %v5734_v58, %v1465_v5  ;;  %v4841_v50 = vmax.bf16 %v5734_v58, %v5763_v40  ;;  %v1159_v9 = vadd.f32 %v1158_v11, %v4809_v49 }
 0x1c9   :  { %v1160_v45 = vpop.f32.mrf.mxu1  ;;  %v752_v18 = vadd.f32 %v4526_v52, %v4394_v19  ;;  %v4851_v5 = vmax.bf16 %v5734_v58, %v837_v22  ;;  %v5764_v22 = vpack.c.bf16 %v4498_v8, %v4490_v62 }
 0x1ca   :  { %v1530_v12 = vmax.bf16 %v5734_v58, %v1466_v42  ;;  %v1161_v14 = vadd.f32 %v1160_v45, %v4812_v56 }
 0x1cb   :  { %v1162_v54 = vpop.f32.mrf.mxu1  ;;  %v839_v11 = vpack.c.bf16 %v752_v18, %v748_v38 }
 0x1cc   :  { %v1163_v30 = vadd.f32 %v1162_v54, %v4809_v49  ;;  %1829 = vmatprep.mubr.bf16.mxu0 %v1530_v12  ;;  %v4862_v54 = vmax.bf16 %v5734_v58, %v5764_v22 }
 0x1cd   :  { %v1164_v3 = vpop.f32.mrf.mxu1  ;;  %1830 = vmatmul.mubr.bf16.vlgmr.msra.gmra.mxu0 %v1529_v16 }
 0x1ce   :  { %v1165_v12 = vadd.f32 %v1164_v3, %v4812_v56  ;;  %v1467_v34 = vpack.c.bf16 %v1163_v30, %v1159_v9  ;;  %v758_v30 = vadd.f32 %v4532_v21, %v4394_v19  ;;  %v762_v9 = vadd.f32 %v4550_v55, %v4394_v19  ;;  %v3918_v21 = vld [vmem:[#allocation6] sm:$0xff]  }
 0x1cf   :  { %v1168_v39 = vpop.f32.mrf.mxu1  ;;  %1407 = vmatmul.mubr.bf16.gmra.mxu1 %v4841_v50 }
 0x1d0   :  { %v1468_v42 = vpack.c.bf16 %v1165_v12, %v1161_v14  ;;  %1416 = vmatprep.mubr.bf16.mxu1 %v4851_v5  ;;  %v1531_v52 = vmax.bf16 %v5734_v58, %v1467_v34  ;;  %v1169_v40 = vadd.f32 %v1168_v39, %v4809_v49  ;;  %v4872_v14 = vmax.bf16 %v5734_v58, %v839_v11 }
 0x1d1   :  { %v1170_v29 = vpop.f32.mrf.mxu1  ;;  %v841_v39 = vpack.c.bf16 %v762_v9, %v758_v30  ;;  %2490 = vmatpush1.bf16.msra.mxu1 %v3918_v21  ;;  %v772_v30 = vadd.f32 %v4574_v41, %v4394_v19  ;;  %v5766_v21 = vpack.c.bf16 %v4546_v46, %v4538_v26  ;;  %v3919_v46 = vld [vmem:[#allocation6 + $0x78] sm:$0xff]  }
 0x1d2   :  { %v1532_v59 = vmax.bf16 %v5734_v58, %v1468_v42  ;;  %v1171_v3 = vadd.f32 %v1170_v29, %v4812_v56  ;;  %2491 = vmatprep.subr.bf16.mxu1 %v5734_v58 }
 0x1d3   :  { %v1172_v16 = vpop.f32.mrf.mxu1  ;;  %v4894_v9 = vmax.bf16 %v5734_v58, %v841_v39 }
 0x1d4   :  { %v1173_v45 = vadd.f32 %v1172_v16, %v4809_v49  ;;  %1839 = vmatprep.mubr.bf16.mxu0 %v1532_v59  ;;  %v5765_v59 = vpack.c.bf16 %v4522_v44, %v4514_v37 }
 0x1d5   :  { %v1174_v38 = vpop.f32.mrf.mxu1  ;;  %1840 = vmatmul.mubr.bf16.gmra.mxu0 %v1531_v52  ;;  %v768_v52 = vadd.f32 %v4556_v23, %v4394_v19  ;;  %2492 = vmatpush2.bf16.msra.mxu1 %v3919_v46 }
 0x1d6   :  { %v1175_v18 = vadd.f32 %v1174_v38, %v4812_v56  ;;  %v1469_v62 = vpack.c.bf16 %v1173_v45, %v1169_v40  ;;  %v4884_v16 = vmax.bf16 %v5734_v58, %v5765_v59  ;;  %2493 = vmatprep.subr.bf16.mxu1 %v5734_v58 }
 0x1d7   :  { %v1178_v8 = vpop.f32.mrf.mxu1  ;;  %1417 = vmatmul.mubr.bf16.gmra.mxu1 %v4862_v54 }
 0x1d8   :  { %v1470_v12 = vpack.c.bf16 %v1175_v18, %v1171_v3  ;;  %1426 = vmatprep.mubr.bf16.mxu1 %v4872_v14  ;;  %v1533_v29 = vmax.bf16 %v5734_v58, %v1469_v62  ;;  %v1179_v45 = vadd.f32 %v1178_v8, %v4809_v49  ;;  %v843_v18 = vpack.c.bf16 %v772_v30, %v768_v52 }
 0x1d9   :  { %v1180_v34 = vpop.f32.mrf.mxu1 }
 0x1da   :  { %v1534_v42 = vmax.bf16 %v5734_v58, %v1470_v12  ;;  %v1181_v40 = vadd.f32 %v1180_v34, %v4812_v56  ;;  %v4905_v34 = vmax.bf16 %v5734_v58, %v5766_v21  ;;  %v4913_v59 = vmax.bf16 %v5734_v58, %v843_v18 }
 0x1db   :  { %v1182_v55 = vpop.f32.mrf.mxu1 }
 0x1dc   :  { %v1183_v11 = vadd.f32 %v1182_v55, %v4809_v49  ;;  %1849 = vmatprep.mubr.bf16.mxu0 %v1534_v42  ;;  %v778_v55 = vadd.f32 %v4582_v43, %v4394_v19 }
 0x1dd   :  { %v1184_v22 = vpop.f32.mrf.mxu1  ;;  %1850 = vmatmul.mubr.bf16.gmra.mxu0 %v1533_v29 }
 0x1de   :  { %v1185_v38 = vadd.f32 %v1184_v22, %v4812_v56  ;;  %v1471_v37 = vpack.c.bf16 %v1183_v11, %v1179_v45  ;;  %v845_v30 = vpack.c.bf16 %v778_v55, %v778_v55 }
 0x1df   :  { %v1188_v44 = vpop.f32.mrf.mxu1  ;;  %1427 = vmatmul.mubr.bf16.gmra.mxu1 %v4884_v16 }
 0x1e0   :  { %v1472_v3 = vpack.c.bf16 %v1185_v38, %v1181_v40  ;;  %1436 = vmatprep.mubr.bf16.mxu1 %v4894_v9  ;;  %v1535_v41 = vmax.bf16 %v5734_v58, %v1471_v37  ;;  %v1189_v39 = vadd.f32 %v1188_v44, %v4809_v49  ;;  %v5767_v37 = vpack.c.bf16 %v4570_v63, %v4562_v20 }
 0x1e1   :  { %v1190_v23 = vpop.f32.mrf.mxu1 }
 0x1e2   :  { %v1536_v62 = vmax.bf16 %v5734_v58, %v1472_v3  ;;  %v1191_v29 = vadd.f32 %v1190_v23, %v4812_v56  ;;  %v4925_v44 = vmax.bf16 %v5734_v58, %v5767_v37  ;;  %v776_v3 = vadd.f32 %v4580_v6, %v4391_v17 }
 0x1e3   :  { %v1192_v8 = vpop.f32.mrf.mxu1 }
 0x1e4   :  { %v1193_v12 = vadd.f32 %v1192_v8, %v4809_v49  ;;  %1859 = vmatprep.mubr.bf16.mxu0 %v1536_v62  ;;  %v4931_v62 = vmax.bf16 %v5734_v58, %v845_v30  ;;  %v844_v63 = vpack.c.bf16 %v776_v3, %v776_v3 }
 0x1e5   :  { %v1194_v42 = vpop.f32.mrf.mxu1  ;;  %1860 = vmatmul.mubr.bf16.gmra.mxu0 %v1535_v41 }
 0x1e6   :  { %v1195_v11 = vadd.f32 %v1194_v42, %v4812_v56  ;;  %v1473_v52 = vpack.c.bf16 %v1193_v12, %v1189_v39 }
 0x1e7   :  { %v1198_v45 = vpop.f32.mrf.mxu1  ;;  %1437 = vmatmul.mubr.bf16.gmra.mxu1 %v4905_v34 }
 0x1e8   :  { %v1474_v26 = vpack.c.bf16 %v1195_v11, %v1191_v29  ;;  %1446 = vmatprep.mubr.bf16.mxu1 %v4913_v59  ;;  %v1537_v19 = vmax.bf16 %v5734_v58, %v1473_v52  ;;  %v1199_v23 = vadd.f32 %v1198_v45, %v4809_v49  ;;  %v4941_v29 = vmax.bf16 %v5734_v58, %v844_v63 }
 0x1e9   :  { %v1200_v22 = vpop.f32.mrf.mxu1 }
 0x1ea   :  { %v1538_v40 = vmax.bf16 %v5734_v58, %v1474_v26  ;;  %v1201_v8 = vadd.f32 %v1200_v22, %v4812_v56 }
 0x1eb   :  { %v1202_v43 = vpop.f32.mrf.mxu1 }
 0x1ec   :  { %v1203_v38 = vadd.f32 %v1202_v43, %v4809_v49  ;;  %1869 = vmatprep.mubr.bf16.mxu0 %v1538_v40  ;;  %v3920_v40 = vld [vmem:[#allocation6 + $0x70] sm:$0xff]  }
 0x1ed   :  { %v1204_v18 = vpop.f32.mrf.mxu1  ;;  %1870 = vmatmul.mubr.bf16.gmra.mxu0 %v1537_v19  ;;  %2494 = vmatpush2.bf16.msra.mxu1 %v3920_v40  ;;  %v3922_v40 = vld [vmem:[#allocation6 + $0x60] sm:$0xff]  }
 0x1ee   :  { %v1205_v41 = vadd.f32 %v1204_v18, %v4812_v56  ;;  %v1475_v12 = vpack.c.bf16 %v1203_v38, %v1199_v23  ;;  %2495 = vmatprep.subr.bf16.mxu1 %v5734_v58 }
 0x1ef   :  { %v1208_v21 = vpop.f32.mrf.mxu1  ;;  %1447 = vmatmul.mubr.bf16.gmra.mxu1 %v4925_v44 }
 0x1f0   :  { %v1476_v20 = vpack.c.bf16 %v1205_v41, %v1201_v8  ;;  %1456 = vmatprep.mubr.bf16.mxu1 %v4931_v62  ;;  %v1539_v39 = vmax.bf16 %v5734_v58, %v1475_v12  ;;  %v1209_v11 = vadd.f32 %v1208_v21, %v4809_v49 }
 0x1f1   :  { %v1210_v17 = vpop.f32.mrf.mxu1 }
 0x1f2   :  { %v1540_v6 = vmax.bf16 %v5734_v58, %v1476_v20  ;;  %v1211_v45 = vadd.f32 %v1210_v17, %v4812_v56 }
 0x1f3   :  { %v1212_v42 = vpop.f32.mrf.mxu1 }
 0x1f4   :  { %v1213_v55 = vadd.f32 %v1212_v42, %v4809_v49  ;;  %1879 = vmatprep.mubr.bf16.mxu0 %v1540_v6 }
 0x1f5   :  { %v1214_v52 = vpop.f32.mrf.mxu1  ;;  %1880 = vmatmul.mubr.bf16.gmra.mxu0 %v1539_v39 }
 0x1f6   :  { %v1215_v26 = vadd.f32 %v1214_v52, %v4812_v56  ;;  %v1477_v46 = vpack.c.bf16 %v1213_v55, %v1209_v11  ;;  %v3921_v55 = vld [vmem:[#allocation6 + $0x68] sm:$0xff]  }
 0x1f7   :  { %v1218_v22 = vpop.f32.mrf.mxu1  ;;  %1457 = vmatmul.mubr.bf16.gmra.mxu1 %v4941_v29 }
 0x1f8   :  { %v1478_v30 = vpack.c.bf16 %v1215_v26, %v1211_v45  ;;  %v1541_v38 = vmax.bf16 %v5734_v58, %v1477_v46  ;;  %v1219_v23 = vadd.f32 %v1218_v22, %v4809_v49  ;;  %2496 = vmatpush2.bf16.msra.mxu1 %v3921_v55 }
 0x1f9   :  { %v1220_v19 = vpop.f32.mrf.mxu1  ;;  %2497 = vmatprep.subr.bf16.mxu1 %v5734_v58 }
 0x1fa   :  { %v1542_v43 = vmax.bf16 %v5734_v58, %v1478_v30  ;;  %v1221_v8 = vadd.f32 %v1220_v19, %v4812_v56 }
 0x1fb   :  { %v1222_v37 = vpop.f32.mrf.mxu1 }
 0x1fc   :  { %v1223_v3 = vadd.f32 %v1222_v37, %v4809_v49  ;;  %1889 = vmatprep.mubr.bf16.mxu0 %v1542_v43  ;;  %2498 = vmatpush2.bf16.msra.mxu1 %v3922_v40 }
 0x1fd   :  { %v1224_v18 = vpop.f32.mrf.mxu1  ;;  %1890 = vmatmul.mubr.bf16.gmra.mxu0 %v1541_v38  ;;  %2499 = vmatprep.subr.bf16.mxu1 %v5734_v58 }
 0x1fe   :  { %v1225_v41 = vadd.f32 %v1224_v18, %v4812_v56  ;;  %v1479_v12 = vpack.c.bf16 %v1223_v3, %v1219_v23  ;;  %v3923_v23 = vld [vmem:[#allocation6 + $0x58] sm:$0xff]  }
 0x1ff   :  { %v1228_v21 = vpop.f32.mrf.mxu1 }
 0x200   :  { %v1480_v20 = vpack.c.bf16 %v1225_v41, %v1221_v8  ;;  %v1543_v6 = vmax.bf16 %v5734_v58, %v1479_v12  ;;  %v1229_v11 = vadd.f32 %v1228_v21, %v4809_v49  ;;  %2500 = vmatpush2.bf16.msra.mxu1 %v3923_v23 }
 0x201   :  { %v1230_v63 = vpop.f32.mrf.mxu1  ;;  %2501 = vmatprep.subr.bf16.mxu1 %v5734_v58 }
 0x202   :  { %v1544_v17 = vmax.bf16 %v5734_v58, %v1480_v20  ;;  %v1231_v45 = vadd.f32 %v1230_v63, %v4812_v56 }
 0x203   :  { %v1232_v39 = vpop.f32.mrf.mxu1 }
 0x204   :  { %v1233_v42 = vadd.f32 %v1232_v39, %v4809_v49  ;;  %1899 = vmatprep.mubr.bf16.mxu0 %v1544_v17  ;;  %v3924_v17 = vld [vmem:[#allocation6 + $0x50] sm:$0xff]  }
 0x205   :  { %v1234_v52 = vpop.f32.mrf.mxu1  ;;  %1900 = vmatmul.mubr.bf16.gmra.mxu0 %v1543_v6  ;;  %2502 = vmatpush2.bf16.msra.mxu1 %v3924_v17 }
 0x206   :  { %v1235_v26 = vadd.f32 %v1234_v52, %v4812_v56  ;;  %v1481_v46 = vpack.c.bf16 %v1233_v42, %v1229_v11  ;;  %2503 = vmatprep.subr.bf16.mxu1 %v5734_v58 }
 0x207   :  { %v1238_v22 = vpop.f32.mrf.mxu1 }
 0x208   :  { %v1482_v30 = vpack.c.bf16 %v1235_v26, %v1231_v45  ;;  %v1545_v38 = vmax.bf16 %v5734_v58, %v1481_v46  ;;  %v1239_v18 = vadd.f32 %v1238_v22, %v4809_v49  ;;  %v3925_v26 = vld [vmem:[#allocation6 + $0x48] sm:$0xff]  }
 0x209   :  { %v1240_v19 = vpop.f32.mrf.mxu1  ;;  %2504 = vmatpush2.bf16.msra.mxu1 %v3925_v26 }
 0x20a   :  { %v1546_v43 = vmax.bf16 %v5734_v58, %v1482_v30  ;;  %v1241_v41 = vadd.f32 %v1240_v19, %v4812_v56  ;;  %2505 = vmatprep.subr.bf16.mxu1 %v5734_v58 }
 0x20b   :  { %v1242_v37 = vpop.f32.mrf.mxu1 }
 0x20c   :  { %v1243_v3 = vadd.f32 %v1242_v37, %v4809_v49  ;;  %1909 = vmatprep.mubr.bf16.mxu0 %v1546_v43 }
 0x20d   :  { %v1244_v8 = vpop.f32.mrf.mxu1  ;;  %1910 = vmatmul.mubr.bf16.gmra.mxu0 %v1545_v38  ;;  %v3926_v38 = vld [vmem:[#allocation6 + $0x40] sm:$0xff]  }
 0x20e   :  { %v1245_v12 = vadd.f32 %v1244_v8, %v4812_v56  ;;  %v1483_v21 = vpack.c.bf16 %v1243_v3, %v1239_v18  ;;  %2506 = vmatpush2.bf16.msra.mxu1 %v3926_v38 }
 0x20f   :  { %v1248_v20 = vpop.f32.mrf.mxu1 }
 0x210   :  { %v1484_v63 = vpack.c.bf16 %v1245_v12, %v1241_v41  ;;  %v1547_v42 = vmax.bf16 %v5734_v58, %v1483_v21  ;;  %v1249_v52 = vadd.f32 %v1248_v20, %v4809_v49 }
 0x211   :  { %v1250_v6 = vpop.f32.mrf.mxu1 }
 0x212   :  { %v1548_v39 = vmax.bf16 %v5734_v58, %v1484_v63  ;;  %v1251_v46 = vadd.f32 %v1250_v6, %v4812_v56 }
 0x213   :  { %v1252_v55 = vpop.f32.mrf.mxu1 }
 0x214   :  { %v1253_v11 = vadd.f32 %v1252_v55, %v4809_v49  ;;  %1919 = vmatprep.mubr.bf16.mxu0 %v1548_v39 }
 0x215   :  { %v1254_v45 = vpop.f32.mrf.mxu1  ;;  %1920 = vmatmul.mubr.bf16.gmra.mxu0 %v1547_v42 }
 0x216   :  { %v1255_v22 = vadd.f32 %v1254_v45, %v4812_v56  ;;  %v1485_v30 = vpack.c.bf16 %v1253_v11, %v1249_v52 }
 0x217   :  { %v1258_v40 = vpop.f32.mrf.mxu1 }
 0x218   :  { %v1486_v19 = vpack.c.bf16 %v1255_v22, %v1251_v46  ;;  %v1549_v3 = vmax.bf16 %v5734_v58, %v1485_v30  ;;  %v1259_v8 = vadd.f32 %v1258_v40, %v4809_v49 }
 0x219   :  { %v1260_v43 = vpop.f32.mrf.mxu1 }
 0x21a   :  { %v1550_v37 = vmax.bf16 %v5734_v58, %v1486_v19  ;;  %v1261_v12 = vadd.f32 %v1260_v43, %v4812_v56 }
 0x21b   :  { %v1262_v23 = vpop.f32.mrf.mxu1 }
 0x21c   :  { %v1263_v18 = vadd.f32 %v1262_v23, %v4809_v49  ;;  %1929 = vmatprep.mubr.bf16.mxu0 %v1550_v37 }
 0x21d   :  { %v1264_v41 = vpop.f32.mrf.mxu1  ;;  %1930 = vmatmul.mubr.bf16.gmra.mxu0 %v1549_v3 }
 0x21e   :  { %v1265_v21 = vadd.f32 %v1264_v41, %v4812_v56  ;;  %v1487_v20 = vpack.c.bf16 %v1263_v18, %v1259_v8 }
 0x21f   :  { %v1268_v63 = vpop.f32.mrf.mxu1 }
 0x220   :  { %v1488_v17 = vpack.c.bf16 %v1265_v21, %v1261_v12  ;;  %v1551_v42 = vmax.bf16 %v5734_v58, %v1487_v20  ;;  %v1269_v52 = vadd.f32 %v1268_v63, %v4809_v49 }
 0x221   :  { %v1270_v6 = vpop.f32.mrf.mxu1 }
 0x222   :  { %v1552_v39 = vmax.bf16 %v5734_v58, %v1488_v17  ;;  %v1271_v26 = vadd.f32 %v1270_v6, %v4812_v56 }
 0x223   :  { %v1272_v55 = vpop.f32.mrf.mxu1 }
 0x224   :  { %v1273_v11 = vadd.f32 %v1272_v55, %v4809_v49  ;;  %1939 = vmatprep.mubr.bf16.mxu0 %v1552_v39 }
 0x225   :  { %v1274_v45 = vpop.f32.mrf.mxu1  ;;  %1940 = vmatmul.mubr.bf16.gmra.mxu0 %v1551_v42 }
 0x226   :  { %v1275_v46 = vadd.f32 %v1274_v45, %v4812_v56  ;;  %v1489_v22 = vpack.c.bf16 %v1273_v11, %v1269_v52 }
 0x227   :  { %v1278_v30 = vpop.f32.mrf.mxu1 }
 0x228   :  { %v1490_v40 = vpack.c.bf16 %v1275_v46, %v1271_v26  ;;  %v1553_v38 = vmax.bf16 %v5734_v58, %v1489_v22  ;;  %v1279_v23 = vadd.f32 %v1278_v30, %v4809_v49 }
 0x229   :  { %v1280_v19 = vpop.f32.mrf.mxu1 }
 0x22a   :  { %v1554_v43 = vmax.bf16 %v5734_v58, %v1490_v40  ;;  %v1281_v8 = vadd.f32 %v1280_v19, %v4812_v56 }
 0x22b   :  { %v1282_v37 = vpop.f32.mrf.mxu1 }
 0x22c   :  { %v1283_v3 = vadd.f32 %v1282_v37, %v4809_v49  ;;  %1949 = vmatprep.mubr.bf16.mxu0 %v1554_v43 }
 0x22d   :  { %v1284_v18 = vpop.f32.mrf.mxu1  ;;  %1950 = vmatmul.mubr.bf16.gmra.mxu0 %v1553_v38 }
 0x22e   :  { %v1285_v41 = vadd.f32 %v1284_v18, %v4812_v56  ;;  %v1491_v12 = vpack.c.bf16 %v1283_v3, %v1279_v23 }
 0x22f   :  { %v1288_v21 = vpop.f32.mrf.mxu1 }
 0x230   :  { %v1492_v20 = vpack.c.bf16 %v1285_v41, %v1281_v8  ;;  %v1555_v6 = vmax.bf16 %v5734_v58, %v1491_v12  ;;  %v1289_v55 = vadd.f32 %v1288_v21, %v4809_v49 }
 0x231   :  { %v1290_v63 = vpop.f32.mrf.mxu1 }
 0x232   :  { %v1556_v17 = vmax.bf16 %v5734_v58, %v1492_v20  ;;  %v1291_v52 = vadd.f32 %v1290_v63, %v4812_v56 }
 0x233   :  { %v1292_v39 = vpop.f32.mrf.mxu1 }
 0x234   :  { %v1293_v42 = vadd.f32 %v1292_v39, %v4809_v49  ;;  %1959 = vmatprep.mubr.bf16.mxu0 %v1556_v17 }
 0x235   :  { %v1294_v11 = vpop.f32.mrf.mxu1  ;;  %1960 = vmatmul.mubr.bf16.gmra.mxu0 %v1555_v6 }
 0x236   :  { %v1295_v45 = vadd.f32 %v1294_v11, %v4812_v56  ;;  %v1493_v26 = vpack.c.bf16 %v1293_v42, %v1289_v55 }
 0x237   :  { %v1298_v46 = vpop.f32.mrf.mxu1 }
 0x238   :  { %v1494_v22 = vpack.c.bf16 %v1295_v45, %v1291_v52  ;;  %v1557_v19 = vmax.bf16 %v5734_v58, %v1493_v26  ;;  %v1299_v37 = vadd.f32 %v1298_v46, %v4809_v49 }
 0x239   :  { %v1300_v30 = vpop.f32.mrf.mxu1 }
 0x23a   :  { %v1558_v40 = vmax.bf16 %v5734_v58, %v1494_v22  ;;  %v1301_v23 = vadd.f32 %v1300_v30, %v4812_v56 }
 0x23b   :  { %v1302_v43 = vpop.f32.mrf.mxu1 }
 0x23c   :  { %v1303_v38 = vadd.f32 %v1302_v43, %v4809_v49  ;;  %1969 = vmatprep.mubr.bf16.mxu0 %v1558_v40 }
 0x23d   :  { %v1304_v3 = vpop.f32.mrf.mxu1  ;;  %1970 = vmatmul.mubr.bf16.gmra.mxu0 %v1557_v19 }
 0x23e   :  { %v1305_v18 = vadd.f32 %v1304_v3, %v4812_v56  ;;  %v1495_v8 = vpack.c.bf16 %v1303_v38, %v1299_v37 }
 0x23f   :  { %v1308_v41 = vpop.f32.mrf.mxu1 }
 0x240   :  { %v1496_v12 = vpack.c.bf16 %v1305_v18, %v1301_v23  ;;  %v1559_v63 = vmax.bf16 %v5734_v58, %v1495_v8  ;;  %v1309_v39 = vadd.f32 %v1308_v41, %v4809_v49 }
 0x241   :  { %v1310_v21 = vpop.f32.mrf.mxu1 }
 0x242   :  { %v1560_v20 = vmax.bf16 %v5734_v58, %v1496_v12  ;;  %v1311_v55 = vadd.f32 %v1310_v21, %v4812_v56 }
 0x243   :  { %v1312_v17 = vpop.f32.mrf.mxu1 }
 0x244   :  { %v1313_v6 = vadd.f32 %v1312_v17, %v4809_v49  ;;  %1979 = vmatprep.mubr.bf16.mxu0 %v1560_v20 }
 0x245   :  { %v1314_v42 = vpop.f32.mrf.mxu1  ;;  %1980 = vmatmul.mubr.bf16.gmra.mxu0 %v1559_v63 }
 0x246   :  { %v1315_v11 = vadd.f32 %v1314_v42, %v4812_v56  ;;  %v1497_v52 = vpack.c.bf16 %v1313_v6, %v1309_v39 }
 0x247   :  { %v1318_v45 = vpop.f32.mrf.mxu1 }
 0x248   :  { %v1498_v26 = vpack.c.bf16 %v1315_v11, %v1311_v55  ;;  %v1561_v30 = vmax.bf16 %v5734_v58, %v1497_v52  ;;  %v1319_v43 = vadd.f32 %v1318_v45, %v4809_v49 }
 0x249   :  { %v1320_v46 = vpop.f32.mrf.mxu1 }
 0x24a   :  { %v1562_v22 = vmax.bf16 %v5734_v58, %v1498_v26  ;;  %v1321_v37 = vadd.f32 %v1320_v46, %v4812_v56 }
 0x24b   :  { %v1322_v40 = vpop.f32.mrf.mxu1 }
 0x24c   :  { %v1323_v19 = vadd.f32 %v1322_v40, %v4809_v49  ;;  %1989 = vmatprep.mubr.bf16.mxu0 %v1562_v22 }
 0x24d   :  { %v1324_v38 = vpop.f32.mrf.mxu1  ;;  %1990 = vmatmul.mubr.bf16.gmra.mxu0 %v1561_v30 }
 0x24e   :  { %v1325_v3 = vadd.f32 %v1324_v38, %v4812_v56  ;;  %v1499_v23 = vpack.c.bf16 %v1323_v19, %v1319_v43 }
 0x24f   :  { %v1328_v18 = vpop.f32.mrf.mxu1 }
 0x250   :  { %v1500_v8 = vpack.c.bf16 %v1325_v3, %v1321_v37  ;;  %v1563_v21 = vmax.bf16 %v5734_v58, %v1499_v23  ;;  %v1329_v17 = vadd.f32 %v1328_v18, %v4809_v49 }
 0x251   :  { %v1330_v41 = vpop.f32.mrf.mxu1 }
 0x252   :  { %v1564_v12 = vmax.bf16 %v5734_v58, %v1500_v8  ;;  %v1331_v39 = vadd.f32 %v1330_v41, %v4812_v56 }
 0x253   :  { %v1332_v20 = vpop.f32.mrf.mxu1 }
 0x254   :  { %v1333_v63 = vadd.f32 %v1332_v20, %v4809_v49  ;;  %1999 = vmatprep.mubr.bf16.mxu0 %v1564_v12 }
 0x255   :  { %v1334_v6 = vpop.f32.mrf.mxu1  ;;  %2000 = vmatmul.mubr.bf16.gmra.mxu0 %v1563_v21 }
 0x256   :  { %v1335_v42 = vadd.f32 %v1334_v6, %v4812_v56  ;;  %v1501_v55 = vpack.c.bf16 %v1333_v63, %v1329_v17 }
 0x257   :  { %v1338_v11 = vpop.f32.mrf.mxu1 }
 0x258   :  { %v1502_v52 = vpack.c.bf16 %v1335_v42, %v1331_v39  ;;  %v1565_v46 = vmax.bf16 %v5734_v58, %v1501_v55  ;;  %v1339_v40 = vadd.f32 %v1338_v11, %v4809_v49 }
 0x259   :  { %v1340_v45 = vpop.f32.mrf.mxu1 }
 0x25a   :  { %v1566_v26 = vmax.bf16 %v5734_v58, %v1502_v52  ;;  %v1341_v43 = vadd.f32 %v1340_v45, %v4812_v56 }
 0x25b   :  { %v1342_v22 = vpop.f32.mrf.mxu1 }
 0x25c   :  { %v1343_v30 = vadd.f32 %v1342_v22, %v4809_v49  ;;  %2009 = vmatprep.mubr.bf16.mxu0 %v1566_v26 }
 0x25d   :  { %v1344_v19 = vpop.f32.mrf.mxu1  ;;  %2010 = vmatmul.mubr.bf16.gmra.mxu0 %v1565_v46 }
 0x25e   :  { %v1345_v38 = vadd.f32 %v1344_v19, %v4812_v56  ;;  %v1503_v37 = vpack.c.bf16 %v1343_v30, %v1339_v40 }
 0x25f   :  { %v1348_v3 = vpop.f32.mrf.mxu1 }
 0x260   :  { %v1504_v23 = vpack.c.bf16 %v1345_v38, %v1341_v43  ;;  %v1567_v41 = vmax.bf16 %v5734_v58, %v1503_v37  ;;  %v1349_v20 = vadd.f32 %v1348_v3, %v4809_v49 }
 0x261   :  { %v1350_v18 = vpop.f32.mrf.mxu1 }
 0x262   :  { %v1568_v8 = vmax.bf16 %v5734_v58, %v1504_v23  ;;  %v1351_v17 = vadd.f32 %v1350_v18, %v4812_v56 }
 0x263   :  { %v1352_v12 = vpop.f32.mrf.mxu1 }
 0x264   :  { %v1353_v21 = vadd.f32 %v1352_v12, %v4809_v49  ;;  %2019 = vmatprep.mubr.bf16.mxu0 %v1568_v8 }
 0x265   :  { %v1354_v63 = vpop.f32.mrf.mxu1  ;;  %2020 = vmatmul.mubr.bf16.gmra.mxu0 %v1567_v41 }
 0x266   :  { %v1355_v6 = vadd.f32 %v1354_v63, %v4812_v56  ;;  %v1505_v39 = vpack.c.bf16 %v1353_v21, %v1349_v20 }
 0x267   :  { %v1358_v42 = vpop.f32.mrf.mxu1 }
 0x268   :  { %v1506_v55 = vpack.c.bf16 %v1355_v6, %v1351_v17  ;;  %v1569_v45 = vmax.bf16 %v5734_v58, %v1505_v39  ;;  %v1359_v22 = vadd.f32 %v1358_v42, %v4809_v49 }
 0x269   :  { %v1360_v11 = vpop.f32.mrf.mxu1 }
 0x26a   :  { %v1570_v52 = vmax.bf16 %v5734_v58, %v1506_v55  ;;  %v1361_v40 = vadd.f32 %v1360_v11, %v4812_v56 }
 0x26b   :  { %v1362_v26 = vpop.f32.mrf.mxu1 }
 0x26c   :  { %v1363_v46 = vadd.f32 %v1362_v26, %v4809_v49  ;;  %2029 = vmatprep.mubr.bf16.mxu0 %v1570_v52 }
 0x26d   :  { %v1364_v30 = vpop.f32.mrf.mxu1  ;;  %2030 = vmatmul.mubr.bf16.gmra.mxu0 %v1569_v45 }
 0x26e   :  { %v1365_v19 = vadd.f32 %v1364_v30, %v4812_v56  ;;  %v1507_v43 = vpack.c.bf16 %v1363_v46, %v1359_v22 }
 0x26f   :  { %v1368_v38 = vpop.f32.mrf.mxu1 }
 0x270   :  { %v1508_v37 = vpack.c.bf16 %v1365_v19, %v1361_v40  ;;  %v1571_v18 = vmax.bf16 %v5734_v58, %v1507_v43  ;;  %v1369_v12 = vadd.f32 %v1368_v38, %v4809_v49 }
 0x271   :  { %v1370_v3 = vpop.f32.mrf.mxu1 }
 0x272   :  { %v1572_v23 = vmax.bf16 %v5734_v58, %v1508_v37  ;;  %v1371_v20 = vadd.f32 %v1370_v3, %v4812_v56 }
 0x273   :  { %v1372_v8 = vpop.f32.mrf.mxu1 }
 0x274   :  { %v1373_v41 = vadd.f32 %v1372_v8, %v4809_v49  ;;  %2039 = vmatprep.mubr.bf16.mxu0 %v1572_v23 }
 0x275   :  { %v1374_v21 = vpop.f32.mrf.mxu1  ;;  %2040 = vmatmul.mubr.bf16.gmra.mxu0 %v1571_v18 }
 0x276   :  { %v1375_v63 = vadd.f32 %v1374_v21, %v4812_v56  ;;  %v1509_v17 = vpack.c.bf16 %v1373_v41, %v1369_v12 }
 0x277   :  { %v1378_v6 = vpop.f32.mrf.mxu1 }
 0x278   :  { %v1510_v39 = vpack.c.bf16 %v1375_v63, %v1371_v20  ;;  %v1573_v11 = vmax.bf16 %v5734_v58, %v1509_v17  ;;  %v1379_v26 = vadd.f32 %v1378_v6, %v4809_v49 }
 0x279   :  { %v1380_v42 = vpop.f32.mrf.mxu1 }
 0x27a   :  { %v1574_v55 = vmax.bf16 %v5734_v58, %v1510_v39  ;;  %v1381_v22 = vadd.f32 %v1380_v42, %v4812_v56 }
 0x27b   :  { %v1382_v52 = vpop.f32.mrf.mxu1 }
 0x27c   :  { %v1383_v45 = vadd.f32 %v1382_v52, %v4809_v49  ;;  %2049 = vmatprep.mubr.bf16.mxu0 %v1574_v55 }
 0x27d   :  { %v1384_v46 = vpop.f32.mrf.mxu1  ;;  %2050 = vmatmul.mubr.bf16.gmra.mxu0 %v1573_v11  ;;  %v1625_v11 = vld [vmem:[%s5685_s6] sm:$0x3] }
 0x27e   :  { %v1385_v30 = vadd.f32 %v1384_v46, %v4812_v56  ;;  %v1511_v40 = vpack.c.bf16 %v1383_v45, %v1379_v26 }
 0x27f   :  { %v1388_v19 = vpop.f32.mrf.mxu1 }
 0x280   :  { %v1512_v43 = vpack.c.bf16 %v1385_v30, %v1381_v22  ;;  %v1575_v3 = vmax.bf16 %v5734_v58, %v1511_v40  ;;  %v1389_v8 = vadd.f32 %v1388_v19, %v4809_v49  ;;  %v5071_v40 = vrot.slane %v1625_v11, %v4382_v13 }
 0x281   :  { %v1390_v38 = vpop.f32.mrf.mxu1 }
 0x282   :  { %v1576_v37 = vmax.bf16 %v5734_v58, %v1512_v43  ;;  %v1391_v12 = vadd.f32 %v1390_v38, %v4812_v56 }
 0x283   :  { %v1392_v23 = vpop.f32.mrf.mxu1 }
 0x284   :  { %v1393_v18 = vadd.f32 %v1392_v23, %v4809_v49  ;;  %2059 = vmatprep.mubr.bf16.mxu0 %v1576_v37  ;;  %v3927_v23 = vld [vmem:[#allocation8 + $0x38] sm:$0xff]  }
 0x285   :  { %v1394_v41 = vpop.f32.mrf.mxu1  ;;  %2060 = vmatmul.mubr.bf16.gmra.mxu0 %v1575_v3  ;;  %v5074_v3 = vrot.slane %v1625_v11, %v4388_v15  ;;  %3686 = vmatprep.subr.bf16.mxu0 %v3927_v23 }
 0x286   :  { %v1395_v21 = vadd.f32 %v1394_v41, %v4812_v56  ;;  %v1513_v20 = vpack.c.bf16 %v1393_v18, %v1389_v8  ;;  %3687 = vmatpush3.bf16.msra.mxu0 %v3927_v23 }
 0x287   :  { %v1398_v63 = vpop.f32.mrf.mxu1 }
 0x288   :  { %v1514_v17 = vpack.c.bf16 %v1395_v21, %v1391_v12  ;;  %v1577_v42 = vmax.bf16 %v5734_v58, %v1513_v20  ;;  %v1399_v45 = vadd.f32 %v1398_v63, %v4809_v49 }
 0x289   :  { %v1400_v6 = vpop.f32.mrf.mxu1 }
 0x28a   :  { %v1578_v39 = vmax.bf16 %v5734_v58, %v1514_v17  ;;  %v1401_v22 = vadd.f32 %v1400_v6, %v4812_v56 }
 0x28b   :  { %v1402_v55 = vpop.f32.mrf.mxu1 }
 0x28c   :  { %v1403_v52 = vadd.f32 %v1402_v55, %v4809_v49  ;;  %2069 = vmatprep.mubr.bf16.mxu0 %v1578_v39 }
 0x28d   :  { %v1404_v26 = vpop.f32.mrf.mxu1  ;;  %v1831_v46 = vpop.f32.mrf.mxu0  ;;  %2070 = vmatmul.mubr.bf16.gmra.mxu0 %v1577_v42 }
 0x28e   :  { %v1405_v30 = vadd.f32 %v1404_v26, %v4812_v56  ;;  %v1515_v19 = vpack.c.bf16 %v1403_v52, %v1399_v45  ;;  %v1832_v41 = vadd.f32 %v1831_v46, %v5071_v40 }
 0x28f   :  { %v1408_v43 = vpop.f32.mrf.mxu1  ;;  %v1833_v38 = vpop.f32.mrf.mxu0 }
 0x290   :  { %v1516_v37 = vpack.c.bf16 %v1405_v30, %v1401_v22  ;;  %v1579_v20 = vmax.bf16 %v5734_v58, %v1515_v19  ;;  %v1834_v6 = vadd.f32 %v1833_v38, %v5074_v3  ;;  %v1409_v55 = vadd.f32 %v1408_v43, %v4809_v49 }
 0x291   :  { %v1410_v18 = vpop.f32.mrf.mxu1  ;;  %v1835_v8 = vpop.f32.mrf.mxu0 }
 0x292   :  { %v1836_v12 = vadd.f32 %v1835_v8, %v5071_v40  ;;  %v1580_v21 = vmax.bf16 %v5734_v58, %v1516_v37  ;;  %v1411_v45 = vadd.f32 %v1410_v18, %v4812_v56 }
 0x293   :  { %v1412_v63 = vpop.f32.mrf.mxu1  ;;  %v1837_v17 = vpop.f32.mrf.mxu0 }
 0x294   :  { %v2148_v39 = vpack.c.bf16 %v1836_v12, %v1832_v41  ;;  %v1413_v15 = vadd.f32 %v1412_v63, %v4809_v49  ;;  %v1838_v42 = vadd.f32 %v1837_v17, %v5074_v3  ;;  %2079 = vmatprep.mubr.bf16.mxu0 %v1580_v21 }
 0x295   :  { %v1414_v11 = vpop.f32.mrf.mxu1  ;;  %v1841_v52 = vpop.f32.mrf.mxu0  ;;  %2080 = vmatmul.mubr.bf16.gmra.mxu0 %v1579_v20 }
 0x296   :  { %v2149_v26 = vpack.c.bf16 %v1838_v42, %v1834_v6  ;;  %v1415_v46 = vadd.f32 %v1414_v11, %v4812_v56  ;;  %v2212_v22 = vmax.bf16 %v5734_v58, %v2148_v39  ;;  %v1517_v30 = vpack.c.bf16 %v1413_v15, %v1409_v55 }
 0x297   :  { %v1418_v19 = vpop.f32.mrf.mxu1  ;;  %v1843_v38 = vpop.f32.mrf.mxu0  ;;  %v1842_v43 = vadd.f32 %v1841_v52, %v5071_v40 }
 0x298   :  { %v2213_v37 = vmax.bf16 %v5734_v58, %v2149_v26  ;;  %v1518_v23 = vpack.c.bf16 %v1415_v46, %v1411_v45  ;;  %v2276_v20 = vadd.bf16 %v2212_v22, %v4404_v33  ;;  %v1581_v63 = vmax.bf16 %v5734_v58, %v1517_v30 }
 0x299   :  { %v1420_v8 = vpop.f32.mrf.mxu1  ;;  %v1845_v41 = vpop.f32.mrf.mxu0  ;;  %v1844_v17 = vadd.f32 %v1843_v38, %v5074_v3  ;;  %v1419_v11 = vadd.f32 %v1418_v19, %v4809_v49 }
 0x29a   :  { %v1846_v12 = vadd.f32 %v1845_v41, %v5071_v40  ;;  %v1582_v21 = vmax.bf16 %v5734_v58, %v1518_v23  ;;  %v2277_v18 = vadd.bf16 %v2213_v37, %v4401_v32  ;;  %v1421_v32 = vadd.f32 %v1420_v8, %v4812_v56 }
 0x29b   :  { %v1422_v6 = vpop.f32.mrf.mxu1  ;;  %v1847_v39 = vpop.f32.mrf.mxu0 }
 0x29c   :  { %v2150_v15 = vpack.c.bf16 %v1846_v12, %v1842_v43  ;;  %v1423_v42 = vadd.f32 %v1422_v6, %v4809_v49  ;;  %v1848_v55 = vadd.f32 %v1847_v39, %v5074_v3  ;;  %2089 = vmatprep.mubr.bf16.mxu0 %v1582_v21  ;;  %2507 = vmatprep.mubr.bf16.mxu1 %v2277_v18 }
 0x29d   :  { %v1424_v52 = vpop.f32.mrf.mxu1  ;;  %v1851_v45 = vpop.f32.mrf.mxu0  ;;  %2090 = vmatmul.mubr.bf16.gmra.mxu0 %v1581_v63  ;;  %2508 = vmatmul.mubr.bf16.vlgmr.msra.gmra.mxu1 %v2276_v20 }
 0x29e   :  { %v2151_v33 = vpack.c.bf16 %v1848_v55, %v1844_v17  ;;  %v1425_v26 = vadd.f32 %v1424_v52, %v4812_v56  ;;  %v2214_v46 = vmax.bf16 %v5734_v58, %v2150_v15  ;;  %v1519_v22 = vpack.c.bf16 %v1423_v42, %v1419_v11 }
 0x29f   :  { %v1428_v30 = vpop.f32.mrf.mxu1  ;;  %v1853_v38 = vpop.f32.mrf.mxu0  ;;  %v1852_v19 = vadd.f32 %v1851_v45, %v5071_v40 }
 0x2a0   :  { %v2215_v37 = vmax.bf16 %v5734_v58, %v2151_v33  ;;  %v1520_v23 = vpack.c.bf16 %v1425_v26, %v1421_v32  ;;  %v2278_v18 = vadd.bf16 %v2214_v46, %v4421_v51  ;;  %v1583_v20 = vmax.bf16 %v5734_v58, %v1519_v22 }
 0x2a1   :  { %v1430_v41 = vpop.f32.mrf.mxu1  ;;  %v1855_v43 = vpop.f32.mrf.mxu0  ;;  %v1854_v63 = vadd.f32 %v1853_v38, %v5074_v3  ;;  %v1429_v55 = vadd.f32 %v1428_v30, %v4809_v49 }
 0x2a2   :  { %v1856_v12 = vadd.f32 %v1855_v43, %v5071_v40  ;;  %v1584_v21 = vmax.bf16 %v5734_v58, %v1520_v23  ;;  %v2279_v8 = vadd.bf16 %v2215_v37, %v4415_v48  ;;  %v1431_v48 = vadd.f32 %v1430_v41, %v4812_v56 }
 0x2a3   :  { %v1432_v17 = vpop.f32.mrf.mxu1  ;;  %v1857_v6 = vpop.f32.mrf.mxu0 }
 0x2a4   :  { %v2152_v39 = vpack.c.bf16 %v1856_v12, %v1852_v19  ;;  %v1433_v15 = vadd.f32 %v1432_v17, %v4809_v49  ;;  %v1858_v42 = vadd.f32 %v1857_v6, %v5074_v3  ;;  %2099 = vmatprep.mubr.bf16.mxu0 %v1584_v21  ;;  %2515 = vmatprep.mubr.bf16.mxu1 %v2279_v8 }
 0x2a5   :  { %v1434_v11 = vpop.f32.mrf.mxu1  ;;  %v1861_v52 = vpop.f32.mrf.mxu0  ;;  %2100 = vmatmul.mubr.bf16.gmra.mxu0 %v1583_v20  ;;  %2516 = vmatmul.mubr.bf16.gmra.mxu1 %v2278_v18 }
 0x2a6   :  { %v2153_v51 = vpack.c.bf16 %v1858_v42, %v1854_v63  ;;  %v1435_v45 = vadd.f32 %v1434_v11, %v4812_v56  ;;  %v2216_v32 = vmax.bf16 %v5734_v58, %v2152_v39  ;;  %v1521_v33 = vpack.c.bf16 %v1433_v15, %v1429_v55 }
 0x2a7   :  { %v1438_v26 = vpop.f32.mrf.mxu1  ;;  %v1863_v46 = vpop.f32.mrf.mxu0  ;;  %v1862_v30 = vadd.f32 %v1861_v52, %v5071_v40 }
 0x2a8   :  { %v2217_v22 = vmax.bf16 %v5734_v58, %v2153_v51  ;;  %v1522_v38 = vpack.c.bf16 %v1435_v45, %v1431_v48  ;;  %v2280_v12 = vadd.bf16 %v2216_v32, %v4445_v7  ;;  %v1585_v21 = vmax.bf16 %v5734_v58, %v1521_v33  ;;  %v3928_v33 = vld [vmem:[#allocation8 + $0x30] sm:$0xff]  }
 0x2a9   :  { %v1440_v37 = vpop.f32.mrf.mxu1  ;;  %v1865_v23 = vpop.f32.mrf.mxu0  ;;  %v1864_v8 = vadd.f32 %v1863_v46, %v5074_v3  ;;  %v1439_v39 = vadd.f32 %v1438_v26, %v4809_v49  ;;  %3688 = vmatprep.subr.bf16.mxu0 %v3928_v33 }
 0x2aa   :  { %v1866_v43 = vadd.f32 %v1865_v23, %v5071_v40  ;;  %v1586_v19 = vmax.bf16 %v5734_v58, %v1522_v38  ;;  %v2281_v41 = vadd.bf16 %v2217_v22, %v4439_v4  ;;  %v1441_v4 = vadd.f32 %v1440_v37, %v4812_v56  ;;  %3689 = vmatpush3.bf16.msra.mxu0 %v3928_v33 }
 0x2ab   :  { %v1442_v18 = vpop.f32.mrf.mxu1  ;;  %v1867_v20 = vpop.f32.mrf.mxu0 }
 0x2ac   :  { %v2154_v63 = vpack.c.bf16 %v1866_v43, %v1862_v30  ;;  %v1443_v17 = vadd.f32 %v1442_v18, %v4809_v49  ;;  %v1868_v6 = vadd.f32 %v1867_v20, %v5074_v3  ;;  %2109 = vmatprep.mubr.bf16.mxu0 %v1586_v19  ;;  %2523 = vmatprep.mubr.bf16.mxu1 %v2281_v41 }
 0x2ad   :  { %v1444_v15 = vpop.f32.mrf.mxu1  ;;  %v1871_v42 = vpop.f32.mrf.mxu0  ;;  %2110 = vmatmul.mubr.bf16.gmra.mxu0 %v1585_v21  ;;  %2524 = vmatmul.mubr.bf16.gmra.mxu1 %v2280_v12 }
 0x2ae   :  { %v2155_v7 = vpack.c.bf16 %v1868_v6, %v1864_v8  ;;  %v1445_v55 = vadd.f32 %v1444_v15, %v4812_v56  ;;  %v2218_v11 = vmax.bf16 %v5734_v58, %v2154_v63  ;;  %v1523_v52 = vpack.c.bf16 %v1443_v17, %v1439_v39 }
 0x2af   :  { %v1448_v48 = vpop.f32.mrf.mxu1  ;;  %v1873_v51 = vpop.f32.mrf.mxu0  ;;  %v1872_v22 = vadd.f32 %v1871_v42, %v5071_v40 }
 0x2b0   :  { %v2219_v45 = vmax.bf16 %v5734_v58, %v2155_v7  ;;  %v1524_v32 = vpack.c.bf16 %v1445_v55, %v1441_v4  ;;  %v2282_v30 = vadd.bf16 %v2218_v11, %v4469_v36  ;;  %v1587_v43 = vmax.bf16 %v5734_v58, %v1523_v52 }
 0x2b1   :  { %v1450_v46 = vpop.f32.mrf.mxu1  ;;  %v1875_v26 = vpop.f32.mrf.mxu0  ;;  %v1874_v19 = vadd.f32 %v1873_v51, %v5074_v3  ;;  %v1449_v20 = vadd.f32 %v1448_v48, %v4809_v49 }
 0x2b2   :  { %v1876_v38 = vadd.f32 %v1875_v26, %v5071_v40  ;;  %v1588_v37 = vmax.bf16 %v5734_v58, %v1524_v32  ;;  %v2283_v23 = vadd.bf16 %v2219_v45, %v4463_v31  ;;  %v1451_v36 = vadd.f32 %v1450_v46, %v4812_v56 }
 0x2b3   :  { %v1452_v41 = vpop.f32.mrf.mxu1  ;;  %v1877_v12 = vpop.f32.mrf.mxu0 }
 0x2b4   :  { %v2156_v21 = vpack.c.bf16 %v1876_v38, %v1872_v22  ;;  %v1453_v8 = vadd.f32 %v1452_v41, %v4809_v49  ;;  %v1878_v18 = vadd.f32 %v1877_v12, %v5074_v3  ;;  %2119 = vmatprep.mubr.bf16.mxu0 %v1588_v37  ;;  %2531 = vmatprep.mubr.bf16.mxu1 %v2283_v23 }
 0x2b5   :  { %v1454_v31 = vpop.f32.mrf.mxu1  ;;  %v1881_v63 = vpop.f32.mrf.mxu0  ;;  %2120 = vmatmul.mubr.bf16.gmra.mxu0 %v1587_v43  ;;  %2532 = vmatmul.mubr.bf16.gmra.mxu1 %v2282_v30 }
 0x2b6   :  { %v2157_v17 = vpack.c.bf16 %v1878_v18, %v1874_v19  ;;  %v1455_v6 = vadd.f32 %v1454_v31, %v4812_v56  ;;  %v2220_v39 = vmax.bf16 %v5734_v58, %v2156_v21  ;;  %v1525_v15 = vpack.c.bf16 %v1453_v8, %v1449_v20 }
 0x2b7   :  { %v1458_v42 = vpop.f32.mrf.mxu1  ;;  %v1883_v4 = vpop.f32.mrf.mxu0  ;;  %v1882_v11 = vadd.f32 %v1881_v63, %v5071_v40 }
 0x2b8   :  { %v2221_v7 = vmax.bf16 %v5734_v58, %v2157_v17  ;;  %v1526_v55 = vpack.c.bf16 %v1455_v6, %v1451_v36  ;;  %v2284_v46 = vadd.bf16 %v2220_v39, %v4493_v0  ;;  %v1589_v26 = vmax.bf16 %v5734_v58, %v1525_v15  ;;  %v5768_v17 = vld [vmem:[#allocation14_spill] sm:$0xff] }
 0x2b9   :  { %v1460_v52 = vpop.f32.mrf.mxu1  ;;  %v1885_v48 = vpop.f32.mrf.mxu0  ;;  %v1459_v22 = vadd.f32 %v1458_v42, %v4809_v49  ;;  %v1884_v38 = vadd.f32 %v1883_v4, %v5074_v3 }
 0x2ba   :  { %v1461_v51 = vadd.f32 %v1460_v52, %v4812_v56  ;;  %v1886_v45 = vadd.f32 %v1885_v48, %v5071_v40  ;;  %v1590_v32 = vmax.bf16 %v5734_v58, %v1526_v55  ;;  %v2285_v33 = vadd.bf16 %v2221_v7, %v4487_v61 }
 0x2bb   :  { %v1462_v37 = vpop.f32.mrf.mxu1  ;;  %v1887_v23 = vpop.f32.mrf.mxu0  ;;  %v1527_v12 = vpack.c.bf16 %v1459_v22, %v1459_v22 }
 0x2bc   :  { %v1528_v30 = vpack.c.bf16 %v1461_v51, %v1461_v51  ;;  %v2158_v43 = vpack.c.bf16 %v1886_v45, %v1882_v11  ;;  %v1888_v56 = vadd.f32 %v1887_v23, %v5074_v3  ;;  %2129 = vmatprep.mubr.bf16.mxu0 %v1590_v32  ;;  %2539 = vmatprep.mubr.bf16.mxu1 %v2285_v33  ;;  %v5769_v32 = vld [vmem:[#allocation15_spill] sm:$0xff] }
 0x2bd   :  { %v1463_v19 = vpop.f32.mrf.mxu1  ;;  %v1891_v41 = vpop.f32.mrf.mxu0  ;;  %2130 = vmatmul.mubr.bf16.gmra.mxu0 %v1589_v26  ;;  %2540 = vmatmul.mubr.bf16.gmra.mxu1 %v2284_v46  ;;  %v1591_v36 = vmax.bf16 %v5734_v58, %v1527_v12  ;;  %v5770_v46 = vld [vmem:[#allocation16_spill] sm:$0xff] }
 0x2be   :  { %v1592_v61 = vmax.bf16 %v5734_v58, %v1528_v30  ;;  %v2159_v0 = vpack.c.bf16 %v1888_v56, %v1884_v38  ;;  %v2222_v49 = vmax.bf16 %v5734_v58, %v2158_v43  ;;  %v1892_v20 = vadd.f32 %v1891_v41, %v5071_v40 }
 0x2bf   :  { %v1893_v21 = vpop.f32.mrf.mxu0 }
 0x2c0   :  { %v2223_v8 = vmax.bf16 %v5734_v58, %v2159_v0  ;;  %2139 = vmatprep.mubr.bf16.mxu0 %v1592_v61  ;;  %v2286_v6 = vadd.bf16 %v2222_v49, %v5768_v17  ;;  %v1894_v15 = vadd.f32 %v1893_v21, %v5074_v3  ;;  %v3929_v61 = vld [vmem:[#allocation8 + $0x28] sm:$0xff]  }
 0x2c1   :  { %v1895_v18 = vpop.f32.mrf.mxu0  ;;  %v5771_v21 = vld [vmem:[#allocation17_spill] sm:$0xff]  ;;  %3690 = vmatprep.subr.bf16.mxu0 %v3929_v61 }
 0x2c2   :  { %v1896_v31 = vadd.f32 %v1895_v18, %v5071_v40  ;;  %v2287_v63 = vadd.bf16 %v2223_v8, %v4511_v35  ;;  %v5772_v18 = vld [vmem:[#allocation18_spill] sm:$0xff]  ;;  %3691 = vmatpush3.bf16.msra.mxu0 %v3929_v61 }
 0x2c3   :  { %v1897_v39 = vpop.f32.mrf.mxu0 }
 0x2c4   :  { %v2160_v42 = vpack.c.bf16 %v1896_v31, %v1892_v20  ;;  %v1898_v4 = vadd.f32 %v1897_v39, %v5074_v3  ;;  %2547 = vmatprep.mubr.bf16.mxu1 %v2287_v63 }
 0x2c5   :  { %v1901_v7 = vpop.f32.mrf.mxu0  ;;  %2140 = vmatmul.mubr.bf16.gmra.mxu0 %v1591_v36  ;;  %2548 = vmatmul.mubr.bf16.gmra.mxu1 %v2286_v6 }
 0x2c6   :  { %v2161_v55 = vpack.c.bf16 %v1898_v4, %v1894_v15  ;;  %v2224_v11 = vmax.bf16 %v5734_v58, %v2160_v42  ;;  %v1902_v51 = vadd.f32 %v1901_v7, %v5071_v40 }
 0x2c7   :  { %v1903_v52 = vpop.f32.mrf.mxu0 }
 0x2c8   :  { %v2225_v35 = vmax.bf16 %v5734_v58, %v2161_v55  ;;  %v2288_v26 = vadd.bf16 %v2224_v11, %v5770_v46  ;;  %v1904_v38 = vadd.f32 %v1903_v52, %v5074_v3  ;;  %v5773_v52 = vld [vmem:[#allocation19_spill] sm:$0xff] }
 0x2c9   :  { %v1905_v48 = vpop.f32.mrf.mxu0 }
 0x2ca   :  { %v1906_v45 = vadd.f32 %v1905_v48, %v5071_v40  ;;  %v2289_v33 = vadd.bf16 %v2225_v35, %v5769_v32 }
 0x2cb   :  { %v1907_v22 = vpop.f32.mrf.mxu0 }
 0x2cc   :  { %v2162_v37 = vpack.c.bf16 %v1906_v45, %v1902_v51  ;;  %v1908_v23 = vadd.f32 %v1907_v22, %v5074_v3  ;;  %2555 = vmatprep.mubr.bf16.mxu1 %v2289_v33  ;;  %v3930_v45 = vld [vmem:[#allocation8 + $0x20] sm:$0xff]  }
 0x2cd   :  { %v1911_v30 = vpop.f32.mrf.mxu0  ;;  %2556 = vmatmul.mubr.bf16.gmra.mxu1 %v2288_v26  ;;  %3692 = vmatprep.subr.bf16.mxu0 %v3930_v45 }
 0x2ce   :  { %v2163_v43 = vpack.c.bf16 %v1908_v23, %v1904_v38  ;;  %v2226_v56 = vmax.bf16 %v5734_v58, %v2162_v37  ;;  %v1912_v12 = vadd.f32 %v1911_v30, %v5071_v40  ;;  %3693 = vmatpush3.bf16.msra.mxu0 %v3930_v45  ;;  %v3931_v23 = vld [vmem:[#allocation8 + $0x18] sm:$0xff]  }
 0x2cf   :  { %v1913_v19 = vpop.f32.mrf.mxu0  ;;  %3694 = vmatprep.subr.bf16.mxu0 %v3931_v23 }
 0x2d0   :  { %v2227_v41 = vmax.bf16 %v5734_v58, %v2163_v43  ;;  %v2290_v20 = vadd.bf16 %v2226_v56, %v5772_v18  ;;  %v1914_v63 = vadd.f32 %v1913_v19, %v5074_v3 }
 0x2d1   :  { %v1915_v0 = vpop.f32.mrf.mxu0 }
 0x2d2   :  { %v1916_v49 = vadd.f32 %v1915_v0, %v5071_v40  ;;  %v2291_v8 = vadd.bf16 %v2227_v41, %v5771_v21  ;;  %3695 = vmatpush3.bf16.msra.mxu0 %v3931_v23  ;;  %v5774_v41 = vld [vmem:[#allocation20_spill] sm:$0xff] }
 0x2d3   :  { %v1917_v31 = vpop.f32.mrf.mxu0 }
 0x2d4   :  { %v2164_v36 = vpack.c.bf16 %v1916_v49, %v1912_v12  ;;  %v1918_v17 = vadd.f32 %v1917_v31, %v5074_v3  ;;  %2563 = vmatprep.mubr.bf16.mxu1 %v2291_v8  ;;  %v3932_v12 = vld [vmem:[#allocation8 + $0x10] sm:$0xff]  }
 0x2d5   :  { %v1921_v6 = vpop.f32.mrf.mxu0  ;;  %2564 = vmatmul.mubr.bf16.gmra.mxu1 %v2290_v20  ;;  %3696 = vmatprep.subr.bf16.mxu0 %v3932_v12 }
 0x2d6   :  { %v2165_v39 = vpack.c.bf16 %v1918_v17, %v1914_v63  ;;  %v2228_v15 = vmax.bf16 %v5734_v58, %v2164_v36  ;;  %v1922_v55 = vadd.f32 %v1921_v6, %v5071_v40  ;;  %3697 = vmatpush3.bf16.msra.mxu0 %v3932_v12 }
 0x2d7   :  { %v1923_v42 = vpop.f32.mrf.mxu0 }
 0x2d8   :  { %v2229_v4 = vmax.bf16 %v5734_v58, %v2165_v39  ;;  %v2292_v48 = vadd.bf16 %v2228_v15, %v4588_v53  ;;  %v1924_v32 = vadd.f32 %v1923_v42, %v5074_v3  ;;  %v5775_v15 = vld [vmem:[#allocation21_spill] sm:$0xff] }
 0x2d9   :  { %v1925_v7 = vpop.f32.mrf.mxu0 }
 0x2da   :  { %v1926_v11 = vadd.f32 %v1925_v7, %v5071_v40  ;;  %v2293_v35 = vadd.bf16 %v2229_v4, %v5773_v52  ;;  %v5776_v4 = vld [vmem:[#allocation22_spill] sm:$0xff] }
 0x2db   :  { %v1927_v51 = vpop.f32.mrf.mxu0 }
 0x2dc   :  { %v2166_v33 = vpack.c.bf16 %v1926_v11, %v1922_v55  ;;  %v1928_v46 = vadd.f32 %v1927_v51, %v5074_v3  ;;  %2571 = vmatprep.mubr.bf16.mxu1 %v2293_v35  ;;  %v3934_v11 = vld [vmem:[#allocation8] sm:$0xff]  }
 0x2dd   :  { %v1931_v26 = vpop.f32.mrf.mxu0  ;;  %2572 = vmatmul.mubr.bf16.gmra.mxu1 %v2292_v48 }
 0x2de   :  { %v2167_v22 = vpack.c.bf16 %v1928_v46, %v1924_v32  ;;  %v2230_v38 = vmax.bf16 %v5734_v58, %v2166_v33  ;;  %v1932_v43 = vadd.f32 %v1931_v26, %v5071_v40 }
 0x2df   :  { %v1933_v37 = vpop.f32.mrf.mxu0 }
 0x2e0   :  { %v2231_v30 = vmax.bf16 %v5734_v58, %v2167_v22  ;;  %v2294_v61 = vadd.bf16 %v2230_v38, %v5774_v41  ;;  %v1934_v49 = vadd.f32 %v1933_v37, %v5074_v3  ;;  %v5777_v37 = vld [vmem:[#allocation23_spill] sm:$0xff] }
 0x2e1   :  { %v1935_v53 = vpop.f32.mrf.mxu0 }
 0x2e2   :  { %v1936_v56 = vadd.f32 %v1935_v53, %v5071_v40  ;;  %v2295_v19 = vadd.bf16 %v2231_v30, %v4597_v1  ;;  %v3933_v1 = vld [vmem:[#allocation8 + $0x8] sm:$0xff]   ;;  %v5778_v30 = vld [vmem:[#allocation24_spill] sm:$0xff] }
 0x2e3   :  { %v1937_v0 = vpop.f32.mrf.mxu0  ;;  %3698 = vmatprep.subr.bf16.mxu0 %v3933_v1 }
 0x2e4   :  { %v2168_v21 = vpack.c.bf16 %v1936_v56, %v1932_v43  ;;  %v1938_v8 = vadd.f32 %v1937_v0, %v5074_v3  ;;  %2579 = vmatprep.mubr.bf16.mxu1 %v2295_v19  ;;  %3699 = vmatpush3.bf16.msra.mxu0 %v3933_v1  ;;  %v5780_v1 = vld [vmem:[#allocation26_spill] sm:$0xff] }
 0x2e5   :  { %v1941_v18 = vpop.f32.mrf.mxu0  ;;  %2580 = vmatmul.mubr.bf16.gmra.mxu1 %v2294_v61  ;;  %3700 = vmatprep.subr.bf16.mxu0 %v3934_v11 }
 0x2e6   :  { %v2169_v20 = vpack.c.bf16 %v1938_v8, %v1934_v49  ;;  %v2232_v31 = vmax.bf16 %v5734_v58, %v2168_v21  ;;  %v1942_v6 = vadd.f32 %v1941_v18, %v5071_v40 }
 0x2e7   :  { %v1943_v63 = vpop.f32.mrf.mxu0 }
 0x2e8   :  { %v2233_v36 = vmax.bf16 %v5734_v58, %v2169_v20  ;;  %v2296_v7 = vadd.bf16 %v2232_v31, %v5776_v4  ;;  %v1944_v52 = vadd.f32 %v1943_v63, %v5074_v3  ;;  %3701 = vmatpush3.bf16.msra.mxu0 %v3934_v11  ;;  %v5779_v31 = vld [vmem:[#allocation25_spill] sm:$0xff] }
 0x2e9   :  { %v1945_v17 = vpop.f32.mrf.mxu0 }
 0x2ea   :  { %v1946_v39 = vadd.f32 %v1945_v17, %v5071_v40  ;;  %v2297_v42 = vadd.bf16 %v2233_v36, %v5775_v15 }
 0x2eb   :  { %v1947_v55 = vpop.f32.mrf.mxu0 }
 0x2ec   :  { %v2170_v35 = vpack.c.bf16 %v1946_v39, %v1942_v6  ;;  %v1948_v48 = vadd.f32 %v1947_v55, %v5074_v3  ;;  %2587 = vmatprep.mubr.bf16.mxu1 %v2297_v42 }
 0x2ed   :  { %v1951_v51 = vpop.f32.mrf.mxu0  ;;  %2588 = vmatmul.mubr.bf16.gmra.mxu1 %v2296_v7 }
 0x2ee   :  { %v2171_v45 = vpack.c.bf16 %v1948_v48, %v1944_v52  ;;  %v2234_v32 = vmax.bf16 %v5734_v58, %v2170_v35  ;;  %v1952_v22 = vadd.f32 %v1951_v51, %v5071_v40  ;;  %v5781_v51 = vld [vmem:[#allocation27_spill] sm:$0xff] }
 0x2ef   :  { %v1953_v33 = vpop.f32.mrf.mxu0 }
 0x2f0   :  { %v2235_v46 = vmax.bf16 %v5734_v58, %v2171_v45  ;;  %v2298_v53 = vadd.bf16 %v2234_v32, %v5778_v30  ;;  %v1954_v56 = vadd.f32 %v1953_v33, %v5074_v3  ;;  %v5782_v32 = vld [vmem:[#allocation28_spill] sm:$0xff] }
 0x2f1   :  { %v1955_v26 = vpop.f32.mrf.mxu0 }
 0x2f2   :  { %v1956_v38 = vadd.f32 %v1955_v26, %v5071_v40  ;;  %v2299_v23 = vadd.bf16 %v2235_v46, %v5777_v37 }
 0x2f3   :  { %v1957_v43 = vpop.f32.mrf.mxu0 }
 0x2f4   :  { %v2172_v19 = vpack.c.bf16 %v1956_v38, %v1952_v22  ;;  %v1958_v41 = vadd.f32 %v1957_v43, %v5074_v3  ;;  %2595 = vmatprep.mubr.bf16.mxu1 %v2299_v23 }
 0x2f5   :  { %v1961_v61 = vpop.f32.mrf.mxu0  ;;  %2596 = vmatmul.mubr.bf16.gmra.mxu1 %v2298_v53 }
 0x2f6   :  { %v2173_v0 = vpack.c.bf16 %v1958_v41, %v1954_v56  ;;  %v2236_v12 = vmax.bf16 %v5734_v58, %v2172_v19  ;;  %v1962_v18 = vadd.f32 %v1961_v61, %v5071_v40  ;;  %v5783_v61 = vld [vmem:[#allocation29_spill] sm:$0xff] }
 0x2f7   :  { %v1963_v49 = vpop.f32.mrf.mxu0 }
 0x2f8   :  { %v2237_v21 = vmax.bf16 %v5734_v58, %v2173_v0  ;;  %v2300_v36 = vadd.bf16 %v2236_v12, %v5780_v1  ;;  %v1964_v6 = vadd.f32 %v1963_v49, %v5074_v3  ;;  %v5784_v12 = vld [vmem:[#allocation30_spill] sm:$0xff] }
 0x2f9   :  { %v1965_v8 = vpop.f32.mrf.mxu0 }
 0x2fa   :  { %v1966_v20 = vadd.f32 %v1965_v8, %v5071_v40  ;;  %v2301_v63 = vadd.bf16 %v2237_v21, %v5779_v31 }
 0x2fb   :  { %v1967_v17 = vpop.f32.mrf.mxu0 }
 0x2fc   :  { %v2174_v39 = vpack.c.bf16 %v1966_v20, %v1962_v18  ;;  %v1968_v15 = vadd.f32 %v1967_v17, %v5074_v3  ;;  %2603 = vmatprep.mubr.bf16.mxu1 %v2301_v63 }
 0x2fd   :  { %v1971_v42 = vpop.f32.mrf.mxu0  ;;  %2604 = vmatmul.mubr.bf16.gmra.mxu1 %v2300_v36 }
 0x2fe   :  { %v2175_v4 = vpack.c.bf16 %v1968_v15, %v1964_v6  ;;  %v2238_v7 = vmax.bf16 %v5734_v58, %v2174_v39  ;;  %v1972_v35 = vadd.f32 %v1971_v42, %v5071_v40  ;;  %v5785_v42 = vld [vmem:[#allocation31_spill] sm:$0xff] }
 0x2ff   :  { %v1973_v55 = vpop.f32.mrf.mxu0 }
 0x300   :  { %v2239_v11 = vmax.bf16 %v5734_v58, %v2175_v4  ;;  %v2302_v33 = vadd.bf16 %v2238_v7, %v5782_v32  ;;  %v1974_v26 = vadd.f32 %v1973_v55, %v5074_v3  ;;  %v5786_v7 = vld [vmem:[#allocation32_spill] sm:$0xff] }
 0x301   :  { %v1975_v52 = vpop.f32.mrf.mxu0 }
 0x302   :  { %v1976_v48 = vadd.f32 %v1975_v52, %v5071_v40  ;;  %v2303_v45 = vadd.bf16 %v2239_v11, %v5781_v51 }
 0x303   :  { %v1977_v46 = vpop.f32.mrf.mxu0 }
 0x304   :  { %v2176_v22 = vpack.c.bf16 %v1976_v48, %v1972_v35  ;;  %v1978_v38 = vadd.f32 %v1977_v46, %v5074_v3  ;;  %2611 = vmatprep.mubr.bf16.mxu1 %v2303_v45 }
 0x305   :  { %v1981_v37 = vpop.f32.mrf.mxu0  ;;  %2612 = vmatmul.mubr.bf16.gmra.mxu1 %v2302_v33 }
 0x306   :  { %v2177_v23 = vpack.c.bf16 %v1978_v38, %v1974_v26  ;;  %v2240_v30 = vmax.bf16 %v5734_v58, %v2176_v22  ;;  %v1982_v19 = vadd.f32 %v1981_v37, %v5071_v40  ;;  %v5787_v37 = vld [vmem:[#allocation33_spill] sm:$0xff] }
 0x307   :  { %v1983_v53 = vpop.f32.mrf.mxu0 }
 0x308   :  { %v2241_v43 = vmax.bf16 %v5734_v58, %v2177_v23  ;;  %v2304_v49 = vadd.bf16 %v2240_v30, %v5784_v12  ;;  %v1984_v8 = vadd.f32 %v1983_v53, %v5074_v3  ;;  %v5788_v30 = vld [vmem:[#allocation34_spill] sm:$0xff] }
 0x309   :  { %v1985_v56 = vpop.f32.mrf.mxu0 }
 0x30a   :  { %v1986_v41 = vadd.f32 %v1985_v56, %v5071_v40  ;;  %v2305_v0 = vadd.bf16 %v2241_v43, %v5783_v61 }
 0x30b   :  { %v1987_v21 = vpop.f32.mrf.mxu0 }
 0x30c   :  { %v2178_v18 = vpack.c.bf16 %v1986_v41, %v1982_v19  ;;  %v1988_v20 = vadd.f32 %v1987_v21, %v5074_v3  ;;  %2619 = vmatprep.mubr.bf16.mxu1 %v2305_v0 }
 0x30d   :  { %v1991_v31 = vpop.f32.mrf.mxu0  ;;  %2620 = vmatmul.mubr.bf16.gmra.mxu1 %v2304_v49 }
 0x30e   :  { %v2179_v63 = vpack.c.bf16 %v1988_v20, %v1984_v8  ;;  %v2242_v1 = vmax.bf16 %v5734_v58, %v2178_v18  ;;  %v1992_v39 = vadd.f32 %v1991_v31, %v5071_v40  ;;  %v5789_v31 = vld [vmem:[#allocation35_spill] sm:$0xff] }
 0x30f   :  { %v1993_v36 = vpop.f32.mrf.mxu0 }
 0x310   :  { %v2243_v17 = vmax.bf16 %v5734_v58, %v2179_v63  ;;  %v2306_v55 = vadd.bf16 %v2242_v1, %v5786_v7  ;;  %v1994_v52 = vadd.f32 %v1993_v36, %v5074_v3  ;;  %v5790_v1 = vld [vmem:[#allocation36_spill] sm:$0xff] }
 0x311   :  { %v1995_v6 = vpop.f32.mrf.mxu0 }
 0x312   :  { %v1996_v15 = vadd.f32 %v1995_v6, %v5071_v40  ;;  %v2307_v4 = vadd.bf16 %v2243_v17, %v5785_v42 }
 0x313   :  { %v1997_v11 = vpop.f32.mrf.mxu0 }
 0x314   :  { %v2180_v35 = vpack.c.bf16 %v1996_v15, %v1992_v39  ;;  %v1998_v48 = vadd.f32 %v1997_v11, %v5074_v3  ;;  %2627 = vmatprep.mubr.bf16.mxu1 %v2307_v4 }
 0x315   :  { %v2001_v51 = vpop.f32.mrf.mxu0  ;;  %2628 = vmatmul.mubr.bf16.gmra.mxu1 %v2306_v55 }
 0x316   :  { %v2181_v45 = vpack.c.bf16 %v1998_v48, %v1994_v52  ;;  %v2244_v32 = vmax.bf16 %v5734_v58, %v2180_v35  ;;  %v2002_v22 = vadd.f32 %v2001_v51, %v5071_v40 }
 0x317   :  { %v2003_v33 = vpop.f32.mrf.mxu0 }
 0x318   :  { %v2245_v46 = vmax.bf16 %v5734_v58, %v2181_v45  ;;  %v2308_v53 = vadd.bf16 %v2244_v32, %v5788_v30  ;;  %v2004_v56 = vadd.f32 %v2003_v33, %v5074_v3  ;;  %v5791_v45 = vld [vmem:[#allocation37_spill] sm:$0xff] }
 0x319   :  { %v2005_v26 = vpop.f32.mrf.mxu0 }
 0x31a   :  { %v2006_v38 = vadd.f32 %v2005_v26, %v5071_v40  ;;  %v2309_v23 = vadd.bf16 %v2245_v46, %v5787_v37 }
 0x31b   :  { %v2007_v43 = vpop.f32.mrf.mxu0 }
 0x31c   :  { %v2182_v19 = vpack.c.bf16 %v2006_v38, %v2002_v22  ;;  %v2008_v41 = vadd.f32 %v2007_v43, %v5074_v3  ;;  %2635 = vmatprep.mubr.bf16.mxu1 %v2309_v23 }
 0x31d   :  { %v2011_v61 = vpop.f32.mrf.mxu0  ;;  %2636 = vmatmul.mubr.bf16.gmra.mxu1 %v2308_v53 }
 0x31e   :  { %v2183_v0 = vpack.c.bf16 %v2008_v41, %v2004_v56  ;;  %v2246_v12 = vmax.bf16 %v5734_v58, %v2182_v19  ;;  %v2012_v18 = vadd.f32 %v2011_v61, %v5071_v40  ;;  %v5792_v19 = vld [vmem:[#allocation38_spill] sm:$0xff]  ;;  %v5793_v61 = vld [vmem:[#allocation39_spill] sm:$0xff] }
 0x31f   :  { %v2013_v49 = vpop.f32.mrf.mxu0 }
 0x320   :  { %v2247_v21 = vmax.bf16 %v5734_v58, %v2183_v0  ;;  %v2310_v36 = vadd.bf16 %v2246_v12, %v5790_v1  ;;  %v2014_v6 = vadd.f32 %v2013_v49, %v5074_v3 }
 0x321   :  { %v2015_v8 = vpop.f32.mrf.mxu0 }
 0x322   :  { %v2016_v20 = vadd.f32 %v2015_v8, %v5071_v40  ;;  %v2311_v63 = vadd.bf16 %v2247_v21, %v5789_v31 }
 0x323   :  { %v2017_v17 = vpop.f32.mrf.mxu0 }
 0x324   :  { %v2184_v39 = vpack.c.bf16 %v2016_v20, %v2012_v18  ;;  %v2018_v15 = vadd.f32 %v2017_v17, %v5074_v3  ;;  %2643 = vmatprep.mubr.bf16.mxu1 %v2311_v63 }
 0x325   :  { %v2021_v42 = vpop.f32.mrf.mxu0  ;;  %2644 = vmatmul.mubr.bf16.gmra.mxu1 %v2310_v36 }
 0x326   :  { %v2185_v4 = vpack.c.bf16 %v2018_v15, %v2014_v6  ;;  %v2248_v7 = vmax.bf16 %v5734_v58, %v2184_v39  ;;  %v2022_v35 = vadd.f32 %v2021_v42, %v5071_v40  ;;  %v5794_v39 = vld [vmem:[#allocation40_spill] sm:$0xff]  ;;  %v5795_v42 = vld [vmem:[#allocation41_spill] sm:$0xff] }
 0x327   :  { %v2023_v55 = vpop.f32.mrf.mxu0 }
 0x328   :  { %v2249_v11 = vmax.bf16 %v5734_v58, %v2185_v4  ;;  %v2312_v32 = vadd.bf16 %v2248_v7, %v5791_v45  ;;  %v2024_v46 = vadd.f32 %v2023_v55, %v5074_v3 }
 0x329   :  { %v2025_v52 = vpop.f32.mrf.mxu0 }
 0x32a   :  { %v2026_v48 = vadd.f32 %v2025_v52, %v5071_v40  ;;  %v2313_v51 = vadd.bf16 %v2249_v11, %v4708_v28 }
 0x32b   :  { %v2027_v33 = vpop.f32.mrf.mxu0 }
 0x32c   :  { %v2186_v26 = vpack.c.bf16 %v2026_v48, %v2022_v35  ;;  %v2028_v22 = vadd.f32 %v2027_v33, %v5074_v3  ;;  %2651 = vmatprep.mubr.bf16.mxu1 %v2313_v51 }
 0x32d   :  { %v2031_v38 = vpop.f32.mrf.mxu0  ;;  %2652 = vmatmul.mubr.bf16.gmra.mxu1 %v2312_v32 }
 0x32e   :  { %v2187_v37 = vpack.c.bf16 %v2028_v22, %v2024_v46  ;;  %v2250_v23 = vmax.bf16 %v5734_v58, %v2186_v26  ;;  %v2032_v28 = vadd.f32 %v2031_v38, %v5071_v40  ;;  %v5796_v22 = vld [vmem:[#allocation42_spill] sm:$0xff] }
 0x32f   :  { %v2033_v30 = vpop.f32.mrf.mxu0 }
 0x330   :  { %v2251_v53 = vmax.bf16 %v5734_v58, %v2187_v37  ;;  %v2314_v0 = vadd.bf16 %v2250_v23, %v5793_v61  ;;  %v2034_v49 = vadd.f32 %v2033_v30, %v5074_v3  ;;  %v5797_v37 = vld [vmem:[#allocation43_spill] sm:$0xff] }
 0x331   :  { %v2035_v43 = vpop.f32.mrf.mxu0 }
 0x332   :  { %v2036_v56 = vadd.f32 %v2035_v43, %v5071_v40  ;;  %v2315_v41 = vadd.bf16 %v2251_v53, %v5792_v19 }
 0x333   :  { %v2037_v12 = vpop.f32.mrf.mxu0 }
 0x334   :  { %v2188_v21 = vpack.c.bf16 %v2036_v56, %v2032_v28  ;;  %v2038_v8 = vadd.f32 %v2037_v12, %v5074_v3  ;;  %2659 = vmatprep.mubr.bf16.mxu1 %v2315_v41 }
 0x335   :  { %v2041_v18 = vpop.f32.mrf.mxu0  ;;  %2660 = vmatmul.mubr.bf16.gmra.mxu1 %v2314_v0 }
 0x336   :  { %v2189_v20 = vpack.c.bf16 %v2038_v8, %v2034_v49  ;;  %v2252_v31 = vmax.bf16 %v5734_v58, %v2188_v21  ;;  %v2042_v17 = vadd.f32 %v2041_v18, %v5071_v40 }
 0x337   :  { %v2043_v63 = vpop.f32.mrf.mxu0 }
 0x338   :  { %v2253_v1 = vmax.bf16 %v5734_v58, %v2189_v20  ;;  %v2316_v4 = vadd.bf16 %v2252_v31, %v5795_v42  ;;  %v2044_v55 = vadd.f32 %v2043_v63, %v5074_v3 }
 0x339   :  { %v2045_v36 = vpop.f32.mrf.mxu0 }
 0x33a   :  { %v2046_v6 = vadd.f32 %v2045_v36, %v5071_v40  ;;  %v2317_v15 = vadd.bf16 %v2253_v1, %v5794_v39 }
 0x33b   :  { %v2047_v7 = vpop.f32.mrf.mxu0 }
 0x33c   :  { %v2190_v11 = vpack.c.bf16 %v2046_v6, %v2042_v17  ;;  %v2048_v52 = vadd.f32 %v2047_v7, %v5074_v3  ;;  %2667 = vmatprep.mubr.bf16.mxu1 %v2317_v15 }
 0x33d   :  { %v2051_v35 = vpop.f32.mrf.mxu0  ;;  %2668 = vmatmul.mubr.bf16.gmra.mxu1 %v2316_v4 }
 0x33e   :  { %v2191_v48 = vpack.c.bf16 %v2048_v52, %v2044_v55  ;;  %v2254_v51 = vmax.bf16 %v5734_v58, %v2190_v11  ;;  %v2052_v46 = vadd.f32 %v2051_v35, %v5071_v40 }
 0x33f   :  { %v2053_v45 = vpop.f32.mrf.mxu0 }
 0x340   :  { %v2255_v32 = vmax.bf16 %v5734_v58, %v2191_v48  ;;  %v2318_v23 = vadd.bf16 %v2254_v51, %v5797_v37  ;;  %v2054_v53 = vadd.f32 %v2053_v45, %v5074_v3 }
 0x341   :  { %v2055_v33 = vpop.f32.mrf.mxu0 }
 0x342   :  { %v2056_v26 = vadd.f32 %v2055_v33, %v5071_v40  ;;  %v2319_v38 = vadd.bf16 %v2255_v32, %v5796_v22 }
 0x343   :  { %v2057_v30 = vpop.f32.mrf.mxu0 }
 0x344   :  { %v2192_v43 = vpack.c.bf16 %v2056_v26, %v2052_v46  ;;  %v2058_v28 = vadd.f32 %v2057_v30, %v5074_v3  ;;  %2675 = vmatprep.mubr.bf16.mxu1 %v2319_v38 }
 0x345   :  { %v2061_v56 = vpop.f32.mrf.mxu0  ;;  %2676 = vmatmul.mubr.bf16.gmra.mxu1 %v2318_v23 }
 0x346   :  { %v2193_v19 = vpack.c.bf16 %v2058_v28, %v2054_v53  ;;  %v2256_v41 = vmax.bf16 %v5734_v58, %v2192_v43  ;;  %v2062_v49 = vadd.f32 %v2061_v56, %v5071_v40 }
 0x347   :  { %v2063_v61 = vpop.f32.mrf.mxu0 }
 0x348   :  { %v2257_v0 = vmax.bf16 %v5734_v58, %v2193_v19  ;;  %v2320_v18 = vadd.bf16 %v2256_v41, %v4761_v27  ;;  %v2064_v31 = vadd.f32 %v2063_v61, %v5074_v3  ;;  %v5320_v19 = vld [vmem:[%s5687_s8] ss:$0 sm:$0xff] }
 0x349   :  { %v2065_v12 = vpop.f32.mrf.mxu0 }
 0x34a   :  { %v2066_v21 = vadd.f32 %v2065_v12, %v5071_v40  ;;  %v2321_v8 = vadd.bf16 %v2257_v0, %v4758_v2 }
 0x34b   :  { %v2067_v20 = vpop.f32.mrf.mxu0 }
 0x34c   :  { %v2194_v63 = vpack.c.bf16 %v2066_v21, %v2062_v49  ;;  %v2068_v1 = vadd.f32 %v2067_v20, %v5074_v3  ;;  %2683 = vmatprep.mubr.bf16.mxu1 %v2321_v8 }
 0x34d   :  { %v2071_v36 = vpop.f32.mrf.mxu0  ;;  %2684 = vmatmul.mubr.bf16.gmra.mxu1 %v2320_v18  ;;  %v5798_v18 = vld [vmem:[#allocation44_spill] sm:$0xff] }
 0x34e   :  { %v2195_v17 = vpack.c.bf16 %v2068_v1, %v2064_v31  ;;  %v2258_v6 = vmax.bf16 %v5734_v58, %v2194_v63  ;;  %v2072_v2 = vadd.f32 %v2071_v36, %v5071_v40 }
 0x34f   :  { %v2073_v39 = vpop.f32.mrf.mxu0 }
 0x350   :  { %v2259_v15 = vmax.bf16 %v5734_v58, %v2195_v17  ;;  %v2322_v7 = vadd.bf16 %v2258_v6, %v4777_v57  ;;  %v2074_v11 = vadd.f32 %v2073_v39, %v5074_v3 }
 0x351   :  { %v2075_v42 = vpop.f32.mrf.mxu0 }
 0x352   :  { %v2076_v27 = vadd.f32 %v2075_v42, %v5071_v40  ;;  %v2323_v4 = vadd.bf16 %v2259_v15, %v4774_v47 }
 0x353   :  { %v2077_v55 = vpop.f32.mrf.mxu0 }
 0x354   :  { %v2196_v52 = vpack.c.bf16 %v2076_v27, %v2072_v2  ;;  %v2078_v35 = vadd.f32 %v2077_v55, %v5074_v3  ;;  %2691 = vmatprep.mubr.bf16.mxu1 %v2323_v4 }
 0x355   :  { %v2081_v48 = vpop.f32.mrf.mxu0  ;;  %2692 = vmatmul.mubr.bf16.gmra.mxu1 %v2322_v7 }
 0x356   :  { %v2197_v51 = vpack.c.bf16 %v2078_v35, %v2074_v11  ;;  %v2260_v45 = vmax.bf16 %v5734_v58, %v2196_v52  ;;  %v2082_v47 = vadd.f32 %v2081_v48, %v5071_v40 }
 0x357   :  { %v2083_v32 = vpop.f32.mrf.mxu0 }
 0x358   :  { %v2261_v33 = vmax.bf16 %v5734_v58, %v2197_v51  ;;  %v2324_v22 = vadd.bf16 %v2260_v45, %v4794_v10  ;;  %v2084_v37 = vadd.f32 %v2083_v32, %v5074_v3 }
 0x359   :  { %v2085_v46 = vpop.f32.mrf.mxu0 }
 0x35a   :  { %v2086_v57 = vadd.f32 %v2085_v46, %v5071_v40  ;;  %v2325_v26 = vadd.bf16 %v2261_v33, %v4785_v25 }
 0x35b   :  { %v2087_v38 = vpop.f32.mrf.mxu0 }
 0x35c   :  { %v2198_v23 = vpack.c.bf16 %v2086_v57, %v2082_v47  ;;  %v2088_v30 = vadd.f32 %v2087_v38, %v5074_v3  ;;  %2699 = vmatprep.mubr.bf16.mxu1 %v2325_v26 }
 0x35d   :  { %v2091_v53 = vpop.f32.mrf.mxu0  ;;  %v2509_v43 = vpop.f32.mrf.mxu1  ;;  %2700 = vmatmul.mubr.bf16.gmra.mxu1 %v2324_v22 }
 0x35e   :  { %v2199_v28 = vpack.c.bf16 %v2088_v30, %v2084_v37  ;;  %v2262_v56 = vmax.bf16 %v5734_v58, %v2198_v23  ;;  %v2092_v61 = vadd.f32 %v2091_v53, %v5071_v40  ;;  %v2510_v49 = vadd.f32 %v5320_v19, %v2509_v43 }
 0x35f   :  { %v2093_v25 = vpop.f32.mrf.mxu0  ;;  %v2511_v10 = vpop.f32.mrf.mxu1 }
 0x360   :  { %v2263_v41 = vmax.bf16 %v5734_v58, %v2199_v28  ;;  %v2326_v31 = vadd.bf16 %v2262_v56, %v4819_v24  ;;  %v2094_v36 = vadd.f32 %v2093_v25, %v5074_v3 }
 0x361   :  { %v2095_v0 = vpop.f32.mrf.mxu0  ;;  %v2512_v12 = vpop.f32.mrf.mxu1 }
 0x362   :  { %v2096_v21 = vadd.f32 %v2095_v0, %v5071_v40  ;;  %v2513_v8 = vadd.f32 %v5320_v19, %v2512_v12  ;;  %v2327_v20 = vadd.bf16 %v2263_v41, %v5798_v18 }
 0x363   :  { %v2097_v63 = vpop.f32.mrf.mxu0  ;;  %v2514_v1 = vpop.f32.mrf.mxu1 }
 0x364   :  { %v2200_v17 = vpack.c.bf16 %v2096_v21, %v2092_v61  ;;  %v2763_v6 = vpack.c.bf16 %v2513_v8, %v2510_v49  ;;  %v2098_v39 = vadd.f32 %v2097_v63, %v5074_v3  ;;  %2707 = vmatprep.mubr.bf16.mxu1 %v2327_v20 }
 0x365   :  { %v2101_v15 = vpop.f32.mrf.mxu0  ;;  %v2517_v42 = vpop.f32.mrf.mxu1  ;;  %2708 = vmatmul.mubr.bf16.gmra.mxu1 %v2326_v31 }
 0x366   :  { %v2201_v2 = vpack.c.bf16 %v2098_v39, %v2094_v36  ;;  %v2264_v27 = vmax.bf16 %v5734_v58, %v2200_v17  ;;  %v2795_v55 = vmax.bf16 %v5734_v58, %v2763_v6  ;;  %v2102_v11 = vadd.f32 %v2101_v15, %v5071_v40 }
 0x367   :  { %v2103_v4 = vpop.f32.mrf.mxu0  ;;  %v2519_v7 = vpop.f32.mrf.mxu1  ;;  %v2518_v48 = vadd.f32 %v5320_v19, %v2517_v42 }
 0x368   :  { %v2265_v24 = vmax.bf16 %v5734_v58, %v2201_v2  ;;  %3702 = vmatprep.mubr.bf16.mxu0 %v2795_v55  ;;  %v2328_v33 = vadd.bf16 %v2264_v27, %v4841_v50  ;;  %v2104_v57 = vadd.f32 %v2103_v4, %v5074_v3 }
 0x369   :  { %v2105_v52 = vpop.f32.mrf.mxu0  ;;  %v2520_v35 = vpop.f32.mrf.mxu1 }
 0x36a   :  { %v2106_v51 = vadd.f32 %v2105_v52, %v5071_v40  ;;  %v2521_v45 = vadd.f32 %v5320_v19, %v2520_v35  ;;  %v2329_v32 = vadd.bf16 %v2265_v24, %v4829_v60 }
 0x36b   :  { %v2107_v46 = vpop.f32.mrf.mxu0  ;;  %v2522_v47 = vpop.f32.mrf.mxu1 }
 0x36c   :  { %v2202_v26 = vpack.c.bf16 %v2106_v51, %v2102_v11  ;;  %v2764_v22 = vpack.c.bf16 %v2521_v45, %v2518_v48  ;;  %v2108_v38 = vadd.f32 %v2107_v46, %v5074_v3  ;;  %2715 = vmatprep.mubr.bf16.mxu1 %v2329_v32 }
 0x36d   :  { %v2111_v37 = vpop.f32.mrf.mxu0  ;;  %v2525_v23 = vpop.f32.mrf.mxu1  ;;  %2716 = vmatmul.mubr.bf16.gmra.mxu1 %v2328_v33 }
 0x36e   :  { %v2796_v30 = vmax.bf16 %v5734_v58, %v2764_v22  ;;  %v2203_v53 = vpack.c.bf16 %v2108_v38, %v2104_v57  ;;  %v2266_v43 = vmax.bf16 %v5734_v58, %v2202_v26  ;;  %v2112_v56 = vadd.f32 %v2111_v37, %v5071_v40 }
 0x36f   :  { %v2113_v60 = vpop.f32.mrf.mxu0  ;;  %v2527_v28 = vpop.f32.mrf.mxu1  ;;  %v2526_v41 = vadd.f32 %v5320_v19, %v2525_v23 }
 0x370   :  { %v2267_v50 = vmax.bf16 %v5734_v58, %v2203_v53  ;;  %3703 = vmatmul.mubr.bf16.vlgmr.msra.gmra.mxu0 %v2796_v30  ;;  %v2330_v49 = vadd.bf16 %v2266_v43, %v4862_v54  ;;  %v2114_v18 = vadd.f32 %v2113_v60, %v5074_v3 }
 0x371   :  { %v2115_v25 = vpop.f32.mrf.mxu0  ;;  %v2528_v10 = vpop.f32.mrf.mxu1 }
 0x372   :  { %v2116_v61 = vadd.f32 %v2115_v25, %v5071_v40  ;;  %v2529_v0 = vadd.f32 %v5320_v19, %v2528_v10  ;;  %v2331_v12 = vadd.bf16 %v2267_v50, %v4851_v5 }
 0x373   :  { %v2117_v21 = vpop.f32.mrf.mxu0  ;;  %v2530_v8 = vpop.f32.mrf.mxu1 }
 0x374   :  { %v2204_v20 = vpack.c.bf16 %v2116_v61, %v2112_v56  ;;  %v2765_v31 = vpack.c.bf16 %v2529_v0, %v2526_v41  ;;  %v2118_v63 = vadd.f32 %v2117_v21, %v5074_v3  ;;  %2723 = vmatprep.mubr.bf16.mxu1 %v2331_v12 }
 0x375   :  { %v2121_v1 = vpop.f32.mrf.mxu0  ;;  %v2533_v36 = vpop.f32.mrf.mxu1  ;;  %2724 = vmatmul.mubr.bf16.gmra.mxu1 %v2330_v49 }
 0x376   :  { %v2205_v17 = vpack.c.bf16 %v2118_v63, %v2114_v18  ;;  %v2268_v6 = vmax.bf16 %v5734_v58, %v2204_v20  ;;  %v2797_v5 = vmax.bf16 %v5734_v58, %v2765_v31  ;;  %v2122_v42 = vadd.f32 %v2121_v1, %v5071_v40 }
 0x377   :  { %v2123_v39 = vpop.f32.mrf.mxu0  ;;  %v2535_v15 = vpop.f32.mrf.mxu1  ;;  %v2534_v4 = vadd.f32 %v5320_v19, %v2533_v36 }
 0x378   :  { %v2269_v54 = vmax.bf16 %v5734_v58, %v2205_v17  ;;  %3706 = vmatprep.mubr.bf16.mxu0 %v2797_v5  ;;  %v2332_v11 = vadd.bf16 %v2268_v6, %v4884_v16  ;;  %v2124_v48 = vadd.f32 %v2123_v39, %v5074_v3 }
 0x379   :  { %v2125_v2 = vpop.f32.mrf.mxu0  ;;  %v2536_v27 = vpop.f32.mrf.mxu1 }
 0x37a   :  { %v2126_v7 = vadd.f32 %v2125_v2, %v5071_v40  ;;  %v2537_v55 = vadd.f32 %v5320_v19, %v2536_v27  ;;  %v2333_v24 = vadd.bf16 %v2269_v54, %v4872_v14 }
 0x37b   :  { %v2127_v52 = vpop.f32.mrf.mxu0  ;;  %v2538_v35 = vpop.f32.mrf.mxu1 }
 0x37c   :  { %v2206_v51 = vpack.c.bf16 %v2126_v7, %v2122_v42  ;;  %v2766_v45 = vpack.c.bf16 %v2537_v55, %v2534_v4  ;;  %v2128_v32 = vadd.f32 %v2127_v52, %v5074_v3  ;;  %2731 = vmatprep.mubr.bf16.mxu1 %v2333_v24 }
 0x37d   :  { %v2131_v33 = vpop.f32.mrf.mxu0  ;;  %v2541_v46 = vpop.f32.mrf.mxu1  ;;  %2732 = vmatmul.mubr.bf16.gmra.mxu1 %v2332_v11 }
 0x37e   :  { %v2798_v47 = vmax.bf16 %v5734_v58, %v2766_v45  ;;  %v2207_v57 = vpack.c.bf16 %v2128_v32, %v2124_v48  ;;  %v2270_v26 = vmax.bf16 %v5734_v58, %v2206_v51  ;;  %v2132_v38 = vadd.f32 %v2131_v33, %v5071_v40 }
 0x37f   :  { %v2133_v14 = vpop.f32.mrf.mxu0  ;;  %v2543_v22 = vpop.f32.mrf.mxu1  ;;  %v2542_v30 = vadd.f32 %v5320_v19, %v2541_v46 }
 0x380   :  { %v2271_v16 = vmax.bf16 %v5734_v58, %v2207_v57  ;;  %3707 = vmatmul.mubr.bf16.gmra.mxu0 %v2798_v47  ;;  %v2334_v28 = vadd.bf16 %v2270_v26, %v4905_v34  ;;  %v2134_v25 = vadd.f32 %v2133_v14, %v5074_v3 }
 0x381   :  { %v2135_v37 = vpop.f32.mrf.mxu0  ;;  %v2544_v23 = vpop.f32.mrf.mxu1 }
 0x382   :  { %v2136_v53 = vadd.f32 %v2135_v37, %v5071_v40  ;;  %v2545_v43 = vadd.f32 %v5320_v19, %v2544_v23  ;;  %v2335_v60 = vadd.bf16 %v2271_v16, %v4894_v9 }
 0x383   :  { %v2137_v50 = vpop.f32.mrf.mxu0  ;;  %v2546_v56 = vpop.f32.mrf.mxu1 }
 0x384   :  { %v2208_v10 = vpack.c.bf16 %v2136_v53, %v2132_v38  ;;  %v2767_v41 = vpack.c.bf16 %v2545_v43, %v2542_v30  ;;  %v2138_v61 = vadd.f32 %v2137_v50, %v5074_v3  ;;  %2739 = vmatprep.mubr.bf16.mxu1 %v2335_v60 }
 0x385   :  { %v2141_v0 = vpop.f32.mrf.mxu0  ;;  %v2549_v12 = vpop.f32.mrf.mxu1  ;;  %2740 = vmatmul.mubr.bf16.gmra.mxu1 %v2334_v28 }
 0x386   :  { %v2209_v49 = vpack.c.bf16 %v2138_v61, %v2134_v25  ;;  %v2272_v21 = vmax.bf16 %v5734_v58, %v2208_v10  ;;  %v2142_v8 = vadd.f32 %v2141_v0, %v5071_v40  ;;  %v2799_v34 = vmax.bf16 %v5734_v58, %v2767_v41 }
 0x387   :  { %v2143_v9 = vpop.f32.mrf.mxu0  ;;  %v2551_v18 = vpop.f32.mrf.mxu1  ;;  %v2550_v36 = vadd.f32 %v5320_v19, %v2549_v12 }
 0x388   :  { %v2273_v20 = vmax.bf16 %v5734_v58, %v2209_v49  ;;  %v2144_v31 = vadd.f32 %v2143_v9, %v5074_v3  ;;  %3710 = vmatprep.mubr.bf16.mxu0 %v2799_v34  ;;  %v2336_v40 = vadd.bf16 %v2272_v21, %v4925_v44  ;;  %v2210_v15 = vpack.c.bf16 %v2142_v8, %v2142_v8 }
 0x389   :  { %v2145_v63 = vpop.f32.mrf.mxu0  ;;  %v2552_v1 = vpop.f32.mrf.mxu1 }
 0x38a   :  { %v2211_v17 = vpack.c.bf16 %v2144_v31, %v2144_v31  ;;  %v2553_v6 = vadd.f32 %v5320_v19, %v2552_v1  ;;  %v2337_v39 = vadd.bf16 %v2273_v20, %v4913_v59  ;;  %v2274_v7 = vmax.bf16 %v5734_v58, %v2210_v15 }
 0x38b   :  { %v2146_v5 = vpop.f32.mrf.mxu0  ;;  %v2554_v54 = vpop.f32.mrf.mxu1 }
 0x38c   :  { %v2275_v42 = vmax.bf16 %v5734_v58, %v2211_v17  ;;  %v2768_v2 = vpack.c.bf16 %v2553_v6, %v2550_v36  ;;  %2747 = vmatprep.mubr.bf16.mxu1 %v2337_v39  ;;  %v2338_v11 = vadd.bf16 %v2274_v7, %v4941_v29 }
 0x38d   :  { %v2557_v3 = vpop.f32.mrf.mxu1  ;;  %2748 = vmatmul.mubr.bf16.gmra.mxu1 %v2336_v40 }
 0x38e   :  { %v2800_v27 = vmax.bf16 %v5734_v58, %v2768_v2  ;;  %v2339_v4 = vadd.bf16 %v2275_v42, %v4931_v62  ;;  %v2558_v44 = vadd.f32 %v5320_v19, %v2557_v3 }
 0x38f   :  { %v2559_v55 = vpop.f32.mrf.mxu1 }
 0x390   :  { %2755 = vmatprep.mubr.bf16.mxu1 %v2339_v4  ;;  %3711 = vmatmul.mubr.bf16.gmra.mxu0 %v2800_v27 }
 0x391   :  { %v2560_v59 = vpop.f32.mrf.mxu1 }
 0x392   :  { %v2561_v24 = vadd.f32 %v5320_v19, %v2560_v59 }
 0x393   :  { %v2562_v52 = vpop.f32.mrf.mxu1 }
 0x394   :  { %v2769_v35 = vpack.c.bf16 %v2561_v24, %v2558_v44 }
 0x395   :  { %v2565_v48 = vpop.f32.mrf.mxu1  ;;  %2756 = vmatmul.mubr.bf16.gmra.mxu1 %v2338_v11 }
 0x396   :  { %v2801_v51 = vmax.bf16 %v5734_v58, %v2769_v35  ;;  %v2566_v32 = vadd.f32 %v5320_v19, %v2565_v48 }
 0x397   :  { %v2567_v45 = vpop.f32.mrf.mxu1 }
 0x398   :  { %3714 = vmatprep.mubr.bf16.mxu0 %v2801_v51 }
 0x399   :  { %v2568_v62 = vpop.f32.mrf.mxu1 }
 0x39a   :  { %v2569_v33 = vadd.f32 %v5320_v19, %v2568_v62 }
 0x39b   :  { %v2570_v46 = vpop.f32.mrf.mxu1 }
 0x39c   :  { %v2770_v47 = vpack.c.bf16 %v2569_v33, %v2566_v32 }
 0x39d   :  { %v2573_v57 = vpop.f32.mrf.mxu1 }
 0x39e   :  { %v2802_v26 = vmax.bf16 %v5734_v58, %v2770_v47  ;;  %v2574_v22 = vadd.f32 %v5320_v19, %v2573_v57 }
 0x39f   :  { %v2575_v14 = vpop.f32.mrf.mxu1 }
 0x3a0   :  { %3715 = vmatmul.mubr.bf16.gmra.mxu0 %v2802_v26 }
 0x3a1   :  { %v2576_v29 = vpop.f32.mrf.mxu1 }
 0x3a2   :  { %v2577_v16 = vadd.f32 %v5320_v19, %v2576_v29 }
 0x3a3   :  { %v2578_v38 = vpop.f32.mrf.mxu1 }
 0x3a4   :  { %v2771_v37 = vpack.c.bf16 %v2577_v16, %v2574_v22 }
 0x3a5   :  { %v2581_v23 = vpop.f32.mrf.mxu1 }
 0x3a6   :  { %v2803_v30 = vmax.bf16 %v5734_v58, %v2771_v37  ;;  %v2582_v60 = vadd.f32 %v5320_v19, %v2581_v23 }
 0x3a7   :  { %v2583_v53 = vpop.f32.mrf.mxu1 }
 0x3a8   :  { %3718 = vmatprep.mubr.bf16.mxu0 %v2803_v30 }
 0x3a9   :  { %v2584_v43 = vpop.f32.mrf.mxu1 }
 0x3aa   :  { %v2585_v28 = vadd.f32 %v5320_v19, %v2584_v43 }
 0x3ab   :  { %v2586_v50 = vpop.f32.mrf.mxu1 }
 0x3ac   :  { %v2772_v56 = vpack.c.bf16 %v2585_v28, %v2582_v60 }
 0x3ad   :  { %v2589_v25 = vpop.f32.mrf.mxu1 }
 0x3ae   :  { %v2804_v10 = vmax.bf16 %v5734_v58, %v2772_v56  ;;  %v2590_v0 = vadd.f32 %v5320_v19, %v2589_v25 }
 0x3af   :  { %v2591_v41 = vpop.f32.mrf.mxu1 }
 0x3b0   :  { %3719 = vmatmul.mubr.bf16.gmra.mxu0 %v2804_v10 }
 0x3b1   :  { %v2592_v61 = vpop.f32.mrf.mxu1 }
 0x3b2   :  { %v2593_v12 = vadd.f32 %v5320_v19, %v2592_v61 }
 0x3b3   :  { %v2594_v49 = vpop.f32.mrf.mxu1 }
 0x3b4   :  { %v2773_v21 = vpack.c.bf16 %v2593_v12, %v2590_v0 }
 0x3b5   :  { %v2597_v8 = vpop.f32.mrf.mxu1 }
 0x3b6   :  { %v2805_v9 = vmax.bf16 %v5734_v58, %v2773_v21  ;;  %v2598_v20 = vadd.f32 %v5320_v19, %v2597_v8 }
 0x3b7   :  { %v2599_v18 = vpop.f32.mrf.mxu1 }
 0x3b8   :  { %3722 = vmatprep.mubr.bf16.mxu0 %v2805_v9 }
 0x3b9   :  { %v2600_v34 = vpop.f32.mrf.mxu1 }
 0x3ba   :  { %v2601_v31 = vadd.f32 %v5320_v19, %v2600_v34 }
 0x3bb   :  { %v2602_v63 = vpop.f32.mrf.mxu1 }
 0x3bc   :  { %v2774_v1 = vpack.c.bf16 %v2601_v31, %v2598_v20 }
 0x3bd   :  { %v2605_v36 = vpop.f32.mrf.mxu1 }
 0x3be   :  { %v2806_v17 = vmax.bf16 %v5734_v58, %v2774_v1  ;;  %v2606_v40 = vadd.f32 %v5320_v19, %v2605_v36 }
 0x3bf   :  { %v2607_v6 = vpop.f32.mrf.mxu1 }
 0x3c0   :  { %3723 = vmatmul.mubr.bf16.gmra.mxu0 %v2806_v17 }
 0x3c1   :  { %v2608_v39 = vpop.f32.mrf.mxu1 }
 0x3c2   :  { %v2609_v15 = vadd.f32 %v5320_v19, %v2608_v39 }
 0x3c3   :  { %v2610_v5 = vpop.f32.mrf.mxu1 }
 0x3c4   :  { %v2775_v54 = vpack.c.bf16 %v2609_v15, %v2606_v40 }
 0x3c5   :  { %v2613_v42 = vpop.f32.mrf.mxu1 }
 0x3c6   :  { %v2807_v2 = vmax.bf16 %v5734_v58, %v2775_v54  ;;  %v2614_v4 = vadd.f32 %v5320_v19, %v2613_v42 }
 0x3c7   :  { %v2615_v3 = vpop.f32.mrf.mxu1 }
 0x3c8   :  { %3726 = vmatprep.mubr.bf16.mxu0 %v2807_v2 }
 0x3c9   :  { %v2616_v27 = vpop.f32.mrf.mxu1 }
 0x3ca   :  { %v2617_v7 = vadd.f32 %v5320_v19, %v2616_v27 }
 0x3cb   :  { %v2618_v55 = vpop.f32.mrf.mxu1 }
 0x3cc   :  { %v2776_v59 = vpack.c.bf16 %v2617_v7, %v2614_v4 }
 0x3cd   :  { %v2621_v44 = vpop.f32.mrf.mxu1 }
 0x3ce   :  { %v2808_v24 = vmax.bf16 %v5734_v58, %v2776_v59  ;;  %v2622_v35 = vadd.f32 %v5320_v19, %v2621_v44 }
 0x3cf   :  { %v2623_v11 = vpop.f32.mrf.mxu1 }
 0x3d0   :  { %3727 = vmatmul.mubr.bf16.gmra.mxu0 %v2808_v24 }
 0x3d1   :  { %v2624_v52 = vpop.f32.mrf.mxu1 }
 0x3d2   :  { %v2625_v48 = vadd.f32 %v5320_v19, %v2624_v52 }
 0x3d3   :  { %v2626_v51 = vpop.f32.mrf.mxu1 }
 0x3d4   :  { %v2777_v45 = vpack.c.bf16 %v2625_v48, %v2622_v35 }
 0x3d5   :  { %v2629_v62 = vpop.f32.mrf.mxu1 }
 0x3d6   :  { %v2809_v32 = vmax.bf16 %v5734_v58, %v2777_v45  ;;  %v2630_v47 = vadd.f32 %v5320_v19, %v2629_v62 }
 0x3d7   :  { %v2631_v33 = vpop.f32.mrf.mxu1 }
 0x3d8   :  { %3730 = vmatprep.mubr.bf16.mxu0 %v2809_v32 }
 0x3d9   :  { %v2632_v46 = vpop.f32.mrf.mxu1 }
 0x3da   :  { %v2633_v57 = vadd.f32 %v5320_v19, %v2632_v46 }
 0x3db   :  { %v2634_v26 = vpop.f32.mrf.mxu1 }
 0x3dc   :  { %v2778_v14 = vpack.c.bf16 %v2633_v57, %v2630_v47 }
 0x3dd   :  { %v2637_v29 = vpop.f32.mrf.mxu1 }
 0x3de   :  { %v2810_v22 = vmax.bf16 %v5734_v58, %v2778_v14  ;;  %v2638_v37 = vadd.f32 %v5320_v19, %v2637_v29 }
 0x3df   :  { %v2639_v16 = vpop.f32.mrf.mxu1 }
 0x3e0   :  { %3731 = vmatmul.mubr.bf16.gmra.mxu0 %v2810_v22 }
 0x3e1   :  { %v2640_v38 = vpop.f32.mrf.mxu1 }
 0x3e2   :  { %v2641_v23 = vadd.f32 %v5320_v19, %v2640_v38 }
 0x3e3   :  { %v2642_v30 = vpop.f32.mrf.mxu1 }
 0x3e4   :  { %v2779_v53 = vpack.c.bf16 %v2641_v23, %v2638_v37 }
 0x3e5   :  { %v2645_v43 = vpop.f32.mrf.mxu1 }
 0x3e6   :  { %v2811_v60 = vmax.bf16 %v5734_v58, %v2779_v53  ;;  %v2646_v56 = vadd.f32 %v5320_v19, %v2645_v43 }
 0x3e7   :  { %v2647_v28 = vpop.f32.mrf.mxu1 }
 0x3e8   :  { %3734 = vmatprep.mubr.bf16.mxu0 %v2811_v60 }
 0x3e9   :  { %v2648_v50 = vpop.f32.mrf.mxu1 }
 0x3ea   :  { %v2649_v25 = vadd.f32 %v5320_v19, %v2648_v50 }
 0x3eb   :  { %v2650_v10 = vpop.f32.mrf.mxu1 }
 0x3ec   :  { %v2780_v41 = vpack.c.bf16 %v2649_v25, %v2646_v56 }
 0x3ed   :  { %v2653_v61 = vpop.f32.mrf.mxu1 }
 0x3ee   :  { %v2812_v0 = vmax.bf16 %v5734_v58, %v2780_v41  ;;  %v2654_v21 = vadd.f32 %v5320_v19, %v2653_v61 }
 0x3ef   :  { %v2655_v12 = vpop.f32.mrf.mxu1 }
 0x3f0   :  { %3735 = vmatmul.mubr.bf16.gmra.mxu0 %v2812_v0 }
 0x3f1   :  { %v2656_v49 = vpop.f32.mrf.mxu1 }
 0x3f2   :  { %v2657_v8 = vadd.f32 %v5320_v19, %v2656_v49 }
 0x3f3   :  { %v2658_v9 = vpop.f32.mrf.mxu1 }
 0x3f4   :  { %v2781_v18 = vpack.c.bf16 %v2657_v8, %v2654_v21 }
 0x3f5   :  { %v2661_v34 = vpop.f32.mrf.mxu1 }
 0x3f6   :  { %v2813_v20 = vmax.bf16 %v5734_v58, %v2781_v18  ;;  %v2662_v1 = vadd.f32 %v5320_v19, %v2661_v34 }
 0x3f7   :  { %v2663_v31 = vpop.f32.mrf.mxu1 }
 0x3f8   :  { %3738 = vmatprep.mubr.bf16.mxu0 %v2813_v20 }
 0x3f9   :  { %v2664_v63 = vpop.f32.mrf.mxu1 }
 0x3fa   :  { %v2665_v36 = vadd.f32 %v5320_v19, %v2664_v63 }
 0x3fb   :  { %v2666_v17 = vpop.f32.mrf.mxu1 }
 0x3fc   :  { %v2782_v6 = vpack.c.bf16 %v2665_v36, %v2662_v1 }
 0x3fd   :  { %v2669_v39 = vpop.f32.mrf.mxu1 }
 0x3fe   :  { %v2814_v40 = vmax.bf16 %v5734_v58, %v2782_v6  ;;  %v2670_v54 = vadd.f32 %v5320_v19, %v2669_v39 }
 0x3ff   :  { %v2671_v15 = vpop.f32.mrf.mxu1 }
 0x400   :  { %3739 = vmatmul.mubr.bf16.gmra.mxu0 %v2814_v40 }
 0x401   :  { %v2672_v5 = vpop.f32.mrf.mxu1 }
 0x402   :  { %v2673_v42 = vadd.f32 %v5320_v19, %v2672_v5 }
 0x403   :  { %v2674_v2 = vpop.f32.mrf.mxu1 }
 0x404   :  { %v2783_v3 = vpack.c.bf16 %v2673_v42, %v2670_v54 }
 0x405   :  { %v2677_v27 = vpop.f32.mrf.mxu1 }
 0x406   :  { %v2815_v4 = vmax.bf16 %v5734_v58, %v2783_v3  ;;  %v2678_v59 = vadd.f32 %v5320_v19, %v2677_v27 }
 0x407   :  { %v2679_v7 = vpop.f32.mrf.mxu1 }
 0x408   :  { %3742 = vmatprep.mubr.bf16.mxu0 %v2815_v4 }
 0x409   :  { %v2680_v55 = vpop.f32.mrf.mxu1 }
 0x40a   :  { %v2681_v44 = vadd.f32 %v5320_v19, %v2680_v55 }
 0x40b   :  { %v2682_v24 = vpop.f32.mrf.mxu1 }
 0x40c   :  { %v2784_v11 = vpack.c.bf16 %v2681_v44, %v2678_v59 }
 0x40d   :  { %v2685_v52 = vpop.f32.mrf.mxu1 }
 0x40e   :  { %v2816_v35 = vmax.bf16 %v5734_v58, %v2784_v11  ;;  %v2686_v45 = vadd.f32 %v5320_v19, %v2685_v52 }
 0x40f   :  { %v2687_v48 = vpop.f32.mrf.mxu1 }
 0x410   :  { %3743 = vmatmul.mubr.bf16.gmra.mxu0 %v2816_v35 }
 0x411   :  { %v2688_v51 = vpop.f32.mrf.mxu1 }
 0x412   :  { %v2689_v62 = vadd.f32 %v5320_v19, %v2688_v51 }
 0x413   :  { %v2690_v32 = vpop.f32.mrf.mxu1 }
 0x414   :  { %v2785_v33 = vpack.c.bf16 %v2689_v62, %v2686_v45 }
 0x415   :  { %v2693_v46 = vpop.f32.mrf.mxu1 }
 0x416   :  { %v2817_v47 = vmax.bf16 %v5734_v58, %v2785_v33  ;;  %v2694_v14 = vadd.f32 %v5320_v19, %v2693_v46 }
 0x417   :  { %v2695_v57 = vpop.f32.mrf.mxu1 }
 0x418   :  { %3746 = vmatprep.mubr.bf16.mxu0 %v2817_v47 }
 0x419   :  { %v2696_v26 = vpop.f32.mrf.mxu1 }
 0x41a   :  { %v2697_v29 = vadd.f32 %v5320_v19, %v2696_v26 }
 0x41b   :  { %v2698_v22 = vpop.f32.mrf.mxu1 }
 0x41c   :  { %v2786_v16 = vpack.c.bf16 %v2697_v29, %v2694_v14 }
 0x41d   :  { %v2701_v38 = vpop.f32.mrf.mxu1 }
 0x41e   :  { %v2818_v37 = vmax.bf16 %v5734_v58, %v2786_v16  ;;  %v2702_v53 = vadd.f32 %v5320_v19, %v2701_v38 }
 0x41f   :  { %v2703_v23 = vpop.f32.mrf.mxu1 }
 0x420   :  { %3747 = vmatmul.mubr.bf16.gmra.mxu0 %v2818_v37 }
 0x421   :  { %v2704_v30 = vpop.f32.mrf.mxu1 }
 0x422   :  { %v2705_v43 = vadd.f32 %v5320_v19, %v2704_v30 }
 0x423   :  { %v2706_v60 = vpop.f32.mrf.mxu1 }
 0x424   :  { %v2787_v28 = vpack.c.bf16 %v2705_v43, %v2702_v53 }
 0x425   :  { %v2709_v50 = vpop.f32.mrf.mxu1 }
 0x426   :  { %v2819_v56 = vmax.bf16 %v5734_v58, %v2787_v28  ;;  %v2710_v41 = vadd.f32 %v5320_v19, %v2709_v50 }
 0x427   :  { %v2711_v25 = vpop.f32.mrf.mxu1 }
 0x428   :  { %3750 = vmatprep.mubr.bf16.mxu0 %v2819_v56 }
 0x429   :  { %v2712_v10 = vpop.f32.mrf.mxu1 }
 0x42a   :  { %v2713_v61 = vadd.f32 %v5320_v19, %v2712_v10 }
 0x42b   :  { %v2714_v0 = vpop.f32.mrf.mxu1 }
 0x42c   :  { %v2788_v12 = vpack.c.bf16 %v2713_v61, %v2710_v41 }
 0x42d   :  { %v2717_v49 = vpop.f32.mrf.mxu1 }
 0x42e   :  { %v2820_v21 = vmax.bf16 %v5734_v58, %v2788_v12  ;;  %v2718_v18 = vadd.f32 %v5320_v19, %v2717_v49 }
 0x42f   :  { %v2719_v8 = vpop.f32.mrf.mxu1 }
 0x430   :  { %3751 = vmatmul.mubr.bf16.gmra.mxu0 %v2820_v21  ;;  %v5454_v54 = vpop.f32.mrf.mxu0 }
 0x431   :  { %v2720_v9 = vpop.f32.mrf.mxu1 }
 0x432   :  { %v2721_v34 = vadd.f32 %v5320_v19, %v2720_v9  ;;  %v5457_v27 = vpop.f32.mrf.mxu0 }
 0x433   :  { %v2722_v20 = vpop.f32.mrf.mxu1 }
 0x434   :  { %v2789_v31 = vpack.c.bf16 %v2721_v34, %v2718_v18  ;;  %v5461_v24 = vpop.f32.mrf.mxu0 }
 0x435   :  { %v2725_v63 = vpop.f32.mrf.mxu1 }
 0x436   :  { %v2821_v1 = vmax.bf16 %v5734_v58, %v2789_v31  ;;  %v2726_v6 = vadd.f32 %v5320_v19, %v2725_v63  ;;  %v5464_v48 = vpop.f32.mrf.mxu0 }
 0x437   :  { %v2727_v36 = vpop.f32.mrf.mxu1 }
 0x438   :  { %3754 = vmatprep.mubr.bf16.mxu0 %v2821_v1 }
 0x439   :  { %v2728_v17 = vpop.f32.mrf.mxu1 }
 0x43a   :  { %v2729_v39 = vadd.f32 %v5320_v19, %v2728_v17 }
 0x43b   :  { %v2730_v40 = vpop.f32.mrf.mxu1 }
 0x43c   :  { %v2790_v15 = vpack.c.bf16 %v2729_v39, %v2726_v6 }
 0x43d   :  { %v2733_v5 = vpop.f32.mrf.mxu1 }
 0x43e   :  { %v2822_v42 = vmax.bf16 %v5734_v58, %v2790_v15  ;;  %v2734_v4 = vadd.f32 %v5320_v19, %v2733_v5  ;;  %v5505_v5 = vld [vmem:[%s5689_s10] ss:$0 sm:$0xff] }
 0x43f   :  { %v2735_v2 = vpop.f32.mrf.mxu1 }
 0x440   :  { %3755 = vmatmul.mubr.bf16.gmra.mxu0 %v2822_v42  ;;  %v5468_v32 = vpop.f32.mrf.mxu0 }
 0x441   :  { %v2736_v3 = vpop.f32.mrf.mxu1 }
 0x442   :  { %v2737_v7 = vadd.f32 %v5320_v19, %v2736_v3  ;;  %v5471_v26 = vpop.f32.mrf.mxu0 }
 0x443   :  { %v2738_v55 = vpop.f32.mrf.mxu1 }
 0x444   :  { %v2791_v59 = vpack.c.bf16 %v2737_v7, %v2734_v4  ;;  %v5475_v38 = vpop.f32.mrf.mxu0 }
 0x445   :  { %v2741_v44 = vpop.f32.mrf.mxu1 }
 0x446   :  { %v2823_v11 = vmax.bf16 %v5734_v58, %v2791_v59  ;;  %v2742_v51 = vadd.f32 %v5320_v19, %v2741_v44  ;;  %v5479_v60 = vpop.f32.mrf.mxu0 }
 0x447   :  { %v2743_v52 = vpop.f32.mrf.mxu1 }
 0x448   :  { %3758 = vmatprep.mubr.bf16.mxu0 %v2823_v11 }
 0x449   :  { %v2744_v35 = vpop.f32.mrf.mxu1 }
 0x44a   :  { %v2745_v45 = vadd.f32 %v5320_v19, %v2744_v35 }
 0x44b   :  { %v2746_v62 = vpop.f32.mrf.mxu1 }
 0x44c   :  { %v2792_v33 = vpack.c.bf16 %v2745_v45, %v2742_v51 }
 0x44d   :  { %v2749_v46 = vpop.f32.mrf.mxu1 }
 0x44e   :  { %v2824_v47 = vmax.bf16 %v5734_v58, %v2792_v33  ;;  %v2750_v29 = vadd.f32 %v5320_v19, %v2749_v46 }
 0x44f   :  { %v2751_v57 = vpop.f32.mrf.mxu1 }
 0x450   :  { %3759 = vmatmul.mubr.bf16.gmra.mxu0 %v2824_v47  ;;  %v3712_v56 = vpop.f32.mrf.mxu0 }
 0x451   :  { %v2752_v14 = vpop.f32.mrf.mxu1 }
 0x452   :  { %v2753_v22 = vadd.f32 %v5320_v19, %v2752_v14  ;;  %v5482_v41 = vpop.f32.mrf.mxu0 }
 0x453   :  { %v2754_v16 = vpop.f32.mrf.mxu1 }
 0x454   :  { %v2793_v37 = vpack.c.bf16 %v2753_v22, %v2750_v29  ;;  %v3713_v61 = vpop.f32.mrf.mxu0 }
 0x455   :  { %v2757_v23 = vpop.f32.mrf.mxu1  ;;  %v2976_v14 = vadd.f32 %v3713_v61, %v5505_v5 }
 0x456   :  { %v2758_v30 = vadd.f32 %v5320_v19, %v2757_v23  ;;  %v2825_v53 = vmax.bf16 %v5734_v58, %v2793_v37  ;;  %v5484_v0 = vpop.f32.mrf.mxu0  ;;  %v4029_v19 = vmov 0.0   ;;  %v2973_v23 = vadd.f32 %v3712_v56, %v5505_v5 }
 0x457   :  { %v2759_v43 = vpop.f32.mrf.mxu1  ;;  %3321 = vmatprep.subr.mxu0 %v4029_v19  ;;  %v2965_v56 = vadd.f32 %v5505_v5, %v5482_v41  ;;  %v2957_v41 = vadd.f32 %v5468_v32, %v5505_v5  ;;  %v2949_v32 = vadd.f32 %v5505_v5, %v5471_v26  ;;  %v2941_v26 = vadd.f32 %v5454_v54, %v5505_v5 }
 0x458   :  { %v2794_v28 = vpack.c.bf16 %v2758_v30, %v2758_v30  ;;  %3762 = vmatprep.mubr.bf16.mxu0 %v2825_v53  ;;  %v3197_v30 = vmax.f32 %v2976_v14, 0.0  ;;  %v2933_v54 = vadd.f32 %v5505_v5, %v5457_v27 }
 0x459   :  { %v2760_v50 = vpop.f32.mrf.mxu1 }
 0x45a   :  { %v2826_v25 = vmax.bf16 %v5734_v58, %v2794_v28  ;;  %v3196_v50 = vmax.f32 %v2973_v23, 0.0  ;;  %v3392_v23 = vld [vmem:[#allocation2] sm:$0x1] }
 0x45b   :  { %v2761_v10 = vpop.f32.mrf.mxu1  ;;  %3395 = vperm.xlu0 %3779, %v3392_v23  }
 0x45c   :  { %3763 = vmatmul.mubr.bf16.gmra.mxu0 %v2826_v25  ;;  %v2968_v25 = vadd.f32 %v5505_v5, %v5484_v0  ;;  %v2960_v0 = vadd.f32 %v5475_v38, %v5505_v5  ;;  %v3192_v38 = vmax.f32 %v2957_v41, 0.0 }
 0x45d   :  { %3385 = vmatprep.mubr.f32.mxu0 %v4029_v19 }
 0x460   :  { %v3716_v12 = vpop.f32.mrf.mxu0 }
 0x461   :  { %v2989_v59 = vadd.f32 %v3716_v12, %v5505_v5 }
 0x462   :  { %v2980_v49 = vpop.f32.mrf.mxu0 }
 0x463   :  { %v3200_v35 = vmax.f32 %v2989_v59, 0.0  ;;  %v2981_v33 = vadd.f32 %v5505_v5, %v2980_v49  ;;  %v3195_v49 = vmax.f32 %v2968_v25, 0.0 }
 0x464   :  { %v3717_v21 = vpop.f32.mrf.mxu0 }
 0x465   :  { %v2992_v42 = vadd.f32 %v3717_v21, %v5505_v5  ;;  %v3198_v29 = vmax.f32 %v2981_v33, 0.0 }
 0x466   :  { %v2983_v8 = vpop.f32.mrf.mxu0 }
 0x467   :  { %v3201_v44 = vmax.f32 %v2992_v42, 0.0  ;;  %v2984_v51 = vadd.f32 %v5505_v5, %v2983_v8 }
 0x469   :  { %v3199_v46 = vmax.f32 %v2984_v51, 0.0 }
 0x470   :  { %v5488_v9 = vpop.f32.mrf.mxu0 }
 0x472   :  { %v5490_v18 = vpop.f32.mrf.mxu0 }
 0x474   :  { %v5492_v58 = vpop.f32.mrf.mxu0 }
 0x476   :  { %v5494_v34 = vpop.f32.mrf.mxu0 }
 0x480   :  { %v5496_v20 = vpop.f32.mrf.mxu0 }
 0x482   :  { %v5498_v31 = vpop.f32.mrf.mxu0 }
 0x484   :  { %v3725_v63 = vpop.f32.mrf.mxu0 }
 0x485   :  { %v3024_v21 = vadd.f32 %v3725_v63, %v5505_v5  ;;  %v3193_v63 = vmax.f32 %v2960_v0, 0.0 }
 0x486   :  { %v5500_v1 = vpop.f32.mrf.mxu0 }
 0x490   :  { %v3728_v36 = vpop.f32.mrf.mxu0 }
 0x491   :  { %v3037_v22 = vadd.f32 %v3728_v36, %v5505_v5 }
 0x492   :  { %v3028_v17 = vpop.f32.mrf.mxu0 }
 0x493   :  { %v3212_v53 = vmax.f32 %v3037_v22, 0.0  ;;  %v3029_v10 = vadd.f32 %v5505_v5, %v3028_v17  ;;  %v3194_v17 = vmax.f32 %v2965_v56, 0.0  ;;  %v5575_v22 = vld [vmem:[%s5690_s11] sm:$0xff]  ;;  %s4031_s11 = smov [#allocation9]  }
 0x494   :  { %v3729_v6 = vpop.f32.mrf.mxu0  ;;  %3684 = vmatprep.mubr.f32.mxu1 %v5575_v22  ;;  %s3446_s9 = sshll.u32 %s4031_s11, 4  ;;  %s3447_s9 = int_to_ptr.vmem [resolvable:$true] %s3446_s9 }
 0x495   :  { %v3040_v47 = vadd.f32 %v3729_v6, %v5505_v5  ;;  %v3210_v8 = vmax.f32 %v3029_v10, 0.0  ;;  %s3995_s30 = scalar_lea.vmem %s3447_s9, 64  ;;  %p4000_p2 = scmp.lt.s32.totalorder %s3447_s9, %s3447_s9 }
 0x496   :  { %v3031_v39 = vpop.f32.mrf.mxu0  ;;  %p3996_p1 = scmp.ne.s32.totalorder %s3447_s9, %s3995_s30  ;;  %p4001_p3 = scmp.lt.s32.totalorder %s3995_s30, %s3995_s30 }
 0x497   :  { %v3213_v16 = vmax.f32 %v3040_v47, 0.0  ;;  %v3032_v43 = vadd.f32 %v5505_v5, %v3031_v39  ;;  %v3021_v39 = vadd.f32 %v5496_v20, %v5505_v5 }
 0x498   :  { %p4002_p4 = por %p4001_p3, %p4000_p2 }
 0x499   :  { %v3211_v61 = vmax.f32 %v3032_v43, 0.0  ;;  %v3208_v42 = vmax.f32 %v3021_v39, 0.0 }
 0x49a   :  { %p4003_p5 = pnand %p4002_p4, %p3996_p1 }
 0x4a0   :  { %v3732_v40 = vpop.f32.mrf.mxu0 }
 0x4a1   :  { %v3053_v3 = vadd.f32 %v3732_v40, %v5505_v5  ;;  %v3209_v40 = vmax.f32 %v3024_v21, 0.0 }
 0x4a2   :  { %v3044_v15 = vpop.f32.mrf.mxu0 }
 0x4a3   :  { %v3216_v11 = vmax.f32 %v3053_v3, 0.0  ;;  %v3045_v45 = vadd.f32 %v5505_v5, %v3044_v15  ;;  %v2952_v3 = vadd.f32 %v5505_v5, %v5479_v60  ;;  %v2944_v60 = vadd.f32 %v5461_v24, %v5505_v5 }
 0x4a4   :  { %v3733_v2 = vpop.f32.mrf.mxu0  ;;  %v3188_v24 = vmax.f32 %v2941_v26, 0.0 }
 0x4a5   :  { %v3056_v4 = vadd.f32 %v3733_v2, %v5505_v5  ;;  %v3214_v57 = vmax.f32 %v3045_v45, 0.0  ;;  %v3016_v2 = vadd.f32 %v5505_v5, %v5500_v1  ;;  %v3008_v1 = vadd.f32 %v5492_v58, %v5505_v5 }
 0x4a6   :  { %v3047_v7 = vpop.f32.mrf.mxu0  ;;  %v3189_v45 = vmax.f32 %v2944_v60, 0.0 }
 0x4a7   :  { %v3217_v55 = vmax.f32 %v3056_v4, 0.0  ;;  %v3048_v52 = vadd.f32 %v5505_v5, %v3047_v7  ;;  %v3013_v4 = vadd.f32 %v5505_v5, %v5498_v31  ;;  %v3207_v7 = vmax.f32 %v3016_v2, 0.0 }
 0x4a8   :  { %v3190_v31 = vmax.f32 %v2949_v32, 0.0 }
 0x4a9   :  { %3652 = vmatprep.subr.mxu1 %v3217_v55  ;;  %v3215_v62 = vmax.f32 %v3048_v52, 0.0  ;;  %v3191_v55 = vmax.f32 %v2952_v3, 0.0  ;;  %v3005_v52 = vadd.f32 %v5488_v9, %v5505_v5  ;;  %v2997_v9 = vadd.f32 %v5505_v5, %v5490_v18 }
 0x4aa   :  { %3653 = vmatpush3.xpose.msra.mxu1 %v3201_v44  ;;  %v3206_v44 = vmax.f32 %v3013_v4, 0.0 }
 0x4ab   :  { %3654 = vmatprep.subr.mxu1 %v3216_v11  ;;  %v3204_v58 = vmax.f32 %v3005_v52, 0.0 }
 0x4ae   :  { %3655 = vmatpush3.xpose.msra.mxu1 %v3200_v35  ;;  %v3205_v35 = vmax.f32 %v3008_v1, 0.0 }
 0x4af   :  { %3656 = vmatprep.subr.mxu1 %v3215_v62  ;;  %v3000_v62 = vadd.f32 %v5505_v5, %v5494_v34  ;;  %v3202_v34 = vmax.f32 %v2997_v9, 0.0 }
 0x4b0   :  { %v5518_v37 = vpop.f32.mrf.mxu0 }
 0x4b1   :  { %v3203_v47 = vmax.f32 %v3000_v62, 0.0  ;;  %v3069_v26 = vadd.f32 %v5518_v37, %v5505_v5 }
 0x4b2   :  { %3657 = vmatpush3.xpose.msra.mxu1 %v3199_v46  ;;  %v5522_v28 = vpop.f32.mrf.mxu0  ;;  %v2936_v46 = vadd.f32 %v5505_v5, %v5464_v48  ;;  %v3186_v48 = vmax.f32 %v2933_v54, 0.0 }
 0x4b3   :  { %3658 = vmatprep.subr.mxu1 %v3214_v57 }
 0x4b4   :  { %v5527_v12 = vpop.f32.mrf.mxu0  ;;  %v3187_v14 = vmax.f32 %v2936_v46, 0.0 }
 0x4b6   :  { %3659 = vmatpush3.xpose.msra.mxu1 %v3198_v29  ;;  %v5532_v36 = vpop.f32.mrf.mxu0 }
 0x4b7   :  { %3660 = vmatprep.subr.mxu1 %v3213_v16  ;;  %v3064_v62 = vadd.f32 %v5505_v5, %v5532_v36 }
 0x4b9   :  { %v3219_v46 = vmax.f32 %v3064_v62, 0.0 }
 0x4ba   :  { %3661 = vmatpush3.xpose.msra.mxu1 %v3197_v30 }
 0x4bb   :  { %3662 = vmatprep.subr.mxu1 %v3212_v53 }
 0x4be   :  { %3663 = vmatpush3.xpose.msra.mxu1 %v3196_v50 }
 0x4bf   :  { %3664 = vmatprep.subr.mxu1 %v3211_v61 }
 0x4c0   :  { %v5536_v6 = vpop.f32.mrf.mxu0 }
 0x4c1   :  { %v3085_v32 = vadd.f32 %v5536_v6, %v5505_v5 }
 0x4c2   :  { %3665 = vmatpush3.xpose.msra.mxu1 %v3195_v49  ;;  %v5542_v15 = vpop.f32.mrf.mxu0 }
 0x4c3   :  { %3666 = vmatprep.subr.mxu1 %v3210_v8  ;;  %v3077_v60 = vadd.f32 %v5505_v5, %v5542_v15 }
 0x4c4   :  { %v5548_v20 = vpop.f32.mrf.mxu0 }
 0x4c5   :  { %v3088_v3 = vadd.f32 %v5548_v20, %v5505_v5 }
 0x4c6   :  { %3667 = vmatpush3.xpose.msra.mxu1 %v3194_v17  ;;  %v5554_v59 = vpop.f32.mrf.mxu0 }
 0x4c7   :  { %3668 = vmatprep.subr.mxu1 %v3209_v40 }
 0x4ca   :  { %3669 = vmatpush3.xpose.msra.mxu1 %v3193_v63 }
 0x4cb   :  { %3670 = vmatprep.subr.mxu1 %v3208_v42 }
 0x4ce   :  { %3671 = vmatpush3.xpose.msra.mxu1 %v3192_v38 }
 0x4cf   :  { %3672 = vmatprep.subr.mxu1 %v3207_v7 }
 0x4d0   :  { %v3744_v11 = vpop.f32.mrf.mxu0 }
 0x4d1   :  { %v3101_v8 = vadd.f32 %v3744_v11, %v5505_v5  ;;  %v3080_v11 = vadd.f32 %v5505_v5, %v5554_v59 }
 0x4d2   :  { %3673 = vmatpush3.xpose.msra.mxu1 %v3191_v55  ;;  %v3092_v51 = vpop.f32.mrf.mxu0  ;;  %v3225_v55 = vmax.f32 %v3088_v3, 0.0 }
 0x4d3   :  { %3674 = vmatprep.subr.mxu1 %v3206_v44  ;;  %v3228_v39 = vmax.f32 %v3101_v8, 0.0  ;;  %v3093_v63 = vadd.f32 %v5505_v5, %v3092_v51  ;;  %v3224_v44 = vmax.f32 %v3085_v32, 0.0  ;;  %v3222_v51 = vmax.f32 %v3077_v60, 0.0 }
 0x4d4   :  { %v3745_v33 = vpop.f32.mrf.mxu0  ;;  %v4030_v32 = vmov 1966171168  }
 0x4d5   :  { %v3104_v56 = vadd.f32 %v3745_v33, %v5505_v5  ;;  %v3226_v4 = vmax.f32 %v3093_v63, 0.0 }
 0x4d6   :  { %3675 = vmatpush3.xpose.msra.mxu1 %v3190_v31  ;;  %v3095_v57 = vpop.f32.mrf.mxu0  ;;  %v3223_v31 = vmax.f32 %v3080_v11, 0.0 }
 0x4d7   :  { %3676 = vmatprep.subr.mxu1 %v3205_v35  ;;  %v3229_v0 = vmax.f32 %v3104_v56, 0.0  ;;  %v3096_v40 = vadd.f32 %v5505_v5, %v3095_v57  ;;  %v3072_v35 = vadd.f32 %v5527_v12, %v5505_v5 }
 0x4d9   :  { %v3227_v42 = vmax.f32 %v3096_v40, 0.0 }
 0x4da   :  { %3677 = vmatpush3.xpose.msra.mxu1 %v3189_v45  ;;  %v3221_v45 = vmax.f32 %v3072_v35, 0.0 }
 0x4db   :  { %3678 = vmatprep.subr.mxu1 %v3204_v58  ;;  %v3220_v58 = vmax.f32 %v3069_v26, 0.0 }
 0x4de   :  { %3679 = vmatpush3.xpose.msra.mxu1 %v3188_v24  ;;  %v3061_v24 = vadd.f32 %v5505_v5, %v5522_v28 }
 0x4df   :  { %3680 = vmatprep.subr.mxu1 %v3203_v47 }
 0x4e0   :  { %v3748_v29 = vpop.f32.mrf.mxu0  ;;  %v3218_v37 = vmax.f32 %v3061_v24, 0.0 }
 0x4e1   :  { %v3117_v27 = vadd.f32 %v3748_v29, %v5505_v5 }
 0x4e2   :  { %v3108_v16 = vpop.f32.mrf.mxu0  ;;  %3681 = vmatpush3.xpose.msra.mxu1 %v3187_v14 }
 0x4e3   :  { %3682 = vmatprep.subr.mxu1 %v3202_v34  ;;  %v3232_v50 = vmax.f32 %v3117_v27, 0.0  ;;  %v3109_v10 = vadd.f32 %v5505_v5, %v3108_v16 }
 0x4e4   :  { %v3749_v18 = vpop.f32.mrf.mxu0 }
 0x4e5   :  { %v3120_v30 = vadd.f32 %v3749_v18, %v5505_v5  ;;  %v3230_v49 = vmax.f32 %v3109_v10, 0.0 }
 0x4e6   :  { %3683 = vmatpush3.xpose.msra.mxu1 %v3186_v48  ;;  %v3111_v43 = vpop.f32.mrf.mxu0 }
 0x4e7   :  { %v3233_v53 = vmax.f32 %v3120_v30, 0.0  ;;  %v3112_v25 = vadd.f32 %v5505_v5, %v3111_v43 }
 0x4e9   :  { %3322 = vmatpush1.xpose.msra.mxu0 %v3233_v53  ;;  %3685 = vmatmul.mubr.f32.vlgmr.msra.gmra.mxu1 %v5575_v22  ;;  %v3231_v61 = vmax.f32 %v3112_v25, 0.0 }
 0x4ea   :  { %3323 = vmatprep.subr.mxu0 %v4029_v19 }
 0x4ed   :  { %3324 = vmatpush1.xpose.msra.mxu0 %v3232_v50 }
 0x4ee   :  { %3325 = vmatprep.subr.mxu0 %v4029_v19 }
 0x4f0   :  { %v5587_v21 = vpop.f32.mrf.mxu0 }
 0x4f1   :  { %3326 = vmatpush1.xpose.msra.mxu0 %v3231_v61 }
 0x4f2   :  { %3327 = vmatprep.subr.mxu0 %v4029_v19  ;;  %v5591_v17 = vpop.f32.mrf.mxu0 }
 0x4f4   :  { %v5595_v41 = vpop.f32.mrf.mxu0 }
 0x4f5   :  { %3328 = vmatpush1.xpose.msra.mxu0 %v3230_v49  ;;  %v3136_v8 = vadd.f32 %v5595_v41, %v5505_v5  ;;  %v3125_v41 = vadd.f32 %v5505_v5, %v5591_v17 }
 0x4f6   :  { %3329 = vmatprep.subr.mxu0 %v4029_v19  ;;  %v5599_v2 = vpop.f32.mrf.mxu0 }
 0x4f7   :  { %v3237_v40 = vmax.f32 %v3136_v8, 0.0  ;;  %v3234_v3 = vmax.f32 %v3125_v41, 0.0 }
 0x4f9   :  { %3330 = vmatpush1.xpose.msra.mxu0 %v3229_v0 }
 0x4fa   :  { %3331 = vmatprep.subr.mxu0 %v4029_v19 }
 0x4fd   :  { %3332 = vmatpush1.xpose.msra.mxu0 %v3228_v39  ;;  %v3133_v39 = vadd.f32 %v5587_v21, %v5505_v5  ;;  %v3396_v21 = vpop.permute.xlu0 %3395 }
 0x4fe   :  { %3333 = vmatprep.subr.mxu0 %v4029_v19 }
 0x4ff   :  { %v3236_v63 = vmax.f32 %v3133_v39, 0.0 }
 0x500   :  { %v5601_v38 = vpop.f32.mrf.mxu0 }
 0x501   :  { %3334 = vmatpush1.xpose.msra.mxu0 %v3227_v42  ;;  %v3149_v50 = vadd.f32 %v5601_v38, %v5505_v5  ;;  %v3128_v42 = vadd.f32 %v5505_v5, %v5599_v2  ;;  %v3413_v2 = vunpack.c.l.s4 %v4030_v32 }
 0x502   :  { %3335 = vmatprep.subr.mxu0 %v4029_v19  ;;  %v5606_v7 = vpop.f32.mrf.mxu0 }
 0x503   :  { %v3240_v10 = vmax.f32 %v3149_v50, 0.0  ;;  %v3141_v56 = vadd.f32 %v5505_v5, %v5606_v7  ;;  %v3235_v38 = vmax.f32 %v3128_v42, 0.0  ;;  %v3401_v7 = vrot.slane %v3396_v21, %v4382_v13 }
 0x504   :  { %v5611_v1 = vpop.f32.mrf.mxu0  ;;  %v3414_v11 = vunpack.c.0.s8 %v3413_v2  ;;  %v5800_v13 = vlaneseq }
 0x505   :  { %3336 = vmatpush1.xpose.msra.mxu0 %v3226_v4  ;;  %v3152_v53 = vadd.f32 %v5611_v1, %v5505_v5  ;;  %v3238_v0 = vmax.f32 %v3141_v56, 0.0 }
 0x506   :  { %3337 = vmatprep.subr.mxu0 %v4029_v19  ;;  %v5616_v20 = vpop.f32.mrf.mxu0  ;;  %vm3437_vm1 = vcmp.lt.s32.totalorder %v5800_v13, 504 }
 0x507   :  { %v3241_v25 = vmax.f32 %v3152_v53, 0.0  ;;  %v3144_v61 = vadd.f32 %v5505_v5, %v5616_v20 }
 0x509   :  { %3338 = vmatpush1.xpose.msra.mxu0 %v3225_v55  ;;  %v3239_v49 = vmax.f32 %v3144_v61, 0.0 }
 0x50a   :  { %3339 = vmatprep.subr.mxu0 %v4029_v19 }
 0x50d   :  { %3340 = vmatpush1.xpose.msra.mxu0 %v3224_v44 }
 0x50e   :  { %3341 = vmatprep.subr.mxu0 %v4029_v19 }
 0x510   :  { %v3760_v6 = vpop.f32.mrf.mxu0 }
 0x511   :  { %3342 = vmatpush1.xpose.msra.mxu0 %v3223_v31  ;;  %v3165_v16 = vadd.f32 %v3760_v6, %v5505_v5  ;;  %v5799_v31 = vld [vmem:[#allocation13_spill] sm:$0xff] }
 0x512   :  { %v3156_v52 = vpop.f32.mrf.mxu0  ;;  %3343 = vmatprep.subr.mxu0 %v4029_v19 }
 0x513   :  { %v3244_v18 = vmax.f32 %v3165_v16, 0.0  ;;  %v3157_v30 = vadd.f32 %v5505_v5, %v3156_v52 }
 0x514   :  { %v3761_v59 = vpop.f32.mrf.mxu0 }
 0x515   :  { %3344 = vmatpush1.xpose.msra.mxu0 %v3222_v51  ;;  %v3168_v29 = vadd.f32 %v3761_v59, %v5505_v5  ;;  %v3242_v43 = vmax.f32 %v3157_v30, 0.0 }
 0x516   :  { %3345 = vmatprep.subr.mxu0 %v4029_v19  ;;  %v3159_v15 = vpop.f32.mrf.mxu0 }
 0x517   :  { %v3245_v48 = vmax.f32 %v3168_v29, 0.0  ;;  %v3160_v23 = vadd.f32 %v5505_v5, %v3159_v15 }
 0x519   :  { %3346 = vmatpush1.xpose.msra.mxu0 %v3221_v45  ;;  %v3243_v27 = vmax.f32 %v3160_v23, 0.0 }
 0x51a   :  { %3347 = vmatprep.subr.mxu0 %v4029_v19 }
 0x51c   :  { %v3764_v33 = vpop.f32.mrf.mxu0 }
 0x51d   :  { %3348 = vmatpush1.xpose.msra.mxu0 %v3220_v58  ;;  %v3181_v47 = vadd.f32 %v3764_v33, %v5505_v5 }
 0x51e   :  { %v3172_v12 = vpop.f32.mrf.mxu0  ;;  %3349 = vmatprep.subr.mxu0 %v4029_v19 }
 0x51f   :  { %v3248_v36 = vmax.f32 %v3181_v47, 0.0  ;;  %v3173_v28 = vadd.f32 %v5505_v5, %v3172_v12 }
 0x520   :  { %v3765_v9 = vpop.f32.mrf.mxu0 }
 0x521   :  { %3350 = vmatpush1.xpose.msra.mxu0 %v3219_v46  ;;  %v3246_v34 = vmax.f32 %v3173_v28, 0.0 }
 0x522   :  { %3351 = vmatprep.subr.mxu0 %v4029_v19  ;;  %v3175_v57 = vpop.f32.mrf.mxu0 }
 0x523   :  { %v3176_v54 = vadd.f32 %v5505_v5, %v3175_v57 }
 0x525   :  { %3352 = vmatpush1.xpose.msra.mxu0 %v3218_v37  ;;  %v3247_v14 = vmax.f32 %v3176_v54, 0.0 }
 0x526   :  { %3355 = vmatprep.subr.mxu0 %v4029_v19 }
 0x529   :  { %3356 = vmatpush2.xpose.msra.mxu0 %v3248_v36 }
 0x52a   :  { %3357 = vmatprep.subr.mxu0 %v4029_v19 }
 0x52d   :  { %3358 = vmatpush2.xpose.msra.mxu0 %v3247_v14 }
 0x52e   :  { %3359 = vmatprep.subr.mxu0 %v4029_v19 }
 0x531   :  { %3360 = vmatpush2.xpose.msra.mxu0 %v3246_v34 }
 0x532   :  { %3361 = vmatprep.subr.mxu0 %v4029_v19 }
 0x535   :  { %3362 = vmatpush2.xpose.msra.mxu0 %v3245_v48 }
 0x536   :  { %3363 = vmatprep.subr.mxu0 %v4029_v19 }
 0x539   :  { %3364 = vmatpush2.xpose.msra.mxu0 %v3244_v18 }
 0x53a   :  { %3365 = vmatprep.subr.mxu0 %v4029_v19 }
 0x53d   :  { %3366 = vmatpush2.xpose.msra.mxu0 %v3243_v27 }
 0x53e   :  { %3367 = vmatprep.subr.mxu0 %v4029_v19 }
 0x541   :  { %3368 = vmatpush2.xpose.msra.mxu0 %v3242_v43 }
 0x542   :  { %3369 = vmatprep.subr.mxu0 %v4029_v19 }
 0x545   :  { %3370 = vmatpush2.xpose.msra.mxu0 %v3241_v25 }
 0x546   :  { %3371 = vmatprep.subr.mxu0 %v4029_v19 }
 0x549   :  { %3372 = vmatpush2.xpose.msra.mxu0 %v3240_v10 }
 0x54a   :  { %3373 = vmatprep.subr.mxu0 %v4029_v19 }
 0x54d   :  { %3374 = vmatpush2.xpose.msra.mxu0 %v3239_v49 }
 0x54e   :  { %3375 = vmatprep.subr.mxu0 %v4029_v19 }
 0x551   :  { %3376 = vmatpush2.xpose.msra.mxu0 %v3238_v0 }
 0x552   :  { %3377 = vmatprep.subr.mxu0 %v4029_v19 }
 0x555   :  { %3378 = vmatpush2.xpose.msra.mxu0 %v3237_v40 }
 0x556   :  { %3379 = vmatprep.subr.mxu0 %v4029_v19 }
 0x559   :  { %3380 = vmatpush2.xpose.msra.mxu0 %v3236_v63 }
 0x55a   :  { %3381 = vmatprep.subr.mxu0 %v4029_v19 }
 0x55d   :  { %3382 = vmatpush2.xpose.msra.mxu0 %v3235_v38 }
 0x55e   :  { %3383 = vmatprep.subr.mxu0 %v4029_v19  ;;  %v3417_v19 = vsub.s32 %v3414_v11, %v5799_v31 }
 0x561   :  { %3384 = vmatpush2.xpose.msra.mxu0 %v3234_v3 }
 0x564   :  { %3386 = vmatmul.mubr.f32.vlgmr.msra.gmra.mxu0 %v5575_v22 }
 0x5a9   :  { %v3316_v4 = vpop.f32.mrf.mxu1 }
 0x5aa   :  { %v3402_v1 = vadd.f32 %v3401_v7, %v3316_v4 }
 0x5ab   :  { %v3318_v55 = vpop.f32.mrf.mxu1 }
 0x5ac   :  { %v3403_v44 = vadd.f32 %v3401_v7, %v3318_v55 }
 0x5ae   :  { %v3410_v60 = vcombine.low %v3402_v1, %v3403_v44 }
 0x5b0   :  { %v3418_v35 = vrot.slane %v3410_v60, %v3417_v19 }
 0x624   :  { %v3387_v20 = vpop.f32.mrf.mxu0 }
 0x625   :  { %v3404_v17 = vadd.f32 %v3401_v7, %v3387_v20 }
 0x626   :  { %v3389_v5 = vpop.f32.mrf.mxu0 }
 0x627   :  { %v3405_v6 = vadd.f32 %v3401_v7, %v3389_v5 }
 0x629   :  { %v3411_v52 = vcombine.low %v3404_v17, %v3405_v6 }
 0x62b   :  { %v3425_v22 = vrot.slane %v3411_v52, %v3417_v19 }
 0x62d   :  { %v3426_v51 = vcombine.low %v3418_v35, %v3425_v22 }
 0x62f   :  { %v3433_v59 = vrot.slane %v3426_v51, %v3417_v19 }
 0x631   :  { %3439 = vst.msk [vmem:[#allocation9] sm:$0xf] %vm3437_vm1, %v3433_v59 }
 0x632   :  { %4006 = shalt.err (!%p4003_p5)
}
 0x633   :  { %3449 = dma.vmem_to_hbm [thread:$0]  %s3447_s9, 64, %s5692_s13, [#allocation5]  }
 0x634   :  { %4019 = dma.done.wait [#allocation5], 64  }
 0x635   :  { %4020 = vsyncadd [#allocation5], 4294967232 }
 0x636   :  { %3453 = vsyncpa [#allocation4], 1 }
 0x637   :  { %3454 = vsyncpa [#allocation7], 1 }
 0x638   :  { %3455 = vsyncpa [#allocation5], 1 }

</bundles_post_ra>
